<compile_context>
chip_gen: v5e
topology: v5e:2x2
jax: 0.10.0
libtpu: 0.0.40
codegen_flags: <defaults>
</compile_context>

<pallas_src>
import jax
import jax.numpy as jnp
from jax.experimental import pallas as pl
from jax.experimental.pallas import tpu as pltpu

# ----------------------------- model config (small) -----------------------------
B = 2          # batch
S = 8          # sequence length
D = 32         # model dim
H = 4          # attention heads
F = 64         # FFN hidden dim
K = 16         # codebook size
V = 32         # vocab size
LN_EPS = 1e-5

NT = B * S          # total tokens in the fused working layout
DH = D // H         # per-head dim
HN = H * NT         # stacked (head, token) rows for attention
VPAD = 128          # lane-dense padded vocab width for the output store
SCALE = 1.0 / (DH ** 0.5)
NEG_INF = -1e9


# ----------------------------- in-kernel helpers -----------------------------
def _layernorm(x, g, b):
    mu = jnp.mean(x, axis=-1, keepdims=True)
    var = jnp.mean((x - mu) ** 2, axis=-1, keepdims=True)
    return (x - mu) * jax.lax.rsqrt(var + LN_EPS) * g + b


def _softmax(x):
    m = jnp.max(x, axis=-1, keepdims=True)
    e = jnp.exp(x - m)
    # EUP reciprocal: denominator off the VPU critical path.
    return e * pl.reciprocal(jnp.sum(e, axis=-1, keepdims=True), approx=True)


# ----------------------------- Pallas kernel -----------------------------
def dvae_kernel(tok_ref, emb_ref, pos_ref, mask_ref, wd_ref, wf_ref, cb_ref, b_ref, o_ref):
    # tok_ref  : [NT, 1]    int32 token ids (batch*seq flattened)
    # emb_ref  : [V, D]     token embedding table
    # pos_ref  : [NT, D]    positional embedding pre-tiled across the batch
    # mask_ref : [HN, HN]   block-diagonal (same head AND same batch) additive mask
    # wd_ref   : [D, 8*128] D-row weights, 128-lane-aligned segments (Q cols pre-scaled)
    # wf_ref   : [F, 2*128] F-row weights (enc_W2, dec_W2)
    # cb_ref   : [K, D]     codebook
    # b_ref    : [18, 128]  biases / LN params, one 128-lane row each
    # o_ref    : [NT, VPAD] lane-dense vocab logits (first V columns are real)

    # ---- fused embedding gather (one-hot matmul) + positional add ----
    tok = tok_ref[...]                                                   # [NT, 1] int32
    vcol = jax.lax.broadcasted_iota(jnp.int32, (NT, V), 1)
    tok_onehot = (vcol == tok).astype(jnp.float32)                       # [NT, V]
    x = jnp.dot(tok_onehot, emb_ref[...],
                preferred_element_type=jnp.float32) + pos_ref[...]       # [NT, D]

    mask = mask_ref[...]                                                 # [HN, HN]

    def stack_heads(m2d):
        # [NT, D] -> [HN, DH], heads stacked head-major along the sublane axis.
        return m2d.reshape(NT, H, DH).swapaxes(0, 1).reshape(HN, DH)

    def mha(xin, Wqkv, bqkv, Wo, bo):
        # NOTE: SCALE is already folded into the Q columns of Wqkv (pack_params).
        qkv = jnp.dot(xin, Wqkv, preferred_element_type=jnp.float32) + bqkv   # [NT, 3D]
        Q = stack_heads(qkv[:, :D])
        Kh = stack_heads(qkv[:, D:2 * D])
        Vh = stack_heads(qkv[:, 2 * D:3 * D])
        # scores for all heads & batch elements in one matmul (rhs contracted on dim 1)
        s = jax.lax.dot_general(Q, Kh, (((1,), (1,)), ((), ())),
                                preferred_element_type=jnp.float32) + mask    # [HN, HN]
        p = _softmax(s)
        o = jnp.dot(p, Vh, preferred_element_type=jnp.float32)                # [HN, DH]
        # un-stack heads back to [NT, D] with a single expressed transpose
        attn = o.reshape(H, NT, DH).swapaxes(0, 1).reshape(NT, D)
        return jnp.dot(attn, Wo, preferred_element_type=jnp.float32) + bo

    def transformer_layer(xin, sb, fseg, rb):
        # weight segments (128-lane-aligned static slices of the fused slabs)
        Wqkv = wd_ref[:, sb * 128:sb * 128 + 3 * D]
        Wo = wd_ref[:, (sb + 1) * 128:(sb + 1) * 128 + D]
        W1 = wd_ref[:, (sb + 2) * 128:(sb + 2) * 128 + F]
        W2 = wf_ref[:, fseg * 128:fseg * 128 + D]
        # bias / LN rows
        bqkv = b_ref[rb + 0:rb + 1, :3 * D]
        bo = b_ref[rb + 1:rb + 2, :D]
        ln1g = b_ref[rb + 2:rb + 3, :D]
        ln1b = b_ref[rb + 3:rb + 4, :D]
        b1 = b_ref[rb + 4:rb + 5, :F]
        b2 = b_ref[rb + 5:rb + 6, :D]
        ln2g = b_ref[rb + 6:rb + 7, :D]
        ln2b = b_ref[rb + 7:rb + 8, :D]

        a = mha(xin, Wqkv, bqkv, Wo, bo)
        xn = _layernorm(xin + a, ln1g, ln1b)
        f = jnp.maximum(jnp.dot(xn, W1, preferred_element_type=jnp.float32) + b1, 0.0)
        f = jnp.dot(f, W2, preferred_element_type=jnp.float32) + b2
        return _layernorm(xn + f, ln2g, ln2b)

    # ---- transformer quantizer-encoder ----
    h = transformer_layer(x, sb=0, fseg=0, rb=0)

    # ---- discrete quantization: hard (first-occurrence) argmax + codebook lookup ----
    Wcode = wd_ref[:, 3 * 128:3 * 128 + K]
    bcode = b_ref[8:9, :K]
    logits = jnp.dot(h, Wcode, preferred_element_type=jnp.float32) + bcode     # [NT, K]
    m = jnp.max(logits, axis=-1, keepdims=True)
    kcol = jax.lax.broadcasted_iota(jnp.int32, logits.shape, 1)
    idx = jnp.min(jnp.where(logits == m, kcol, K), axis=-1, keepdims=True)
    code_onehot = (kcol == idx).astype(jnp.float32)                            # [NT, K]
    z = jnp.dot(code_onehot, cb_ref[...], preferred_element_type=jnp.float32)  # [NT, D]

    # ---- transformer decoder ----
    d = transformer_layer(z, sb=4, fseg=1, rb=9)

    # ---- lane-dense vocab projection (Wout padded to 128 output lanes) ----
    Wout = wd_ref[:, 7 * 128:8 * 128]
    bout = b_ref[17:18, :]
    o_ref[...] = jnp.dot(d, Wout, preferred_element_type=jnp.float32) + bout


# ----------------------------- parameters -----------------------------
def init_params(key):
    ks = jax.random.split(key, 11)
    nrm = lambda k, shape: 0.02 * jax.random.normal(k, shape, jnp.float32)
    return {
        "enc_Wqkv": nrm(ks[0], (D, 3 * D)),
        "enc_Wo":   nrm(ks[1], (D, D)),
        "enc_W1":   nrm(ks[2], (D, F)),
        "enc_W2":   nrm(ks[3], (F, D)),
        "Wcode":    nrm(ks[4], (D, K)),
        "codebook": nrm(ks[5], (K, D)),
        "dec_Wqkv": nrm(ks[6], (D, 3 * D)),
        "dec_Wo":   nrm(ks[7], (D, D)),
        "dec_W1":   nrm(ks[8], (D, F)),
        "dec_W2":   nrm(ks[9], (F, D)),
        "Wout":     nrm(ks[10], (D, V)),
    }
    # All biases are zeros, LN gains ones, LN biases zeros (built in pack_params).


def pack_params(p):
    def padc(a, w=128):
        return jnp.pad(a, ((0, 0), (0, w - a.shape[1])))

    def fold_scale(wqkv):
        # Fold 1/sqrt(DH) into the Q columns so the kernel skips the score scaling.
        return jnp.concatenate([wqkv[:, :D] * SCALE, wqkv[:, D:]], axis=1)

    # D-row weight slab: 8 segments of 128 lanes each.
    wd = jnp.concatenate(
        [padc(fold_scale(p["enc_Wqkv"])), padc(p["enc_Wo"]), padc(p["enc_W1"]), padc(p["Wcode"]),
         padc(fold_scale(p["dec_Wqkv"])), padc(p["dec_Wo"]), padc(p["dec_W1"]), padc(p["Wout"])],
        axis=1)                                                     # [D, 1024]
    # F-row weight slab.
    wf = jnp.concatenate([padc(p["enc_W2"]), padc(p["dec_W2"])], axis=1)  # [F, 256]

    # bias / LN slab: one 128-lane row per parameter vector.
    rows = []

    def row(v):
        v = jnp.asarray(v, jnp.float32).reshape(1, -1)
        rows.append(jnp.pad(v, ((0, 0), (0, 128 - v.shape[1]))))

    zeros = lambda n: jnp.zeros((n,), jnp.float32)
    ones = lambda n: jnp.ones((n,), jnp.float32)
    # NOTE: if the qkv bias were nonzero its Q third would also need the SCALE fold.
    # encoder layer rows 0..7
    row(zeros(3 * D)); row(zeros(D)); row(ones(D)); row(zeros(D))
    row(zeros(F));     row(zeros(D)); row(ones(D)); row(zeros(D))
    # quantizer bias row 8
    row(zeros(K))
    # decoder layer rows 9..16
    row(zeros(3 * D)); row(zeros(D)); row(ones(D)); row(zeros(D))
    row(zeros(F));     row(zeros(D)); row(ones(D)); row(zeros(D))
    # output bias row 17 (padded to 128 lanes to match the lane-dense output)
    row(zeros(V))
    bias = jnp.concatenate(rows, axis=0)                            # [18, 128]

    return wd, wf, p["codebook"], bias


def build_static_inputs(pos_emb):
    # Positional embedding pre-tiled across the batch (done once, outside the kernel).
    pos_tiled = jnp.tile(pos_emb, (B, 1))                           # [NT, D]
    # Block-diagonal attention mask over the stacked (head, token) layout, built once:
    # a query row may only attend to keys with the same head AND the same batch element.
    r = jnp.arange(HN)
    same_head = (r[:, None] // NT) == (r[None, :] // NT)
    same_batch = ((r[:, None] % NT) // S) == ((r[None, :] % NT) // S)
    attn_mask = jnp.where(same_head & same_batch, 0.0, NEG_INF).astype(jnp.float32)
    return pos_tiled, attn_mask


# ----------------------------- wrapper -----------------------------
@jax.jit
def dvae_forward(tokens, emb_table, pos_tiled, attn_mask, wd, wf, codebook, bias):
    tok2d = tokens.reshape(NT, 1).astype(jnp.int32)     # layout-only; gather is in-kernel

    vmem = pl.BlockSpec(memory_space=pltpu.MemorySpace.VMEM)
    out = pl.pallas_call(
        dvae_kernel,
        out_shape=jax.ShapeDtypeStruct((NT, VPAD), jnp.float32),
        in_specs=[vmem] * 8,
        out_specs=vmem,
        compiler_params=pltpu.CompilerParams(vmem_limit_bytes=32 * 1024 * 1024),
    )(tok2d, emb_table, pos_tiled, attn_mask, wd, wf, codebook, bias)

    return out[:, :V].reshape(B, S, V)                  # slice off lane padding


if __name__ == "__main__":
    key = jax.random.PRNGKey(0)
    key, k_emb, k_pos, k_tok, k_par = jax.random.split(key, 5)

    # embedding table + positional embedding (emb_layer of the PyTorch module)
    emb_table = 0.02 * jax.random.normal(k_emb, (V, D), jnp.float32)
    pos_emb = 0.02 * jax.random.normal(k_pos, (S, D), jnp.float32)

    params = init_params(k_par)
    wd, wf, codebook, bias = pack_params(params)
    pos_tiled, attn_mask = build_static_inputs(pos_emb)

    tokens = jax.random.randint(k_tok, (B, S), 0, V, dtype=jnp.int32)

    out = dvae_forward(tokens, emb_table, pos_tiled, attn_mask, wd, wf, codebook, bias)
    jax.block_until_ready(out)
    assert out.shape == (B, S, V) and out.dtype == jnp.float32
    assert bool(jnp.all(jnp.isfinite(out)))
    print("KERNEL_OK")
</pallas_src>

<mosaic_0001>
module attributes {stable_mosaic.version = 11 : i64} {
  func.func @dvae_kernel(%arg0: memref<16x1xi32, #tpu.memory_space<vmem>>, %arg1: memref<32x32xf32, #tpu.memory_space<vmem>>, %arg2: memref<16x32xf32, #tpu.memory_space<vmem>>, %arg3: memref<64x64xf32, #tpu.memory_space<vmem>>, %arg4: memref<32x1024xf32, #tpu.memory_space<vmem>>, %arg5: memref<64x256xf32, #tpu.memory_space<vmem>>, %arg6: memref<16x32xf32, #tpu.memory_space<vmem>>, %arg7: memref<18x128xf32, #tpu.memory_space<vmem>>, %arg8: memref<16x128xf32, #tpu.memory_space<vmem>>) attributes {dimension_semantics = [], scalar_prefetch = 0 : i64, scratch_operands = 0 : i64, tpu.core_type = #tpu.core_type<tc>} {
    %c0 = arith.constant 0 : index
    %c0_0 = arith.constant 0 : index
    %0 = vector.load %arg0[%c0, %c0_0] : memref<16x1xi32, #tpu.memory_space<vmem>>, vector<16x1xi32>
    %1 = tpu.iota {dimensions = array<i32: 1>} : vector<16x32xi32>
    %2 = vector.broadcast %0 : vector<16x1xi32> to vector<16x32xi32>
    %3 = arith.cmpi eq, %1, %2 : vector<16x32xi32>
    %4 = arith.extui %3 : vector<16x32xi1> to vector<16x32xi32>
    %5 = arith.sitofp %4 : vector<16x32xi32> to vector<16x32xf32>
    %c0_1 = arith.constant 0 : index
    %c0_2 = arith.constant 0 : index
    %6 = vector.load %arg1[%c0_1, %c0_2] : memref<32x32xf32, #tpu.memory_space<vmem>>, vector<32x32xf32>
    %cst = arith.constant dense<0.000000e+00> : vector<16x32xf32>
    %7 = tpu.matmul %5, %6, %cst {dimension_numbers = #tpu.dot_dimension_numbers<[1], [0], [0], [1], [0, 0, 1, 1], [], []>} : vector<16x32xf32>, vector<32x32xf32>, vector<16x32xf32> -> vector<16x32xf32>
    %c0_3 = arith.constant 0 : index
    %c0_4 = arith.constant 0 : index
    %8 = vector.load %arg2[%c0_3, %c0_4] : memref<16x32xf32, #tpu.memory_space<vmem>>, vector<16x32xf32>
    %9 = arith.addf %7, %8 : vector<16x32xf32>
    %c0_5 = arith.constant 0 : index
    %c0_6 = arith.constant 0 : index
    %10 = vector.load %arg3[%c0_5, %c0_6] : memref<64x64xf32, #tpu.memory_space<vmem>>, vector<64x64xf32>
    %c0_7 = arith.constant 0 : index
    %c0_8 = arith.constant 0 : index
    %11 = vector.load %arg4[%c0_7, %c0_8] : memref<32x1024xf32, #tpu.memory_space<vmem>>, vector<32x96xf32>
    %c0_9 = arith.constant 0 : index
    %c128 = arith.constant 128 : index
    %12 = vector.load %arg4[%c0_9, %c128] : memref<32x1024xf32, #tpu.memory_space<vmem>>, vector<32x32xf32>
    %c0_10 = arith.constant 0 : index
    %c256 = arith.constant 256 : index
    %13 = vector.load %arg4[%c0_10, %c256] : memref<32x1024xf32, #tpu.memory_space<vmem>>, vector<32x64xf32>
    %c0_11 = arith.constant 0 : index
    %c0_12 = arith.constant 0 : index
    %14 = vector.load %arg5[%c0_11, %c0_12] : memref<64x256xf32, #tpu.memory_space<vmem>>, vector<64x32xf32>
    %c0_13 = arith.constant 0 : index
    %c0_14 = arith.constant 0 : index
    %15 = vector.load %arg7[%c0_13, %c0_14] : memref<18x128xf32, #tpu.memory_space<vmem>>, vector<1x96xf32>
    %c1 = arith.constant 1 : index
    %c0_15 = arith.constant 0 : index
    %16 = vector.load %arg7[%c1, %c0_15] : memref<18x128xf32, #tpu.memory_space<vmem>>, vector<1x32xf32>
    %c2 = arith.constant 2 : index
    %c0_16 = arith.constant 0 : index
    %17 = vector.load %arg7[%c2, %c0_16] : memref<18x128xf32, #tpu.memory_space<vmem>>, vector<1x32xf32>
    %c3 = arith.constant 3 : index
    %c0_17 = arith.constant 0 : index
    %18 = vector.load %arg7[%c3, %c0_17] : memref<18x128xf32, #tpu.memory_space<vmem>>, vector<1x32xf32>
    %c4 = arith.constant 4 : index
    %c0_18 = arith.constant 0 : index
    %19 = vector.load %arg7[%c4, %c0_18] : memref<18x128xf32, #tpu.memory_space<vmem>>, vector<1x64xf32>
    %c5 = arith.constant 5 : index
    %c0_19 = arith.constant 0 : index
    %20 = vector.load %arg7[%c5, %c0_19] : memref<18x128xf32, #tpu.memory_space<vmem>>, vector<1x32xf32>
    %c6 = arith.constant 6 : index
    %c0_20 = arith.constant 0 : index
    %21 = vector.load %arg7[%c6, %c0_20] : memref<18x128xf32, #tpu.memory_space<vmem>>, vector<1x32xf32>
    %c7 = arith.constant 7 : index
    %c0_21 = arith.constant 0 : index
    %22 = vector.load %arg7[%c7, %c0_21] : memref<18x128xf32, #tpu.memory_space<vmem>>, vector<1x32xf32>
    %cst_22 = arith.constant dense<0.000000e+00> : vector<16x96xf32>
    %23 = tpu.matmul %9, %11, %cst_22 {dimension_numbers = #tpu.dot_dimension_numbers<[1], [0], [0], [1], [0, 0, 1, 1], [], []>} : vector<16x32xf32>, vector<32x96xf32>, vector<16x96xf32> -> vector<16x96xf32>
    %24 = vector.broadcast %15 : vector<1x96xf32> to vector<16x96xf32>
    %25 = arith.addf %23, %24 : vector<16x96xf32>
    %26 = vector.extract_strided_slice %25 {offsets = [0, 0], sizes = [16, 32], strides = [1, 1]} : vector<16x96xf32> to vector<16x32xf32>
    %27 = vector.shape_cast %26 : vector<16x32xf32> to vector<16x4x8xf32>
    %28 = tpu.transpose %27, [1, 0, 2] : vector<16x4x8xf32> -> vector<4x16x8xf32>
    %29 = vector.shape_cast %28 : vector<4x16x8xf32> to vector<64x8xf32>
    %30 = vector.extract_strided_slice %25 {offsets = [0, 32], sizes = [16, 32], strides = [1, 1]} : vector<16x96xf32> to vector<16x32xf32>
    %31 = vector.shape_cast %30 : vector<16x32xf32> to vector<16x4x8xf32>
    %32 = tpu.transpose %31, [1, 0, 2] : vector<16x4x8xf32> -> vector<4x16x8xf32>
    %33 = vector.shape_cast %32 : vector<4x16x8xf32> to vector<64x8xf32>
    %34 = vector.extract_strided_slice %25 {offsets = [0, 64], sizes = [16, 32], strides = [1, 1]} : vector<16x96xf32> to vector<16x32xf32>
    %35 = vector.shape_cast %34 : vector<16x32xf32> to vector<16x4x8xf32>
    %36 = tpu.transpose %35, [1, 0, 2] : vector<16x4x8xf32> -> vector<4x16x8xf32>
    %37 = vector.shape_cast %36 : vector<4x16x8xf32> to vector<64x8xf32>
    %cst_23 = arith.constant dense<0.000000e+00> : vector<64x64xf32>
    %38 = tpu.matmul %29, %33, %cst_23 {dimension_numbers = #tpu.dot_dimension_numbers<[1], [1], [0], [0], [0, 0, 1, 0], [], []>} : vector<64x8xf32>, vector<64x8xf32>, vector<64x64xf32> -> vector<64x64xf32>
    %39 = arith.addf %38, %10 : vector<64x64xf32>
    %cst_24 = arith.constant dense<0xFF800000> : vector<64xf32>
    %40 = vector.multi_reduction <maximumf>, %39, %cst_24 [1] : vector<64x64xf32> to vector<64xf32>
    %41 = vector.shape_cast %40 : vector<64xf32> to vector<64x1xf32>
    %42 = vector.broadcast %41 : vector<64x1xf32> to vector<64x64xf32>
    %43 = arith.subf %39, %42 : vector<64x64xf32>
    %44 = math.exp %43 : vector<64x64xf32>
    %cst_25 = arith.constant dense<0.000000e+00> : vector<64xf32>
    %45 = vector.multi_reduction <add>, %44, %cst_25 [1] : vector<64x64xf32> to vector<64xf32>
    %46 = vector.shape_cast %45 : vector<64xf32> to vector<64x1xf32>
    %47 = tpu.reciprocal %46 {approx = true} : vector<64x1xf32> -> vector<64x1xf32>
    %48 = vector.broadcast %47 : vector<64x1xf32> to vector<64x64xf32>
    %49 = arith.mulf %44, %48 : vector<64x64xf32>
    %cst_26 = arith.constant dense<0.000000e+00> : vector<64x8xf32>
    %50 = tpu.matmul %49, %37, %cst_26 {dimension_numbers = #tpu.dot_dimension_numbers<[1], [0], [0], [1], [0, 0, 1, 1], [], []>} : vector<64x64xf32>, vector<64x8xf32>, vector<64x8xf32> -> vector<64x8xf32>
    %51 = vector.shape_cast %50 : vector<64x8xf32> to vector<4x16x8xf32>
    %52 = tpu.transpose %51, [1, 0, 2] : vector<4x16x8xf32> -> vector<16x4x8xf32>
    %53 = vector.shape_cast %52 : vector<16x4x8xf32> to vector<16x32xf32>
    %cst_27 = arith.constant dense<0.000000e+00> : vector<16x32xf32>
    %54 = tpu.matmul %53, %12, %cst_27 {dimension_numbers = #tpu.dot_dimension_numbers<[1], [0], [0], [1], [0, 0, 1, 1], [], []>} : vector<16x32xf32>, vector<32x32xf32>, vector<16x32xf32> -> vector<16x32xf32>
    %55 = vector.broadcast %16 : vector<1x32xf32> to vector<16x32xf32>
    %56 = arith.addf %54, %55 : vector<16x32xf32>
    %57 = arith.addf %9, %56 : vector<16x32xf32>
    %cst_28 = arith.constant dense<0.000000e+00> : vector<16xf32>
    %58 = vector.multi_reduction <add>, %57, %cst_28 [1] : vector<16x32xf32> to vector<16xf32>
    %59 = vector.shape_cast %58 : vector<16xf32> to vector<16x1xf32>
    %cst_29 = arith.constant 3.200000e+01 : f32
    %60 = vector.broadcast %cst_29 : f32 to vector<16x1xf32>
    %61 = arith.divf %59, %60 : vector<16x1xf32>
    %62 = vector.broadcast %61 : vector<16x1xf32> to vector<16x32xf32>
    %63 = arith.subf %57, %62 : vector<16x32xf32>
    %64 = arith.mulf %63, %63 : vector<16x32xf32>
    %cst_30 = arith.constant dense<0.000000e+00> : vector<16xf32>
    %65 = vector.multi_reduction <add>, %64, %cst_30 [1] : vector<16x32xf32> to vector<16xf32>
    %66 = vector.shape_cast %65 : vector<16xf32> to vector<16x1xf32>
    %cst_31 = arith.constant 3.200000e+01 : f32
    %67 = vector.broadcast %cst_31 : f32 to vector<16x1xf32>
    %68 = arith.divf %66, %67 : vector<16x1xf32>
    %69 = vector.broadcast %61 : vector<16x1xf32> to vector<16x32xf32>
    %70 = arith.subf %57, %69 : vector<16x32xf32>
    %cst_32 = arith.constant 9.99999974E-6 : f32
    %71 = vector.broadcast %cst_32 : f32 to vector<16x1xf32>
    %72 = arith.addf %68, %71 : vector<16x1xf32>
    %73 = math.rsqrt %72 : vector<16x1xf32>
    %74 = vector.broadcast %73 : vector<16x1xf32> to vector<16x32xf32>
    %75 = arith.mulf %70, %74 : vector<16x32xf32>
    %76 = vector.broadcast %17 : vector<1x32xf32> to vector<16x32xf32>
    %77 = arith.mulf %75, %76 : vector<16x32xf32>
    %78 = vector.broadcast %18 : vector<1x32xf32> to vector<16x32xf32>
    %79 = arith.addf %77, %78 : vector<16x32xf32>
    %cst_33 = arith.constant dense<0.000000e+00> : vector<16x64xf32>
    %80 = tpu.matmul %79, %13, %cst_33 {dimension_numbers = #tpu.dot_dimension_numbers<[1], [0], [0], [1], [0, 0, 1, 1], [], []>} : vector<16x32xf32>, vector<32x64xf32>, vector<16x64xf32> -> vector<16x64xf32>
    %81 = vector.broadcast %19 : vector<1x64xf32> to vector<16x64xf32>
    %82 = arith.addf %80, %81 : vector<16x64xf32>
    %cst_34 = arith.constant 0.000000e+00 : f32
    %83 = vector.broadcast %cst_34 : f32 to vector<16x64xf32>
    %84 = arith.maximumf %82, %83 : vector<16x64xf32>
    %cst_35 = arith.constant dense<0.000000e+00> : vector<16x32xf32>
    %85 = tpu.matmul %84, %14, %cst_35 {dimension_numbers = #tpu.dot_dimension_numbers<[1], [0], [0], [1], [0, 0, 1, 1], [], []>} : vector<16x64xf32>, vector<64x32xf32>, vector<16x32xf32> -> vector<16x32xf32>
    %86 = vector.broadcast %20 : vector<1x32xf32> to vector<16x32xf32>
    %87 = arith.addf %85, %86 : vector<16x32xf32>
    %88 = arith.addf %79, %87 : vector<16x32xf32>
    %cst_36 = arith.constant dense<0.000000e+00> : vector<16xf32>
    %89 = vector.multi_reduction <add>, %88, %cst_36 [1] : vector<16x32xf32> to vector<16xf32>
    %90 = vector.shape_cast %89 : vector<16xf32> to vector<16x1xf32>
    %cst_37 = arith.constant 3.200000e+01 : f32
    %91 = vector.broadcast %cst_37 : f32 to vector<16x1xf32>
    %92 = arith.divf %90, %91 : vector<16x1xf32>
    %93 = vector.broadcast %92 : vector<16x1xf32> to vector<16x32xf32>
    %94 = arith.subf %88, %93 : vector<16x32xf32>
    %95 = arith.mulf %94, %94 : vector<16x32xf32>
    %cst_38 = arith.constant dense<0.000000e+00> : vector<16xf32>
    %96 = vector.multi_reduction <add>, %95, %cst_38 [1] : vector<16x32xf32> to vector<16xf32>
    %97 = vector.shape_cast %96 : vector<16xf32> to vector<16x1xf32>
    %cst_39 = arith.constant 3.200000e+01 : f32
    %98 = vector.broadcast %cst_39 : f32 to vector<16x1xf32>
    %99 = arith.divf %97, %98 : vector<16x1xf32>
    %100 = vector.broadcast %92 : vector<16x1xf32> to vector<16x32xf32>
    %101 = arith.subf %88, %100 : vector<16x32xf32>
    %cst_40 = arith.constant 9.99999974E-6 : f32
    %102 = vector.broadcast %cst_40 : f32 to vector<16x1xf32>
    %103 = arith.addf %99, %102 : vector<16x1xf32>
    %104 = math.rsqrt %103 : vector<16x1xf32>
    %105 = vector.broadcast %104 : vector<16x1xf32> to vector<16x32xf32>
    %106 = arith.mulf %101, %105 : vector<16x32xf32>
    %107 = vector.broadcast %21 : vector<1x32xf32> to vector<16x32xf32>
    %108 = arith.mulf %106, %107 : vector<16x32xf32>
    %109 = vector.broadcast %22 : vector<1x32xf32> to vector<16x32xf32>
    %110 = arith.addf %108, %109 : vector<16x32xf32>
    %c0_41 = arith.constant 0 : index
    %c384 = arith.constant 384 : index
    %111 = vector.load %arg4[%c0_41, %c384] : memref<32x1024xf32, #tpu.memory_space<vmem>>, vector<32x16xf32>
    %c8 = arith.constant 8 : index
    %c0_42 = arith.constant 0 : index
    %112 = vector.load %arg7[%c8, %c0_42] : memref<18x128xf32, #tpu.memory_space<vmem>>, vector<1x16xf32>
    %cst_43 = arith.constant dense<0.000000e+00> : vector<16x16xf32>
    %113 = tpu.matmul %110, %111, %cst_43 {dimension_numbers = #tpu.dot_dimension_numbers<[1], [0], [0], [1], [0, 0, 1, 1], [], []>} : vector<16x32xf32>, vector<32x16xf32>, vector<16x16xf32> -> vector<16x16xf32>
    %114 = vector.broadcast %112 : vector<1x16xf32> to vector<16x16xf32>
    %115 = arith.addf %113, %114 : vector<16x16xf32>
    %cst_44 = arith.constant dense<0xFF800000> : vector<16xf32>
    %116 = vector.multi_reduction <maximumf>, %115, %cst_44 [1] : vector<16x16xf32> to vector<16xf32>
    %117 = vector.shape_cast %116 : vector<16xf32> to vector<16x1xf32>
    %118 = tpu.iota {dimensions = array<i32: 1>} : vector<16x16xi32>
    %119 = vector.broadcast %117 : vector<16x1xf32> to vector<16x16xf32>
    %120 = arith.cmpf oeq, %115, %119 : vector<16x16xf32>
    %c16_i32 = arith.constant 16 : i32
    %121 = vector.broadcast %c16_i32 : i32 to vector<16x16xi32>
    %122 = arith.select %120, %118, %121 : vector<16x16xi1>, vector<16x16xi32>
    %cst_45 = arith.constant dense<2147483647> : vector<16xi32>
    %123 = vector.multi_reduction <minsi>, %122, %cst_45 [1] : vector<16x16xi32> to vector<16xi32>
    %124 = vector.shape_cast %123 : vector<16xi32> to vector<16x1xi32>
    %125 = vector.broadcast %124 : vector<16x1xi32> to vector<16x16xi32>
    %126 = arith.cmpi eq, %118, %125 : vector<16x16xi32>
    %127 = arith.extui %126 : vector<16x16xi1> to vector<16x16xi32>
    %128 = arith.sitofp %127 : vector<16x16xi32> to vector<16x16xf32>
    %c0_46 = arith.constant 0 : index
    %c0_47 = arith.constant 0 : index
    %129 = vector.load %arg6[%c0_46, %c0_47] : memref<16x32xf32, #tpu.memory_space<vmem>>, vector<16x32xf32>
    %cst_48 = arith.constant dense<0.000000e+00> : vector<16x32xf32>
    %130 = tpu.matmul %128, %129, %cst_48 {dimension_numbers = #tpu.dot_dimension_numbers<[1], [0], [0], [1], [0, 0, 1, 1], [], []>} : vector<16x16xf32>, vector<16x32xf32>, vector<16x32xf32> -> vector<16x32xf32>
    %c0_49 = arith.constant 0 : index
    %c512 = arith.constant 512 : index
    %131 = vector.load %arg4[%c0_49, %c512] : memref<32x1024xf32, #tpu.memory_space<vmem>>, vector<32x96xf32>
    %c0_50 = arith.constant 0 : index
    %c640 = arith.constant 640 : index
    %132 = vector.load %arg4[%c0_50, %c640] : memref<32x1024xf32, #tpu.memory_space<vmem>>, vector<32x32xf32>
    %c0_51 = arith.constant 0 : index
    %c768 = arith.constant 768 : index
    %133 = vector.load %arg4[%c0_51, %c768] : memref<32x1024xf32, #tpu.memory_space<vmem>>, vector<32x64xf32>
    %c0_52 = arith.constant 0 : index
    %c128_53 = arith.constant 128 : index
    %134 = vector.load %arg5[%c0_52, %c128_53] : memref<64x256xf32, #tpu.memory_space<vmem>>, vector<64x32xf32>
    %c9 = arith.constant 9 : index
    %c0_54 = arith.constant 0 : index
    %135 = vector.load %arg7[%c9, %c0_54] : memref<18x128xf32, #tpu.memory_space<vmem>>, vector<1x96xf32>
    %c10 = arith.constant 10 : index
    %c0_55 = arith.constant 0 : index
    %136 = vector.load %arg7[%c10, %c0_55] : memref<18x128xf32, #tpu.memory_space<vmem>>, vector<1x32xf32>
    %c11 = arith.constant 11 : index
    %c0_56 = arith.constant 0 : index
    %137 = vector.load %arg7[%c11, %c0_56] : memref<18x128xf32, #tpu.memory_space<vmem>>, vector<1x32xf32>
    %c12 = arith.constant 12 : index
    %c0_57 = arith.constant 0 : index
    %138 = vector.load %arg7[%c12, %c0_57] : memref<18x128xf32, #tpu.memory_space<vmem>>, vector<1x32xf32>
    %c13 = arith.constant 13 : index
    %c0_58 = arith.constant 0 : index
    %139 = vector.load %arg7[%c13, %c0_58] : memref<18x128xf32, #tpu.memory_space<vmem>>, vector<1x64xf32>
    %c14 = arith.constant 14 : index
    %c0_59 = arith.constant 0 : index
    %140 = vector.load %arg7[%c14, %c0_59] : memref<18x128xf32, #tpu.memory_space<vmem>>, vector<1x32xf32>
    %c15 = arith.constant 15 : index
    %c0_60 = arith.constant 0 : index
    %141 = vector.load %arg7[%c15, %c0_60] : memref<18x128xf32, #tpu.memory_space<vmem>>, vector<1x32xf32>
    %c16 = arith.constant 16 : index
    %c0_61 = arith.constant 0 : index
    %142 = vector.load %arg7[%c16, %c0_61] : memref<18x128xf32, #tpu.memory_space<vmem>>, vector<1x32xf32>
    %cst_62 = arith.constant dense<0.000000e+00> : vector<16x96xf32>
    %143 = tpu.matmul %130, %131, %cst_62 {dimension_numbers = #tpu.dot_dimension_numbers<[1], [0], [0], [1], [0, 0, 1, 1], [], []>} : vector<16x32xf32>, vector<32x96xf32>, vector<16x96xf32> -> vector<16x96xf32>
    %144 = vector.broadcast %135 : vector<1x96xf32> to vector<16x96xf32>
    %145 = arith.addf %143, %144 : vector<16x96xf32>
    %146 = vector.extract_strided_slice %145 {offsets = [0, 0], sizes = [16, 32], strides = [1, 1]} : vector<16x96xf32> to vector<16x32xf32>
    %147 = vector.shape_cast %146 : vector<16x32xf32> to vector<16x4x8xf32>
    %148 = tpu.transpose %147, [1, 0, 2] : vector<16x4x8xf32> -> vector<4x16x8xf32>
    %149 = vector.shape_cast %148 : vector<4x16x8xf32> to vector<64x8xf32>
    %150 = vector.extract_strided_slice %145 {offsets = [0, 32], sizes = [16, 32], strides = [1, 1]} : vector<16x96xf32> to vector<16x32xf32>
    %151 = vector.shape_cast %150 : vector<16x32xf32> to vector<16x4x8xf32>
    %152 = tpu.transpose %151, [1, 0, 2] : vector<16x4x8xf32> -> vector<4x16x8xf32>
    %153 = vector.shape_cast %152 : vector<4x16x8xf32> to vector<64x8xf32>
    %154 = vector.extract_strided_slice %145 {offsets = [0, 64], sizes = [16, 32], strides = [1, 1]} : vector<16x96xf32> to vector<16x32xf32>
    %155 = vector.shape_cast %154 : vector<16x32xf32> to vector<16x4x8xf32>
    %156 = tpu.transpose %155, [1, 0, 2] : vector<16x4x8xf32> -> vector<4x16x8xf32>
    %157 = vector.shape_cast %156 : vector<4x16x8xf32> to vector<64x8xf32>
    %cst_63 = arith.constant dense<0.000000e+00> : vector<64x64xf32>
    %158 = tpu.matmul %149, %153, %cst_63 {dimension_numbers = #tpu.dot_dimension_numbers<[1], [1], [0], [0], [0, 0, 1, 0], [], []>} : vector<64x8xf32>, vector<64x8xf32>, vector<64x64xf32> -> vector<64x64xf32>
    %159 = arith.addf %158, %10 : vector<64x64xf32>
    %cst_64 = arith.constant dense<0xFF800000> : vector<64xf32>
    %160 = vector.multi_reduction <maximumf>, %159, %cst_64 [1] : vector<64x64xf32> to vector<64xf32>
    %161 = vector.shape_cast %160 : vector<64xf32> to vector<64x1xf32>
    %162 = vector.broadcast %161 : vector<64x1xf32> to vector<64x64xf32>
    %163 = arith.subf %159, %162 : vector<64x64xf32>
    %164 = math.exp %163 : vector<64x64xf32>
    %cst_65 = arith.constant dense<0.000000e+00> : vector<64xf32>
    %165 = vector.multi_reduction <add>, %164, %cst_65 [1] : vector<64x64xf32> to vector<64xf32>
    %166 = vector.shape_cast %165 : vector<64xf32> to vector<64x1xf32>
    %167 = tpu.reciprocal %166 {approx = true} : vector<64x1xf32> -> vector<64x1xf32>
    %168 = vector.broadcast %167 : vector<64x1xf32> to vector<64x64xf32>
    %169 = arith.mulf %164, %168 : vector<64x64xf32>
    %cst_66 = arith.constant dense<0.000000e+00> : vector<64x8xf32>
    %170 = tpu.matmul %169, %157, %cst_66 {dimension_numbers = #tpu.dot_dimension_numbers<[1], [0], [0], [1], [0, 0, 1, 1], [], []>} : vector<64x64xf32>, vector<64x8xf32>, vector<64x8xf32> -> vector<64x8xf32>
    %171 = vector.shape_cast %170 : vector<64x8xf32> to vector<4x16x8xf32>
    %172 = tpu.transpose %171, [1, 0, 2] : vector<4x16x8xf32> -> vector<16x4x8xf32>
    %173 = vector.shape_cast %172 : vector<16x4x8xf32> to vector<16x32xf32>
    %cst_67 = arith.constant dense<0.000000e+00> : vector<16x32xf32>
    %174 = tpu.matmul %173, %132, %cst_67 {dimension_numbers = #tpu.dot_dimension_numbers<[1], [0], [0], [1], [0, 0, 1, 1], [], []>} : vector<16x32xf32>, vector<32x32xf32>, vector<16x32xf32> -> vector<16x32xf32>
    %175 = vector.broadcast %136 : vector<1x32xf32> to vector<16x32xf32>
    %176 = arith.addf %174, %175 : vector<16x32xf32>
    %177 = arith.addf %130, %176 : vector<16x32xf32>
    %cst_68 = arith.constant dense<0.000000e+00> : vector<16xf32>
    %178 = vector.multi_reduction <add>, %177, %cst_68 [1] : vector<16x32xf32> to vector<16xf32>
    %179 = vector.shape_cast %178 : vector<16xf32> to vector<16x1xf32>
    %cst_69 = arith.constant 3.200000e+01 : f32
    %180 = vector.broadcast %cst_69 : f32 to vector<16x1xf32>
    %181 = arith.divf %179, %180 : vector<16x1xf32>
    %182 = vector.broadcast %181 : vector<16x1xf32> to vector<16x32xf32>
    %183 = arith.subf %177, %182 : vector<16x32xf32>
    %184 = arith.mulf %183, %183 : vector<16x32xf32>
    %cst_70 = arith.constant dense<0.000000e+00> : vector<16xf32>
    %185 = vector.multi_reduction <add>, %184, %cst_70 [1] : vector<16x32xf32> to vector<16xf32>
    %186 = vector.shape_cast %185 : vector<16xf32> to vector<16x1xf32>
    %cst_71 = arith.constant 3.200000e+01 : f32
    %187 = vector.broadcast %cst_71 : f32 to vector<16x1xf32>
    %188 = arith.divf %186, %187 : vector<16x1xf32>
    %189 = vector.broadcast %181 : vector<16x1xf32> to vector<16x32xf32>
    %190 = arith.subf %177, %189 : vector<16x32xf32>
    %cst_72 = arith.constant 9.99999974E-6 : f32
    %191 = vector.broadcast %cst_72 : f32 to vector<16x1xf32>
    %192 = arith.addf %188, %191 : vector<16x1xf32>
    %193 = math.rsqrt %192 : vector<16x1xf32>
    %194 = vector.broadcast %193 : vector<16x1xf32> to vector<16x32xf32>
    %195 = arith.mulf %190, %194 : vector<16x32xf32>
    %196 = vector.broadcast %137 : vector<1x32xf32> to vector<16x32xf32>
    %197 = arith.mulf %195, %196 : vector<16x32xf32>
    %198 = vector.broadcast %138 : vector<1x32xf32> to vector<16x32xf32>
    %199 = arith.addf %197, %198 : vector<16x32xf32>
    %cst_73 = arith.constant dense<0.000000e+00> : vector<16x64xf32>
    %200 = tpu.matmul %199, %133, %cst_73 {dimension_numbers = #tpu.dot_dimension_numbers<[1], [0], [0], [1], [0, 0, 1, 1], [], []>} : vector<16x32xf32>, vector<32x64xf32>, vector<16x64xf32> -> vector<16x64xf32>
    %201 = vector.broadcast %139 : vector<1x64xf32> to vector<16x64xf32>
    %202 = arith.addf %200, %201 : vector<16x64xf32>
    %cst_74 = arith.constant 0.000000e+00 : f32
    %203 = vector.broadcast %cst_74 : f32 to vector<16x64xf32>
    %204 = arith.maximumf %202, %203 : vector<16x64xf32>
    %cst_75 = arith.constant dense<0.000000e+00> : vector<16x32xf32>
    %205 = tpu.matmul %204, %134, %cst_75 {dimension_numbers = #tpu.dot_dimension_numbers<[1], [0], [0], [1], [0, 0, 1, 1], [], []>} : vector<16x64xf32>, vector<64x32xf32>, vector<16x32xf32> -> vector<16x32xf32>
    %206 = vector.broadcast %140 : vector<1x32xf32> to vector<16x32xf32>
    %207 = arith.addf %205, %206 : vector<16x32xf32>
    %208 = arith.addf %199, %207 : vector<16x32xf32>
    %cst_76 = arith.constant dense<0.000000e+00> : vector<16xf32>
    %209 = vector.multi_reduction <add>, %208, %cst_76 [1] : vector<16x32xf32> to vector<16xf32>
    %210 = vector.shape_cast %209 : vector<16xf32> to vector<16x1xf32>
    %cst_77 = arith.constant 3.200000e+01 : f32
    %211 = vector.broadcast %cst_77 : f32 to vector<16x1xf32>
    %212 = arith.divf %210, %211 : vector<16x1xf32>
    %213 = vector.broadcast %212 : vector<16x1xf32> to vector<16x32xf32>
    %214 = arith.subf %208, %213 : vector<16x32xf32>
    %215 = arith.mulf %214, %214 : vector<16x32xf32>
    %cst_78 = arith.constant dense<0.000000e+00> : vector<16xf32>
    %216 = vector.multi_reduction <add>, %215, %cst_78 [1] : vector<16x32xf32> to vector<16xf32>
    %217 = vector.shape_cast %216 : vector<16xf32> to vector<16x1xf32>
    %cst_79 = arith.constant 3.200000e+01 : f32
    %218 = vector.broadcast %cst_79 : f32 to vector<16x1xf32>
    %219 = arith.divf %217, %218 : vector<16x1xf32>
    %220 = vector.broadcast %212 : vector<16x1xf32> to vector<16x32xf32>
    %221 = arith.subf %208, %220 : vector<16x32xf32>
    %cst_80 = arith.constant 9.99999974E-6 : f32
    %222 = vector.broadcast %cst_80 : f32 to vector<16x1xf32>
    %223 = arith.addf %219, %222 : vector<16x1xf32>
    %224 = math.rsqrt %223 : vector<16x1xf32>
    %225 = vector.broadcast %224 : vector<16x1xf32> to vector<16x32xf32>
    %226 = arith.mulf %221, %225 : vector<16x32xf32>
    %227 = vector.broadcast %141 : vector<1x32xf32> to vector<16x32xf32>
    %228 = arith.mulf %226, %227 : vector<16x32xf32>
    %229 = vector.broadcast %142 : vector<1x32xf32> to vector<16x32xf32>
    %230 = arith.addf %228, %229 : vector<16x32xf32>
    %c0_81 = arith.constant 0 : index
    %c896 = arith.constant 896 : index
    %231 = vector.load %arg4[%c0_81, %c896] : memref<32x1024xf32, #tpu.memory_space<vmem>>, vector<32x128xf32>
    %c17 = arith.constant 17 : index
    %c0_82 = arith.constant 0 : index
    %232 = vector.load %arg7[%c17, %c0_82] : memref<18x128xf32, #tpu.memory_space<vmem>>, vector<1x128xf32>
    %cst_83 = arith.constant dense<0.000000e+00> : vector<16x128xf32>
    %233 = tpu.matmul %230, %231, %cst_83 {dimension_numbers = #tpu.dot_dimension_numbers<[1], [0], [0], [1], [0, 0, 1, 1], [], []>} : vector<16x32xf32>, vector<32x128xf32>, vector<16x128xf32> -> vector<16x128xf32>
    %234 = vector.broadcast %232 : vector<1x128xf32> to vector<16x128xf32>
    %235 = arith.addf %233, %234 : vector<16x128xf32>
    %c0_84 = arith.constant 0 : index
    %c0_85 = arith.constant 0 : index
    %236 = vector.load %arg8[%c0_84, %c0_85] : memref<16x128xf32, #tpu.memory_space<vmem>>, vector<16x128xf32>
    tpu.vector_store %arg8[%c0_84, %c0_85], %235 {strides = array<i32>} : memref<16x128xf32, #tpu.memory_space<vmem>>, vector<16x128xf32>,
    return
  }
}

</mosaic_0001>

<bundles_post_ra>
// kernel: dvae_forward.1
= control target key start
LH: loop header
LB: loop body
LE: loop exit
PB: predicated region body
PF: predicated region fallthrough
CT: control target
= control target key end

     0   :  { %13 = vsyncpa [#allocation3], 0  ;;  %s4998_s0 = inlined_call_operand.vmem [shape: s32[16,1], index: 0, kind: input, shape index: {}]   ;;  %s4999_s1 = inlined_call_operand.hbm [shape: f32[32,32], index: 1, kind: input, shape index: {}]   ;;  %s5000_s2 = inlined_call_operand.hbm [shape: f32[16,32], index: 2, kind: input, shape index: {}]   ;;  %s5001_s3 = inlined_call_operand.hbm [shape: f32[64,64], index: 3, kind: input, shape index: {}]   ;;  %s5002_s4 = inlined_call_operand.hbm [shape: f32[32,1024], index: 4, kind: input, shape index: {}]   ;;  %s5003_s5 = inlined_call_operand.hbm [shape: f32[64,256], index: 5, kind: input, shape index: {}]   ;;  %s5004_s6 = inlined_call_operand.hbm [shape: f32[16,32], index: 6, kind: input, shape index: {}]   ;;  %s5005_s7 = inlined_call_operand.vmem [shape: f32[18,128], index: 7, kind: input, shape index: {}]   ;;  %s5006_s8 = inlined_call_operand.vmem [shape: f32[16,128], index: 8, kind: output, shape index: {}]  }
   0x1   :  { %14 = vsyncpa [#allocation5], 0 }
   0x2   :  { %15 = vsyncpa [#allocation8], 0 }
   0x3   :  { %16 = vsyncpa [#allocation11], 0  ;;  %s36_s29 = sshll.u32 %s5000_s2, 4  ;;  %s3711_s30 = smov [#allocation4]   ;;  %s37_s29 = int_to_ptr.hbm [resolvable:$true] %s36_s29 }
   0x4   :  { %s38_s9 = sshll.u32 %s3711_s30, 4  ;;  %s62_s12 = sshll.u32 %s5002_s4, 4  ;;  %s39_s9 = int_to_ptr.vmem [resolvable:$true] %s38_s9  ;;  %s63_s12 = int_to_ptr.hbm [resolvable:$true] %s62_s12 }
   0x5   :  { %s3712_s13 = smov 128   ;;  %s3713_s14 = smov 8  }
   0x6   :  { %44 = dma.hbm_to_vmem [thread:$0]  %s37_s29, 256, %s39_s9, [#allocation5], %s3712_s13, %s3712_s13, %s3713_s14  }
   0x7   :  { %s3714_s15 = smov [#allocation7]   ;;  %s3715_s17 = smov 1024  }
   0x8   :  { %s64_s16 = sshll.u32 %s3714_s15, 4  ;;  %s3716_s2 = smov 64   ;;  %s65_s16 = int_to_ptr.vmem [resolvable:$true] %s64_s16 }
   0x9   :  { %70 = dma.hbm_to_vmem [thread:$0]  %s63_s12, 4096, %s65_s16, [#allocation8], %s3715_s17, %s3715_s17, %s3716_s2  }
   0xa   :  { %s23_s20 = sshll.u32 %s4999_s1, 4  ;;  %s3717_s4 = smov [#allocation2]   ;;  %s24_s20 = int_to_ptr.hbm [resolvable:$true] %s23_s20 }
   0xb   :  { %s25_s21 = sshll.u32 %s3717_s4, 4  ;;  %s49_s24 = sshll.u32 %s5001_s3, 4  ;;  %s26_s21 = int_to_ptr.vmem [resolvable:$true] %s25_s21  ;;  %s50_s24 = int_to_ptr.hbm [resolvable:$true] %s49_s24 }
   0xc   :  { %31 = dma.hbm_to_vmem [thread:$0]  %s24_s20, 512, %s26_s21, [#allocation3], %s3712_s13, %s3712_s13, %s3713_s14  }
   0xd   :  { %s3718_s25 = smov [#allocation6]   ;;  %s75_s29 = sshll.u32 %s5003_s5, 4  ;;  %s76_s29 = int_to_ptr.hbm [resolvable:$true] %s75_s29 }
   0xe   :  { %s51_s26 = sshll.u32 %s3718_s25, 4  ;;  %s3719_s1 = smov [#allocation9]   ;;  %s52_s26 = int_to_ptr.vmem [resolvable:$true] %s51_s26 }
   0xf   :  { %57 = dma.hbm_to_vmem [thread:$0]  %s50_s24, 1024, %s52_s26, [#allocation5], %s3712_s13, %s3712_s13, %s3713_s14  }
  0x10   :  { %s77_s30 = sshll.u32 %s3719_s1, 4  ;;  %s88_s10 = sshll.u32 %s5004_s6, 4  ;;  %s78_s30 = int_to_ptr.vmem [resolvable:$true] %s77_s30  ;;  %s89_s10 = int_to_ptr.hbm [resolvable:$true] %s88_s10 }
  0x11   :  { %s3720_s11 = smov 256   ;;  %s3721_s12 = smov 16  }
  0x12   :  { %83 = dma.hbm_to_vmem [thread:$0]  %s76_s29, 2048, %s78_s30, [#allocation8], %s3720_s11, %s3720_s11, %s3721_s12  }
  0x13   :  { %s3722_s15 = smov [#allocation10]  }
  0x14   :  { %s90_s5 = sshll.u32 %s3722_s15, 4  ;;  %s91_s5 = int_to_ptr.vmem [resolvable:$true] %s90_s5 }
  0x15   :  { %96 = dma.hbm_to_vmem [thread:$0]  %s89_s10, 256, %s91_s5, [#allocation11], %s3712_s13, %s3712_s13, %s3713_s14  }
  0x16   :  { %3703 = dma.done.wait [#allocation3], 512  }
  0x17   :  { %3704 = vsyncadd [#allocation3], 4294966784 }
  0x18   :  { %3705 = dma.done.wait [#allocation5], 1280  }
  0x19   :  { %3706 = vsyncadd [#allocation5], 4294966016 }
  0x1a   :  { %3707 = dma.done.wait [#allocation8], 6144  }
  0x1b   :  { %3708 = vsyncadd [#allocation8], 4294961152 }
  0x1c   :  { %3709 = dma.done.wait [#allocation11], 256  }
  0x1d   :  { %3710 = vsyncadd [#allocation11], 4294967040  ;;  %v3723_v0 = vmov 0   ;;  %v123_v1 = vld [vmem:[%s4998_s0] sm:$0xff]  ;;  %v142_v2 = vld [vmem:[#allocation2 + $0x18] sm:$0xff]  ;;  %v125_v9 = vlaneseq  ;;  %vm145_vm0 = vcmask 261120  }
  0x1e   :  { %3410 = vset.pattern.permute.xlu0 %v3723_v0  ;;  %164 = vmatpush.msra.mxu0 %v142_v2  ;;  %v141_v3 = vld [vmem:[#allocation2 + $0x10] sm:$0xff]  ;;  %v140_v4 = vld [vmem:[#allocation2 + $0x8] sm:$0xff]  ;;  %v139_v6 = vld [vmem:[#allocation2] sm:$0xff]  ;;  %v3724_v12 = vmov 0.0   ;;  %s3725_s19 = smov 104   ;;  %s3726_s20 = smov 96  }
  0x1f   :  { %128 = vperm.xlu0 %3410, %v123_v1   ;;  %3376 = vmatpush.msra.mxu1 %v142_v2  ;;  %v124_v5 = vld [vmem:[%s4998_s0 + $0x8] sm:$0xff]  ;;  %v186_v7 = vld [vmem:[#allocation7 + $0xc0] sm:$0xff]  ;;  %v3816_v10 = vand.u32 127, %v125_v9  ;;  %v143_v18 = vld [vmem:[#allocation4] sm:$0xff]  ;;  %s3727_s4 = smov 120   ;;  %s3728_s21 = smov 112  }
  0x20   :  { %165 = vmatpush.msra.mxu0 %v141_v3  ;;  %v185_v8 = vld [vmem:[#allocation7 + $0x80] sm:$0xff]  ;;  %v144_v21 = vld [vmem:[#allocation4 + $0x8] sm:$0xff]  ;;  %v3451_v24 = vld [vmem:[%s5005_s7] ss:$0 sm:$0xff]  ;;  %v3729_v31 = vmov 1983009808  }
  0x21   :  { %3377 = vmatpush.msra.mxu1 %v141_v3  ;;  %v184_v16 = vld [vmem:[#allocation7 + $0x40] sm:$0xff]  ;;  %v267_v32 = vunpack.c.l.s4 %v3729_v31  ;;  %vm262_vm3 = vcmask 1047556   ;;  %v3730_v39 = vmov 1934713408   ;;  %vm970_vm4 = vcmask 64512   ;;  %s3731_s22 = smov 24  }
  0x22   :  { %166 = vmatpush.msra.mxu0 %v140_v4  ;;  %v183_v17 = vld [vmem:[#allocation7] sm:$0xff]  ;;  %v291_v40 = vunpack.c.l.s4 %v3730_v39  ;;  %vm1060_vm5 = vcmask 523264   ;;  %vm1460_vm6 = vcmask 130048   ;;  %vm1463_vm7 = vcmask 195584  }
  0x23   :  { %3378 = vmatpush.msra.mxu1 %v140_v4  ;;  %v3862_v37 = vunpack.c.0.s8 %v267_v32 }
  0x24   :  { %167 = vmatpush.msra.mxu0 %v139_v6  ;;  %v3871_v45 = vunpack.c.0.s8 %v291_v40 }
  0x25   :  { %3379 = vmatpush.msra.mxu1 %v139_v6 }
  0x27   :  { %131 = vperm.xlu0 %3410, %v124_v5   ;;  %230 = vmatpush.msrb.mxu1 %v186_v7 }
  0x29   :  { %231 = vmatpush.msrb.mxu1 %v185_v8 }
  0x2b   :  { %232 = vmatpush.msrb.mxu1 %v184_v16 }
  0x2d   :  { %233 = vmatpush.msrb.mxu1 %v183_v17 }
  0x91   :  { %v129_v11 = vpop.permute.xlu0 %128 }
  0x92   :  { %vm133_vm1 = vcmp.eq.s32.totalorder %v3816_v10, %v129_v11 }
  0x93   :  { %v3300_v13 = vsel %vm133_vm1, 1.0, %v3724_v12 }
  0x94   :  { %3302 = vmatmul.msk.f32.vlgmr.msra.gmra.mxu0 %vm145_vm0, %v3300_v13 }
  0x99   :  { %v132_v14 = vpop.permute.xlu0 %131 }
  0x9a   :  { %vm134_vm2 = vcmp.eq.s32.totalorder %v3816_v10, %v132_v14 }
  0x9b   :  { %v3301_v15 = vsel %vm134_vm2, 1.0, %v3724_v12 }
  0x9c   :  { %3303 = vmatmul.msk.f32.vlgmr.msra.gmra.mxu1 %vm145_vm0, %v3301_v15 }
 0x111   :  { %v169_v19 = vpop.f32.mrf.mxu0 }
 0x112   :  { %v3824_v20 = vadd.f32 %v169_v19, %v143_v18 }
 0x114   :  { %3304 = vmatmul.msk.f32.vlgmr.msrb.gmra.mxu1 %vm145_vm0, %v3824_v20 }
 0x119   :  { %v172_v22 = vpop.f32.mrf.mxu1 }
 0x11a   :  { %v3828_v23 = vadd.f32 %v172_v22, %v144_v21 }
 0x11c   :  { %3305 = vmatmul.msk.f32.gmra.mxu1 %vm145_vm0, %v3828_v23 }
 0x191   :  { %v235_v25 = vpop.f32.mrf.mxu1 }
 0x192   :  { %v3835_v26 = vadd.f32 %v3451_v24, %v235_v25 }
 0x194   :  { %255 = vrot.lane.b32.xlu0 %v3835_v26, %s3725_s19 }
 0x199   :  { %v238_v27 = vpop.f32.mrf.mxu1 }
 0x19a   :  { %v3839_v28 = vadd.f32 %v3451_v24, %v238_v27 }
 0x19c   :  { %484 = vrot.lane.b32.xlu0 %v3839_v28, %s3726_s20  ;;  %245 = vrot.lane.b32.xlu2 %v3839_v28, %s3727_s4  ;;  %v320_v35 = vrot.slane %v3839_v28, 4 }
 0x19d   :  { %251 = vrot.lane.b32.xlu1 %v3839_v28, %s3728_s21 }
 0x1a4   :  { %249 = vrot.lane.b32.xlu2 %v3835_v26, %s3728_s21 }
 0x1a5   :  { %257 = vrot.lane.b32.xlu1 %v3839_v28, %s3725_s19 }
 0x1ad   :  { %243 = vrot.lane.b32.xlu1 %v3835_v26, %s3727_s4 }
 0x1f6   :  { %v3853_v29 = vpop.permute.xlu2 %245 }
 0x1f7   :  { %v332_v42 = vrot.slane %v3853_v29, 4 }
 0x1fe   :  { %v3855_v30 = vpop.permute.xlu2 %249 }
 0x1ff   :  { %490 = vrot.lane.b32.xlu0 %v3855_v30, %s3726_s20 }
 0x206   :  { %v3890_v62 = vpop.permute.xlu0 %255 }
 0x20f   :  { %v252_v33 = vpop.permute.xlu1 %251 }
 0x210   :  { %v318_v34 = vrot.slane %v252_v33, 4  ;;  %492 = vrot.lane.b32.xlu2 %v252_v33, %s3726_s20  ;;  %v321_v36 = vsel %vm262_vm3, %v252_v33, %v320_v35  ;;  %v3411_v13 = vpack.i.bf16 %v3839_v28, %v252_v33 }
 0x211   :  { %v329_v41 = vperm.slane %v321_v36, %v3862_v37 }
 0x212   :  { %v319_v38 = vsel %vm262_vm3, %v318_v34, %v3839_v28 }
 0x213   :  { %v325_v43 = vperm.slane %v319_v38, %v3862_v37  ;;  %v356_v48 = vrot.slane %v329_v41, 4 }
 0x215   :  { %v344_v51 = vrot.slane %v325_v43, 4 }
 0x217   :  { %v3869_v44 = vpop.permute.xlu1 %257 }
 0x218   :  { %v330_v46 = vrot.slane %v3869_v44, 4  ;;  %v333_v47 = vsel %vm262_vm3, %v3869_v44, %v332_v42  ;;  %488 = vrot.lane.b32.xlu2 %v3853_v29, %s3726_s20  ;;  %496 = vrot.lane.b32.xlu1 %v3869_v44, %s3726_s20 }
 0x219   :  { %v341_v49 = vperm.slane %v333_v47, %v3862_v37 }
 0x21a   :  { %v331_v50 = vsel %vm262_vm3, %v330_v46, %v3853_v29 }
 0x21b   :  { %v337_v52 = vperm.slane %v331_v50, %v3862_v37  ;;  %v354_v53 = vrot.slane %v341_v49, 4  ;;  %v357_v54 = vsel %vm262_vm3, %v341_v49, %v356_v48 }
 0x21c   :  { %v365_v55 = vperm.slane %v357_v54, %v3871_v45  ;;  %v261_v54 = vrot.slane %v3855_v30, 4 }
 0x21d   :  { %v342_v56 = vrot.slane %v337_v52, 4  ;;  %v345_v57 = vsel %vm262_vm3, %v337_v52, %v344_v51  ;;  %v355_v58 = vsel %vm262_vm3, %v354_v53, %v329_v41  ;;  %v485_v51 = vpop.permute.xlu0 %484 }
 0x21e   :  { %v353_v59 = vperm.slane %v345_v57, %v3871_v45  ;;  %v361_v60 = vperm.slane %v355_v58, %v3871_v45  ;;  %v372_v61 = vrot.slane %v365_v55, 4  ;;  %v564_v52 = vrot.slane %v485_v51, 4 }
 0x21f   :  { %v343_v63 = vsel %vm262_vm3, %v342_v56, %v325_v43  ;;  %v3893_v0 = vpop.permute.xlu1 %243  ;;  %v264_v55 = vrot.slane %v3835_v26, 4 }
 0x220   :  { %v370_v1 = vrot.slane %v361_v60, 4  ;;  %v373_v2 = vsel %vm262_vm3, 0.0, %v372_v61  ;;  %494 = vrot.lane.b32.xlu2 %v3890_v62, %s3726_s20  ;;  %482 = vrot.lane.b32.xlu1 %v3835_v26, %s3726_s20  ;;  %v349_v3 = vperm.slane %v343_v63, %v3871_v45  ;;  %v368_v4 = vrot.slane %v353_v59, 4 }
 0x221   :  { %486 = vrot.lane.b32.xlu0 %v3893_v0, %s3726_s20  ;;  %v439_v5 = vsel %vm262_vm3, %v372_v61, %v361_v60  ;;  %v444_v6 = vrot.slane %v373_v2, 4  ;;  %v276_v58 = vrot.slane %v3893_v0, 4  ;;  %v265_v59 = vsel %vm262_vm3, %v3855_v30, %v264_v55 }
 0x222   :  { %v366_v7 = vrot.slane %v349_v3, 4  ;;  %v371_v8 = vsel %vm262_vm3, 0.0, %v370_v1  ;;  %v369_v9 = vsel %vm262_vm3, 0.0, %v368_v4  ;;  %v428_v11 = vsel %vm262_vm3, %v368_v4, %v349_v3 }
 0x223   :  { %v433_v15 = vrot.slane %v369_v9, 4  ;;  %v445_v16 = vsel %vm262_vm3, %v444_v6, %v371_v8  ;;  %v432_v17 = vperm.slane %v428_v11, %v3862_v37  ;;  %v443_v21 = vperm.slane %v439_v5, %v3862_v37 }
 0x224   :  { %v367_v14 = vsel %vm262_vm3, 0.0, %v366_v7  ;;  %v449_v19 = vperm.slane %v445_v16, %v3862_v37  ;;  %v263_v61 = vsel %vm262_vm3, %v261_v54, %v3835_v26  ;;  %v3947_v2 = vperm.slane %v265_v59, %v3862_v37 }
 0x225   :  { %v434_v18 = vsel %vm262_vm3, %v433_v15, %v367_v14  ;;  %v452_v27 = vrot.slane %v432_v17, 4  ;;  %v464_v31 = vrot.slane %v443_v21, 4  ;;  %v277_v3 = vsel %vm262_vm3, %v3890_v62, %v276_v58 }
 0x226   :  { %v438_v22 = vperm.slane %v434_v18, %v3862_v37  ;;  %v462_v24 = vrot.slane %v449_v19, 4  ;;  %v3953_v6 = vperm.slane %v263_v61, %v3862_v37  ;;  %v274_v7 = vrot.slane %v3890_v62, 4 }
 0x227   :  { %v465_v40 = vsel %vm262_vm3, %v449_v19, %v464_v31  ;;  %v3961_v16 = vperm.slane %v277_v3, %v3862_v37 }
 0x228   :  { %3412 = vrot.lane.b32.xlu2 %v3411_v13, %s3716_s2  ;;  %v450_v25 = vrot.slane %v438_v22, 4  ;;  %v463_v28 = vsel %vm262_vm3, %v462_v24, %v443_v21  ;;  %v453_v34 = vsel %vm262_vm3, %v438_v22, %v452_v27  ;;  %v473_v42 = vperm.slane %v465_v40, %v3871_v45 }
 0x229   :  { %v469_v33 = vperm.slane %v463_v28, %v3871_v45  ;;  %v461_v38 = vperm.slane %v453_v34, %v3871_v45  ;;  %v275_v15 = vsel %vm262_vm3, %v274_v7, %v3893_v0  ;;  %v288_v24 = vrot.slane %v3953_v6, 4 }
 0x22a   :  { %v451_v32 = vsel %vm262_vm3, %v450_v25, %v432_v17  ;;  %v478_v47 = vrot.slane %v473_v42, 4  ;;  %v300_v25 = vrot.slane %v3947_v2, 4  ;;  %v3970_v31 = vperm.slane %v275_v15, %v3862_v37 }
 0x22b   :  { %v457_v35 = vperm.slane %v451_v32, %v3871_v45  ;;  %v474_v36 = vrot.slane %v469_v33, 4  ;;  %v480_v46 = vrot.slane %v461_v38, 4 }
 0x22c   :  { %v3934_v49 = vsel %vm262_vm3, %v478_v47, %v461_v38  ;;  %v3979_v40 = vsel %vm262_vm3, %v3961_v16, %v300_v25 }
 0x22d   :  { %v476_v39 = vrot.slane %v457_v35, 4  ;;  %v3924_v41 = vsel %vm262_vm3, %v474_v36, %v457_v35  ;;  %v3931_v48 = vsel %vm262_vm3, %v473_v42, %v480_v46  ;;  %v298_v35 = vrot.slane %v3961_v16, 4 }
 0x22f   :  { %v3928_v43 = vsel %vm262_vm3, %v469_v33, %v476_v39 }
 0x26a   :  { %v493_v50 = vpop.permute.xlu2 %492 }
 0x26b   :  { %v562_v53 = vrot.slane %v493_v50, 4  ;;  %v565_v56 = vsel %vm262_vm3, %v493_v50, %v564_v52 }
 0x26c   :  { %v573_v63 = vperm.slane %v565_v56, %v3862_v37 }
 0x26d   :  { %v563_v60 = vsel %vm262_vm3, %v562_v53, %v485_v51 }
 0x26e   :  { %v569_v4 = vperm.slane %v563_v60, %v3862_v37  ;;  %v600_v13 = vrot.slane %v573_v63, 4 }
 0x270   :  { %v588_v18 = vrot.slane %v569_v4, 4 }
 0x271   :  { %v491_v8 = vpop.permute.xlu0 %490 }
 0x272   :  { %v489_v57 = vpop.permute.xlu2 %488  ;;  %v506_v42 = vrot.slane %v491_v8, 4 }
 0x273   :  { %v576_v1 = vrot.slane %v489_v57, 4 }
 0x27a   :  { %v495_v27 = vpop.permute.xlu2 %494 }
 0x27b   :  { %v518_v46 = vrot.slane %v495_v27, 4 }
 0x28a   :  { %v497_v5 = vpop.permute.xlu1 %496 }
 0x28b   :  { %v574_v9 = vrot.slane %v497_v5, 4  ;;  %v577_v11 = vsel %vm262_vm3, %v497_v5, %v576_v1 }
 0x28c   :  { %v585_v14 = vperm.slane %v577_v11, %v3862_v37 }
 0x28d   :  { %v575_v17 = vsel %vm262_vm3, %v574_v9, %v489_v57 }
 0x28e   :  { %v581_v19 = vperm.slane %v575_v17, %v3862_v37  ;;  %v598_v21 = vrot.slane %v585_v14, 4  ;;  %v601_v22 = vsel %vm262_vm3, %v585_v14, %v600_v13 }
 0x28f   :  { %v609_v28 = vperm.slane %v601_v22, %v3871_v45 }
 0x290   :  { %v586_v32 = vrot.slane %v581_v19, 4  ;;  %v589_v33 = vsel %vm262_vm3, %v581_v19, %v588_v18  ;;  %v599_v34 = vsel %vm262_vm3, %v598_v21, %v573_v63 }
 0x291   :  { %v597_v36 = vperm.slane %v589_v33, %v3871_v45  ;;  %v605_v38 = vperm.slane %v599_v34, %v3871_v45  ;;  %v616_v39 = vrot.slane %v609_v28, 4 }
 0x292   :  { %v587_v47 = vsel %vm262_vm3, %v586_v32, %v569_v4  ;;  %v483_v50 = vpop.permute.xlu1 %482 }
 0x293   :  { %v593_v51 = vperm.slane %v587_v47, %v3871_v45  ;;  %v612_v52 = vrot.slane %v597_v36, 4  ;;  %v614_v53 = vrot.slane %v605_v38, 4  ;;  %v617_v54 = vsel %vm262_vm3, 0.0, %v616_v39  ;;  %v487_v55 = vpop.permute.xlu0 %486 }
 0x294   :  { %v683_v56 = vsel %vm262_vm3, %v616_v39, %v605_v38  ;;  %v688_v57 = vrot.slane %v617_v54, 4  ;;  %v519_v58 = vsel %vm262_vm3, %v518_v46, %v487_v55  ;;  %v520_v59 = vrot.slane %v487_v55, 4 }
 0x295   :  { %v610_v60 = vrot.slane %v593_v51, 4  ;;  %v613_v61 = vsel %vm262_vm3, 0.0, %v612_v52  ;;  %v525_v63 = vperm.slane %v519_v58, %v3862_v37  ;;  %v507_v1 = vsel %vm262_vm3, %v506_v42, %v483_v50 }
 0x296   :  { %v677_v3 = vrot.slane %v613_v61, 4  ;;  %v521_v4 = vsel %vm262_vm3, %v495_v27, %v520_v59  ;;  %v508_v5 = vrot.slane %v483_v50, 4  ;;  %v513_v7 = vperm.slane %v507_v1, %v3862_v37 }
 0x297   :  { %v529_v9 = vperm.slane %v521_v4, %v3862_v37  ;;  %v530_v11 = vrot.slane %v525_v63, 4  ;;  %v611_v13 = vsel %vm262_vm3, 0.0, %v610_v60  ;;  %v615_v14 = vsel %vm262_vm3, 0.0, %v614_v53 }
 0x298   :  { %v509_v15 = vsel %vm262_vm3, %v491_v8, %v508_v5  ;;  %v532_v16 = vrot.slane %v513_v7, 4  ;;  %v672_v17 = vsel %vm262_vm3, %v612_v52, %v593_v51  ;;  %v678_v18 = vsel %vm262_vm3, %v677_v3, %v611_v13 }
 0x299   :  { %v542_v19 = vrot.slane %v529_v9, 4  ;;  %v517_v21 = vperm.slane %v509_v15, %v3862_v37  ;;  %v531_v22 = vsel %vm262_vm3, %v530_v11, %v513_v7  ;;  %v4000_v25 = vperm.slane %v672_v17, %v3862_v37 }
 0x29a   :  { %v533_v27 = vsel %vm262_vm3, %v525_v63, %v532_v16  ;;  %v537_v28 = vperm.slane %v531_v22, %v3871_v45  ;;  %v4005_v32 = vperm.slane %v678_v18, %v3862_v37  ;;  %v4008_v8 = vperm.slane %v683_v56, %v3862_v37 }
 0x29b   :  { %v541_v33 = vperm.slane %v533_v27, %v3871_v45  ;;  %v543_v34 = vsel %vm262_vm3, %v542_v19, %v517_v21  ;;  %v544_v36 = vrot.slane %v517_v21, 4  ;;  %v689_v38 = vsel %vm262_vm3, %v688_v57, %v615_v14 }
 0x29c   :  { %v286_v39 = vrot.slane %v3970_v31, 4  ;;  %v549_v42 = vperm.slane %v543_v34, %v3871_v45  ;;  %v4016_v46 = vperm.slane %v689_v38, %v3862_v37  ;;  %v696_v47 = vrot.slane %v4000_v25, 4 }
 0x29d   :  { %v545_v50 = vsel %vm262_vm3, %v529_v9, %v544_v36  ;;  %v554_v51 = vrot.slane %v537_v28, 4  ;;  %v556_v52 = vrot.slane %v541_v33, 4  ;;  %v708_v53 = vrot.slane %v4008_v8, 4 }
 0x29e   :  { %v299_v54 = vsel %vm262_vm3, %v298_v35, %v3947_v2  ;;  %v309_v55 = vperm.slane %v3979_v40, %v3871_v45  ;;  %v553_v56 = vperm.slane %v545_v50, %v3871_v45  ;;  %v697_v57 = vsel %vm262_vm3, %v4005_v32, %v696_v47 }
 0x29f   :  { %v557_v58 = vsel %vm262_vm3, 0.0, %v556_v52  ;;  %v618_v59 = vsel %vm262_vm3, %v556_v52, %v537_v28  ;;  %v705_v60 = vperm.slane %v697_v57, %v3871_v45  ;;  %v709_v61 = vsel %vm262_vm3, %v4016_v46, %v708_v53 }
 0x2a0   :  { %v558_v63 = vrot.slane %v549_v42, 4  ;;  %v560_v1 = vrot.slane %v553_v56, 4  ;;  %v622_v2 = vperm.slane %v618_v59, %v3862_v37  ;;  %v623_v35 = vrot.slane %v557_v58, 4 }
 0x2a1   :  { %v555_v40 = vsel %vm262_vm3, 0.0, %v554_v51  ;;  %v717_v3 = vperm.slane %v709_v61, %v3871_v45  ;;  %v724_v4 = vrot.slane %v705_v60, 4  ;;  %v289_v17 = vsel %vm262_vm3, %v3970_v31, %v288_v24 }
 0x2a2   :  { %v561_v5 = vsel %vm262_vm3, 0.0, %v560_v1  ;;  %v624_v7 = vsel %vm262_vm3, %v623_v35, %v555_v40  ;;  %v629_v9 = vsel %vm262_vm3, %v560_v1, %v549_v42  ;;  %v642_v11 = vrot.slane %v622_v2, 4 }
 0x2a3   :  { %v725_v13 = vsel %vm262_vm3, %v717_v3, %v724_v4  ;;  %v628_v14 = vperm.slane %v624_v7, %v3862_v37  ;;  %v633_v15 = vperm.slane %v629_v9, %v3862_v37  ;;  %v634_v16 = vrot.slane %v561_v5, 4 }
 0x2a4   :  { %v305_v18 = vperm.slane %v299_v54, %v3871_v45  ;;  %3306 = vmatpush.xpose.msk.msra.mxu2 %vm970_vm4, %v725_v13  ;;  %v559_v19 = vsel %vm262_vm3, 0.0, %v558_v63  ;;  %v316_v21 = vrot.slane %v309_v55, 4  ;;  %v287_v36 = vsel %vm262_vm3, %v286_v39, %v3953_v6 }
 0x2a5   :  { %v635_v22 = vsel %vm262_vm3, %v634_v16, %v559_v19  ;;  %v643_v27 = vsel %vm262_vm3, %v628_v14, %v642_v11  ;;  %v654_v28 = vrot.slane %v633_v15, 4  ;;  %v297_v24 = vperm.slane %v289_v17, %v3871_v45 }
 0x2a6   :  { %v639_v33 = vperm.slane %v635_v22, %v3862_v37  ;;  %v651_v34 = vperm.slane %v643_v27, %v3871_v45  ;;  %v694_v42 = vrot.slane %v4005_v32, 4  ;;  %v314_v47 = vrot.slane %v305_v18, 4 }
 0x2a7   :  { %v317_v50 = vsel %vm262_vm3, 0.0, %v316_v21  ;;  %v293_v52 = vperm.slane %v287_v36, %v3871_v45  ;;  %v312_v53 = vrot.slane %v297_v24, 4  ;;  %v722_v55 = vrot.slane %v717_v3, 4 }
 0x2a8   :  { %v655_v31 = vsel %vm262_vm3, %v639_v33, %v654_v28  ;;  %v670_v38 = vrot.slane %v651_v34, 4  ;;  %v390_v56 = vrot.slane %v317_v50, 4  ;;  %v695_v6 = vsel %vm262_vm3, %v694_v42, %v4000_v25 }
 0x2a9   :  { %v663_v51 = vperm.slane %v655_v31, %v3871_v45  ;;  %v640_v39 = vrot.slane %v628_v14, 4  ;;  %v315_v32 = vsel %vm262_vm3, 0.0, %v314_v47  ;;  %v310_v57 = vrot.slane %v293_v52, 4 }
 0x2aa   :  { %v706_v58 = vrot.slane %v4016_v46, 4  ;;  %v313_v59 = vsel %vm262_vm3, 0.0, %v312_v53  ;;  %v723_v61 = vsel %vm262_vm3, %v722_v55, %v705_v60  ;;  %v701_v1 = vperm.slane %v695_v6, %v3871_v45 }
 0x2ab   :  { %v671_v54 = vsel %vm262_vm3, %v663_v51, %v670_v38  ;;  %v668_v63 = vrot.slane %v663_v51, 4  ;;  %v641_v35 = vsel %vm262_vm3, %v640_v39, %v622_v2  ;;  %v652_v40 = vrot.slane %v639_v33, 4 }
 0x2ac   :  { %3307 = vmatpush.xpose.msk.msra.mxu2 %vm970_vm4, %v671_v54  ;;  %v391_v25 = vsel %vm262_vm3, %v390_v56, %v315_v32  ;;  %v379_v3 = vrot.slane %v313_v59, 4  ;;  %v707_v4 = vsel %vm262_vm3, %v706_v58, %v4008_v8  ;;  %v311_v46 = vsel %vm262_vm3, 0.0, %v310_v57 }
 0x2ad   :  { %v669_v5 = vsel %vm262_vm3, %v668_v63, %v651_v34  ;;  %v720_v7 = vrot.slane %v701_v1, 4  ;;  %v647_v60 = vperm.slane %v641_v35, %v3871_v45  ;;  %v395_v9 = vperm.slane %v391_v25, %v3862_v37  ;;  %v177_v63 = vld [vmem:[#allocation6 + $0x10] sm:$0xff]  ;;  %v178_v25 = vld [vmem:[#allocation6 + $0x18] sm:$0xff] }
 0x2ae   :  { %v653_v2 = vsel %vm262_vm3, %v652_v40, %v633_v15  ;;  %v713_v11 = vperm.slane %v707_v4, %v3871_v45  ;;  %v380_v13 = vsel %vm262_vm3, %v379_v3, %v311_v46  ;;  %v385_v14 = vsel %vm262_vm3, %v316_v21, %v305_v18  ;;  %v179_v46 = vld [vmem:[#allocation6 + $0x20] sm:$0xff] }
 0x2af   :  { %v659_v16 = vperm.slane %v653_v2, %v3871_v45  ;;  %v666_v17 = vrot.slane %v647_v60, 4  ;;  %v408_v19 = vrot.slane %v395_v9, 4  ;;  %v384_v22 = vperm.slane %v380_v13, %v3862_v37 }
 0x2b0   :  { %3308 = vmatpush.xpose.msk.msra.mxu2 %vm970_vm4, %v723_v61  ;;  %v721_v8 = vsel %vm262_vm3, %v713_v11, %v720_v7  ;;  %v389_v27 = vperm.slane %v385_v14, %v3862_v37  ;;  %v718_v28 = vrot.slane %v713_v11, 4  ;;  %v374_v18 = vsel %vm262_vm3, %v312_v53, %v293_v52 }
 0x2b1   :  { %v667_v15 = vsel %vm262_vm3, %v659_v16, %v666_v17  ;;  %v396_v21 = vrot.slane %v384_v22, 4  ;;  %v664_v24 = vrot.slane %v659_v16, 4  ;;  %v378_v31 = vperm.slane %v374_v18, %v3862_v37  ;;  %v181_v16 = vld [vmem:[#allocation6 + $0x30] sm:$0xff]  ;;  %v3413_v18 = vpop.permute.xlu2 %3412 }
 0x2b2   :  { %v409_v33 = vsel %vm262_vm3, %v408_v19, %v389_v27  ;;  %v719_v36 = vsel %vm262_vm3, %v718_v28, %v701_v1  ;;  %v410_v54 = vrot.slane %v389_v27, 4  ;;  %v3426_v13 = vpack.i.bf16 %v3893_v0, %v3890_v62 }
 0x2b3   :  { %v415_v34 = vperm.slane %v409_v33, %v3871_v45  ;;  %v397_v38 = vsel %vm262_vm3, %v396_v21, %v378_v31  ;;  %v665_v47 = vsel %vm262_vm3, %v664_v24, %v647_v60  ;;  %v398_v56 = vrot.slane %v378_v31, 4  ;;  %v180_v60 = vld [vmem:[#allocation6 + $0x28] sm:$0xff] }
 0x2b4   :  { %3309 = vmatpush.xpose.msk.msra.mxu2 %vm970_vm4, %v669_v5  ;;  %v403_v50 = vperm.slane %v397_v38, %v3871_v45  ;;  %v411_v55 = vsel %vm262_vm3, %v395_v9, %v410_v54  ;;  %v3416_v14 = vpack.i.bf16 %v3869_v44, %v3855_v30  ;;  %v182_v44 = vld [vmem:[#allocation6 + $0x38] sm:$0xff] }
 0x2b5   :  { %v420_v42 = vrot.slane %v415_v34, 4  ;;  %v419_v6 = vperm.slane %v411_v55, %v3871_v45  ;;  %v399_v39 = vsel %vm262_vm3, %v384_v22, %v398_v56  ;;  %v175_v22 = vld [vmem:[#allocation6] sm:$0xff] }
 0x2b6   :  { %v422_v52 = vrot.slane %v403_v50, 4  ;;  %v407_v57 = vperm.slane %v399_v39, %v3871_v45 }
 0x2b7   :  { %v421_v51 = vsel %vm262_vm3, %v420_v42, %v403_v50  ;;  %v424_v32 = vrot.slane %v419_v6, 4 }
 0x2b8   :  { %3310 = vmatpush.xpose.msk.msra.mxu2 %vm970_vm4, %v721_v8  ;;  %v423_v53 = vsel %vm262_vm3, %v415_v34, %v422_v52  ;;  %v426_v58 = vrot.slane %v407_v57, 4  ;;  %v3421_v8 = vpack.i.bf16 %v3853_v29, %v3835_v26  ;;  %v176_v29 = vld [vmem:[#allocation6 + $0x8] sm:$0xff] }
 0x2ba   :  { %v427_v59 = vsel %vm262_vm3, %v419_v6, %v426_v58  ;;  %v3414_v58 = vunpack.i.l.bf16 %v3413_v18 }
 0x2bc   :  { %3311 = vmatpush.xpose.msk.msra.mxu2 %vm970_vm4, %v667_v15 }
 0x2c0   :  { %3312 = vmatpush.xpose.msk.msra.mxu2 %vm970_vm4, %v719_v36 }
 0x2c4   :  { %3313 = vmatpush.xpose.msk.msra.mxu2 %vm970_vm4, %v665_v47 }
 0x2c7   :  { %3314 = vmatmul.msk.f32.vlgmr.msra.gmra.mxu2 %vm970_vm4, %v421_v51 }
 0x2cf   :  { %3315 = vmatmul.msk.f32.gmra.mxu2 %vm970_vm4, %v3924_v41  ;;  %v425_v41 = vsel %vm262_vm3, %v424_v32, %v407_v57 }
 0x2d7   :  { %3316 = vmatmul.msk.f32.gmra.mxu2 %vm970_vm4, %v423_v53 }
 0x2df   :  { %3317 = vmatmul.msk.f32.gmra.mxu2 %vm970_vm4, %v3928_v43 }
 0x2e7   :  { %3318 = vmatmul.msk.f32.gmra.mxu2 %vm970_vm4, %v425_v41 }
 0x2ef   :  { %3319 = vmatmul.msk.f32.gmra.mxu2 %vm970_vm4, %v3934_v49 }
 0x2f7   :  { %3320 = vmatmul.msk.f32.gmra.mxu2 %vm970_vm4, %v427_v59 }
 0x2ff   :  { %3321 = vmatmul.msk.f32.gmra.mxu2 %vm970_vm4, %v3931_v48 }
 0x34a   :  { %v1036_v43 = vpop.f32.mrf.mxu2 }
 0x34b   :  { %v4138_v0 = vadd.f32 %v1036_v43, %v175_v22  ;;  %v3415_v43 = vunpack.i.h.bf16 %v3413_v18 }
 0x34d   :  { %v1061_v30 = vsel %vm1060_vm5, %v4138_v0, -inf }
 0x352   :  { %v1039_v61 = vpop.f32.mrf.mxu2 }
 0x353   :  { %v4146_v28 = vadd.f32 %v1039_v61, %v176_v29 }
 0x355   :  { %v1064_v33 = vsel %vm1060_vm5, %v4146_v28, -inf }
 0x35a   :  { %v1042_v1 = vpop.f32.mrf.mxu2 }
 0x35b   :  { %v1043_v35 = vadd.f32 %v1042_v1, %v177_v63  ;;  %v806_v1 = vrot.slane %v3414_v58, 4 }
 0x35d   :  { %v1067_v40 = vsel %vm1060_vm5, %v1043_v35, -inf }
 0x35e   :  { %1068 = vmax.xlane.f32.xlu1 %v1067_v40 }
 0x362   :  { %v1045_v3 = vpop.f32.mrf.mxu2 }
 0x363   :  { %v1046_v49 = vadd.f32 %v1045_v3, %v178_v25 }
 0x365   :  { %v1070_v4 = vsel %vm1060_vm5, %v1046_v49, -inf }
 0x366   :  { %1071 = vmax.xlane.f32.xlu2 %v1070_v4 }
 0x36a   :  { %v1048_v5 = vpop.f32.mrf.mxu2 }
 0x36b   :  { %v1049_v7 = vadd.f32 %v1048_v5, %v179_v46 }
 0x36d   :  { %v1073_v48 = vsel %vm1060_vm5, %v1049_v7, -inf }
 0x36e   :  { %1074 = vmax.xlane.f32.xlu0 %v1073_v48 }
 0x372   :  { %v1051_v9 = vpop.f32.mrf.mxu2 }
 0x373   :  { %v1052_v2 = vadd.f32 %v1051_v9, %v180_v60 }
 0x375   :  { %v1076_v11 = vsel %vm1060_vm5, %v1052_v2, -inf }
 0x376   :  { %1077 = vmax.xlane.f32.xlu1 %v1076_v11 }
 0x37a   :  { %v1054_v17 = vpop.f32.mrf.mxu2 }
 0x37b   :  { %v4134_v19 = vadd.f32 %v1054_v17, %v181_v16 }
 0x37d   :  { %v1079_v62 = vsel %vm1060_vm5, %v4134_v19, -inf }
 0x37e   :  { %3427 = vrot.lane.b32.xlu2 %v3426_v13, %s3716_s2 }
 0x382   :  { %3417 = vrot.lane.b32.xlu0 %v3416_v14, %s3716_s2  ;;  %v1057_v27 = vpop.f32.mrf.mxu2 }
 0x383   :  { %v4142_v26 = vadd.f32 %v1057_v27, %v182_v44 }
 0x385   :  { %v1082_v15 = vsel %vm1060_vm5, %v4142_v26, -inf }
 0x38f   :  { %3422 = vrot.lane.b32.xlu1 %v3421_v8, %s3716_s2 }
 0x3a7   :  { %1080 = vmax.xlane.f32.xlu2 %v1079_v62 }
 0x3ac   :  { %1062 = vmax.xlane.f32.xlu0 %v1061_v30 }
 0x3b4   :  { %1083 = vmax.xlane.f32.xlu0 %v1082_v15 }
 0x3b9   :  { %1065 = vmax.xlane.f32.xlu1 %v1064_v33 }
 0x3d1   :  { %v1069_v21 = vpop.xlane.xlu1 %1068 }
 0x3d2   :  { %v1087_v34 = vsub.f32 %v1043_v35, %v1069_v21  ;;  %v808_v35 = vrot.slane %v3415_v43, 4 }
 0x3d4   :  { %v1097_v36 = vmul.f32 1.442695, %v1087_v34  ;;  %v809_v4 = vsel %vm262_vm3, %v3414_v58, %v808_v35 }
 0x3d5   :  { %v817_v9 = vperm.slane %v809_v4, %v3862_v37 }
 0x3d6   :  { %3469 = vpow2.f32 %v1097_v36 }
 0x3d7   :  { %v844_v33 = vrot.slane %v817_v9, 4 }
 0x3d9   :  { %v1072_v24 = vpop.xlane.xlu2 %1071 }
 0x3da   :  { %v1088_v31 = vsub.f32 %v1046_v49, %v1072_v24  ;;  %v807_v49 = vsel %vm262_vm3, %v806_v1, %v3415_v43 }
 0x3db   :  { %v813_v60 = vperm.slane %v807_v49, %v3862_v37 }
 0x3dc   :  { %v4150_v38 = vpop.eup %3469  ;;  %v1099_v42 = vmul.f32 1.442695, %v1088_v31 }
 0x3dd   :  { %v1115_v47 = vsel %vm1060_vm5, %v4150_v38, 0.0  ;;  %v832_v27 = vrot.slane %v813_v60, 4 }
 0x3de   :  { %3471 = vpow2.f32 %v1099_v42  ;;  %1116 = vadd.xlane.f32.xlu2 %v1115_v47 }
 0x3e1   :  { %v1075_v50 = vpop.xlane.xlu0 %1074  ;;  %v3428_v57 = vpop.permute.xlu2 %3427 }
 0x3e2   :  { %v1089_v51 = vsub.f32 %v1049_v7, %v1075_v50  ;;  %v3429_v61 = vunpack.i.l.bf16 %v3428_v57  ;;  %v3430_v63 = vunpack.i.h.bf16 %v3428_v57 }
 0x3e4   :  { %v4154_v52 = vpop.eup %3471  ;;  %v1101_v53 = vmul.f32 1.442695, %v1089_v51  ;;  %v762_v40 = vrot.slane %v3429_v61, 4  ;;  %v764_v3 = vrot.slane %v3430_v63, 4 }
 0x3e5   :  { %v1118_v54 = vsel %vm1060_vm5, %v4154_v52, 0.0 }
 0x3e6   :  { %3473 = vpow2.f32 %v1101_v53  ;;  %1119 = vadd.xlane.f32.xlu1 %v1118_v54  ;;  %v763_v46 = vsel %vm262_vm3, %v762_v40, %v3430_v63  ;;  %v765_v48 = vsel %vm262_vm3, %v3429_v61, %v764_v3 }
 0x3e7   :  { %v773_v17 = vperm.slane %v765_v48, %v3862_v37 }
 0x3e9   :  { %v1078_v55 = vpop.xlane.xlu1 %1077  ;;  %v786_v47 = vrot.slane %v773_v17, 4 }
 0x3ea   :  { %v1090_v56 = vsub.f32 %v1052_v2, %v1078_v55  ;;  %v769_v2 = vperm.slane %v763_v46, %v3862_v37 }
 0x3ec   :  { %v4158_v6 = vpop.eup %3473  ;;  %v1103_v39 = vmul.f32 1.442695, %v1090_v56  ;;  %v774_v18 = vrot.slane %v769_v2, 4 }
 0x3ed   :  { %v1121_v32 = vsel %vm1060_vm5, %v4158_v6, 0.0 }
 0x3ee   :  { %3475 = vpow2.f32 %v1103_v39  ;;  %1122 = vadd.xlane.f32.xlu0 %v1121_v32 }
 0x3f4   :  { %v4162_v41 = vpop.eup %3475  ;;  %v3418_v25 = vpop.permute.xlu0 %3417 }
 0x3f5   :  { %v1124_v59 = vsel %vm1060_vm5, %v4162_v41, 0.0  ;;  %v3420_v5 = vunpack.i.h.bf16 %v3418_v25  ;;  %v3419_v7 = vunpack.i.l.bf16 %v3418_v25 }
 0x3f6   :  { %1125 = vadd.xlane.f32.xlu2 %v1124_v59 }
 0x3f7   :  { %v818_v13 = vrot.slane %v3420_v5, 4  ;;  %v750_v14 = vrot.slane %v3419_v7, 4 }
 0x401   :  { %v3423_v11 = vpop.permute.xlu1 %3422 }
 0x402   :  { %v3425_v8 = vunpack.i.h.bf16 %v3423_v11  ;;  %v3424_v16 = vunpack.i.l.bf16 %v3423_v11 }
 0x404   :  { %v819_v22 = vsel %vm262_vm3, %v818_v13, %v3425_v8  ;;  %v820_v62 = vrot.slane %v3425_v8, 4  ;;  %v751_v30 = vsel %vm262_vm3, %v750_v14, %v3424_v16  ;;  %v752_v44 = vrot.slane %v3424_v16, 4 }
 0x405   :  { %v825_v29 = vperm.slane %v819_v22, %v3862_v37  ;;  %v757_v15 = vperm.slane %v751_v30, %v3862_v37 }
 0x406   :  { %v821_v21 = vsel %vm262_vm3, %v3420_v5, %v820_v62  ;;  %v753_v34 = vsel %vm262_vm3, %v3419_v7, %v752_v44 }
 0x407   :  { %v829_v36 = vperm.slane %v821_v21, %v3862_v37  ;;  %v830_v24 = vrot.slane %v825_v29, 4  ;;  %v833_v31 = vsel %vm262_vm3, %v825_v29, %v832_v27  ;;  %v761_v42 = vperm.slane %v753_v34, %v3862_v37 }
 0x408   :  { %v841_v50 = vperm.slane %v833_v31, %v3871_v45  ;;  %v775_v51 = vsel %vm262_vm3, %v774_v18, %v757_v15  ;;  %v776_v53 = vrot.slane %v757_v15, 4 }
 0x409   :  { %v831_v54 = vsel %vm262_vm3, %v830_v24, %v813_v60  ;;  %v842_v55 = vrot.slane %v829_v36, 4  ;;  %v845_v56 = vsel %vm262_vm3, %v829_v36, %v844_v33  ;;  %v781_v39 = vperm.slane %v775_v51, %v3871_v45 }
 0x40a   :  { %v837_v32 = vperm.slane %v831_v54, %v3871_v45  ;;  %v853_v57 = vperm.slane %v845_v56, %v3871_v45  ;;  %v856_v58 = vrot.slane %v841_v50, 4  ;;  %v777_v59 = vsel %vm262_vm3, %v769_v2, %v776_v53 }
 0x40b   :  { %v843_v43 = vsel %vm262_vm3, %v842_v55, %v817_v9  ;;  %v785_v61 = vperm.slane %v777_v59, %v3871_v45  ;;  %v787_v63 = vsel %vm262_vm3, %v786_v47, %v761_v42  ;;  %v788_v1 = vrot.slane %v761_v42, 4 }
 0x40c   :  { %v849_v35 = vperm.slane %v843_v43, %v3871_v45  ;;  %v854_v40 = vrot.slane %v837_v32, 4  ;;  %v857_v25 = vsel %vm262_vm3, 0.0, %v856_v58  ;;  %v860_v3 = vrot.slane %v853_v57, 4 }
 0x40d   :  { %v921_v49 = vrot.slane %v857_v25, 4  ;;  %v789_v4 = vsel %vm262_vm3, %v773_v17, %v788_v1  ;;  %v793_v46 = vperm.slane %v787_v63, %v3871_v45  ;;  %v798_v5 = vrot.slane %v781_v39, 4 }
 0x40e   :  { %v797_v7 = vperm.slane %v789_v4, %v3871_v45  ;;  %v800_v48 = vrot.slane %v785_v61, 4  ;;  %v855_v60 = vsel %vm262_vm3, 0.0, %v854_v40  ;;  %v858_v9 = vrot.slane %v849_v35, 4 }
 0x40f   :  { %v861_v2 = vsel %vm262_vm3, 0.0, %v860_v3  ;;  %v916_v11 = vsel %vm262_vm3, %v856_v58, %v837_v32  ;;  %v922_v13 = vsel %vm262_vm3, %v921_v49, %v855_v60  ;;  %v927_v14 = vsel %vm262_vm3, %v860_v3, %v849_v35 }
 0x410   :  { %v801_v8 = vsel %vm262_vm3, 0.0, %v800_v48  ;;  %v804_v16 = vrot.slane %v797_v7, 4  ;;  %v859_v17 = vsel %vm262_vm3, 0.0, %v858_v9  ;;  %v920_v22 = vperm.slane %v916_v11, %v3862_v37 }
 0x411   :  { %v867_v62 = vrot.slane %v801_v8, 4  ;;  %v926_v30 = vperm.slane %v922_v13, %v3862_v37  ;;  %v931_v44 = vperm.slane %v927_v14, %v3862_v37  ;;  %v932_v27 = vrot.slane %v861_v2, 4 }
 0x412   :  { %v940_v29 = vrot.slane %v920_v22, 4  ;;  %v799_v15 = vsel %vm262_vm3, 0.0, %v798_v5  ;;  %v802_v33 = vrot.slane %v793_v46, 4  ;;  %v805_v18 = vsel %vm262_vm3, 0.0, %v804_v16 }
 0x413   :  { %v933_v21 = vsel %vm262_vm3, %v932_v27, %v859_v17  ;;  %v952_v34 = vrot.slane %v931_v44, 4  ;;  %v862_v36 = vsel %vm262_vm3, %v800_v48, %v781_v39  ;;  %v868_v24 = vsel %vm262_vm3, %v867_v62, %v799_v15 }
 0x414   :  { %v937_v31 = vperm.slane %v933_v21, %v3862_v37  ;;  %v941_v42 = vsel %vm262_vm3, %v926_v30, %v940_v29  ;;  %v803_v47 = vsel %vm262_vm3, 0.0, %v802_v33  ;;  %v866_v50 = vperm.slane %v862_v36, %v3862_v37 }
 0x415   :  { %v949_v51 = vperm.slane %v941_v42, %v3871_v45  ;;  %v872_v53 = vperm.slane %v868_v24, %v3862_v37  ;;  %v873_v54 = vsel %vm262_vm3, %v804_v16, %v793_v46  ;;  %v878_v55 = vrot.slane %v805_v18, 4 }
 0x416   :  { %v953_v56 = vsel %vm262_vm3, %v937_v31, %v952_v34  ;;  %v877_v39 = vperm.slane %v873_v54, %v3862_v37  ;;  %v886_v32 = vrot.slane %v866_v50, 4  ;;  %v938_v57 = vrot.slane %v926_v30, 4 }
 0x417   :  { %v961_v58 = vperm.slane %v953_v56, %v3871_v45  ;;  %v968_v59 = vrot.slane %v949_v51, 4  ;;  %v879_v43 = vsel %vm262_vm3, %v878_v55, %v803_v47  ;;  %v950_v61 = vrot.slane %v937_v31, 4 }
 0x418   :  { %v883_v63 = vperm.slane %v879_v43, %v3862_v37  ;;  %v887_v1 = vsel %vm262_vm3, %v872_v53, %v886_v32  ;;  %v898_v35 = vrot.slane %v877_v39, 4  ;;  %v939_v40 = vsel %vm262_vm3, %v938_v57, %v920_v22 }
 0x419   :  { %v969_v25 = vsel %vm262_vm3, %v961_v58, %v968_v59  ;;  %v895_v3 = vperm.slane %v887_v1, %v3871_v45  ;;  %v966_v46 = vrot.slane %v961_v58, 4  ;;  %v884_v5 = vrot.slane %v872_v53, 4 }
 0x41a   :  { %1181 = vmatpush.msrb.mxu2 %v969_v25  ;;  %3380 = vmatpush.msra.mxu3 %v969_v25  ;;  %v1081_v49 = vpop.xlane.xlu2 %1080  ;;  %v899_v4 = vsel %vm262_vm3, %v883_v63, %v898_v35  ;;  %v896_v7 = vrot.slane %v883_v63, 4  ;;  %v945_v2 = vperm.slane %v939_v40, %v3871_v45  ;;  %v951_v11 = vsel %vm262_vm3, %v950_v61, %v931_v44 }
 0x41b   :  { %v1091_v48 = vsub.f32 %v4134_v19, %v1081_v49  ;;  %v907_v60 = vperm.slane %v899_v4, %v3871_v45  ;;  %v914_v9 = vrot.slane %v895_v3, 4  ;;  %v885_v13 = vsel %vm262_vm3, %v884_v5, %v866_v50 }
 0x41c   :  { %v891_v17 = vperm.slane %v885_v13, %v3871_v45  ;;  %v897_v22 = vsel %vm262_vm3, %v896_v7, %v877_v39  ;;  %v967_v19 = vsel %vm262_vm3, %v966_v46, %v949_v51  ;;  %v957_v30 = vperm.slane %v951_v11, %v3871_v45 }
 0x41d   :  { %v1105_v14 = vmul.f32 1.442695, %v1091_v48  ;;  %v915_v8 = vsel %vm262_vm3, %v907_v60, %v914_v9  ;;  %v912_v16 = vrot.slane %v907_v60, 4  ;;  %v964_v27 = vrot.slane %v945_v2, 4 }
 0x41e   :  { %1182 = vmatpush.msrb.mxu2 %v915_v8  ;;  %3381 = vmatpush.msra.mxu3 %v915_v8  ;;  %v903_v15 = vperm.slane %v897_v22, %v3871_v45  ;;  %v910_v33 = vrot.slane %v891_v17, 4  ;;  %v962_v34 = vrot.slane %v957_v30, 4 }
 0x41f   :  { %3477 = vpow2.f32 %v1105_v14  ;;  %v1063_v62 = vpop.xlane.xlu0 %1062  ;;  %v913_v29 = vsel %vm262_vm3, %v912_v16, %v895_v3  ;;  %v965_v21 = vsel %vm262_vm3, %v957_v30, %v964_v27 }
 0x420   :  { %1183 = vmatpush.msrb.mxu2 %v967_v19  ;;  %3382 = vmatpush.msra.mxu3 %v967_v19  ;;  %v1085_v44 = vsub.f32 %v4138_v0, %v1063_v62  ;;  %v911_v24 = vsel %vm262_vm3, %v903_v15, %v910_v33  ;;  %v908_v31 = vrot.slane %v903_v15, 4  ;;  %v963_v42 = vsel %vm262_vm3, %v962_v34, %v945_v2 }
 0x422   :  { %1184 = vmatpush.msrb.mxu2 %v913_v29  ;;  %3383 = vmatpush.msra.mxu3 %v913_v29  ;;  %v1093_v18 = vmul.f32 1.442695, %v1085_v44  ;;  %v909_v51 = vsel %vm262_vm3, %v908_v31, %v891_v17 }
 0x424   :  { %3479 = vpow2.f32 %v1093_v18  ;;  %1185 = vmatpush.msrb.mxu2 %v965_v21  ;;  %3384 = vmatpush.msra.mxu3 %v965_v21 }
 0x425   :  { %v3478_v36 = vpop.eup %3477 }
 0x426   :  { %1186 = vmatpush.msrb.mxu2 %v911_v24  ;;  %3385 = vmatpush.msra.mxu3 %v911_v24  ;;  %v1127_v0 = vsel %vm1060_vm5, %v3478_v36, 0.0 }
 0x427   :  { %v1084_v47 = vpop.xlane.xlu0 %1083  ;;  %1128 = vadd.xlane.f32.xlu0 %v1127_v0 }
 0x428   :  { %1187 = vmatpush.msrb.mxu2 %v963_v42  ;;  %3386 = vmatpush.msra.mxu3 %v963_v42  ;;  %v1092_v50 = vsub.f32 %v4142_v26, %v1084_v47 }
 0x42a   :  { %v3480_v53 = vpop.eup %3479  ;;  %1188 = vmatpush.msrb.mxu2 %v909_v51  ;;  %3387 = vmatpush.msra.mxu3 %v909_v51  ;;  %v1107_v54 = vmul.f32 1.442695, %v1092_v50 }
 0x42b   :  { %v1109_v55 = vsel %vm1060_vm5, %v3480_v53, 0.0 }
 0x42c   :  { %3481 = vpow2.f32 %v1107_v54  ;;  %1110 = vadd.xlane.f32.xlu1 %v1109_v55  ;;  %v1066_v56 = vpop.xlane.xlu1 %1065 }
 0x42d   :  { %v1086_v39 = vsub.f32 %v4146_v28, %v1066_v56 }
 0x42f   :  { %v1095_v32 = vmul.f32 1.442695, %v1086_v39 }
 0x431   :  { %3483 = vpow2.f32 %v1095_v32 }
 0x432   :  { %v3482_v57 = vpop.eup %3481 }
 0x433   :  { %v1130_v58 = vsel %vm1060_vm5, %v3482_v57, 0.0 }
 0x434   :  { %1131 = vadd.xlane.f32.xlu1 %v1130_v58 }
 0x437   :  { %v3484_v26 = vpop.eup %3483 }
 0x438   :  { %v1112_v59 = vsel %vm1060_vm5, %v3484_v26, 0.0 }
 0x439   :  { %1113 = vadd.xlane.f32.xlu2 %v1112_v59 }
 0x451   :  { %v1117_v43 = vpop.xlane.xlu2 %1116 }
 0x452   :  { %3485 = vrcp.f32 %v1117_v43 }
 0x458   :  { %v3486_v61 = vpop.eup %3485 }
 0x459   :  { %v1120_v63 = vpop.xlane.xlu1 %1119  ;;  %v1143_v1 = vmul.f32 %v3486_v61, %v4150_v38 }
 0x45a   :  { %3487 = vrcp.f32 %v1120_v63 }
 0x45b   :  { %3324 = vmatmul.msk.f32.vlgmr.msra.gmra.mxu3 %vm1060_vm5, %v1143_v1 }
 0x460   :  { %v3488_v28 = vpop.eup %3487 }
 0x461   :  { %v1123_v35 = vpop.xlane.xlu0 %1122  ;;  %v1144_v40 = vmul.f32 %v3488_v28, %v4154_v52 }
 0x462   :  { %3489 = vrcp.f32 %v1123_v35 }
 0x463   :  { %3325 = vmatmul.msk.f32.gmra.mxu3 %vm1060_vm5, %v1144_v40 }
 0x468   :  { %v3490_v25 = vpop.eup %3489 }
 0x469   :  { %v1126_v3 = vpop.xlane.xlu2 %1125  ;;  %v1145_v49 = vmul.f32 %v3490_v25, %v4158_v6 }
 0x46a   :  { %3491 = vrcp.f32 %v1126_v3 }
 0x46b   :  { %3326 = vmatmul.msk.f32.gmra.mxu3 %vm1060_vm5, %v1145_v49 }
 0x470   :  { %v3492_v4 = vpop.eup %3491 }
 0x471   :  { %v1146_v38 = vmul.f32 %v3492_v4, %v4162_v41 }
 0x473   :  { %3327 = vmatmul.msk.f32.gmra.mxu3 %vm1060_vm5, %v1146_v38 }
 0x49a   :  { %v1129_v46 = vpop.xlane.xlu0 %1128 }
 0x49b   :  { %3493 = vrcp.f32 %v1129_v46 }
 0x49f   :  { %v1111_v5 = vpop.xlane.xlu1 %1110 }
 0x4a0   :  { %3495 = vrcp.f32 %v1111_v5 }
 0x4a1   :  { %v3494_v52 = vpop.eup %3493 }
 0x4a2   :  { %v1147_v7 = vmul.f32 %v3494_v52, %v3478_v36 }
 0x4a4   :  { %3328 = vmatmul.msk.f32.gmra.mxu3 %vm1060_vm5, %v1147_v7 }
 0x4a6   :  { %v3496_v48 = vpop.eup %3495 }
 0x4a7   :  { %v1132_v60 = vpop.xlane.xlu1 %1131  ;;  %v1141_v9 = vmul.f32 %v3496_v48, %v3480_v53 }
 0x4a8   :  { %3497 = vrcp.f32 %v1132_v60 }
 0x4a9   :  { %3322 = vmatmul.msk.f32.vlgmr.msrb.gmra.mxu2 %vm1060_vm5, %v1141_v9 }
 0x4ac   :  { %v1114_v6 = vpop.xlane.xlu2 %1113 }
 0x4ad   :  { %3499 = vrcp.f32 %v1114_v6 }
 0x4ae   :  { %v3498_v2 = vpop.eup %3497 }
 0x4af   :  { %v1148_v41 = vmul.f32 %v3498_v2, %v3482_v57 }
 0x4b1   :  { %3329 = vmatmul.msk.f32.gmra.mxu3 %vm1060_vm5, %v1148_v41 }
 0x4b3   :  { %v3500_v11 = vpop.eup %3499 }
 0x4b4   :  { %v1142_v13 = vmul.f32 %v3500_v11, %v3484_v26 }
 0x4b6   :  { %3323 = vmatmul.msk.f32.gmra.mxu2 %vm1060_vm5, %v1142_v13 }
 0x4de   :  { %v1196_v14 = vpop.f32.mrf.mxu3 }
 0x4df   :  { %v1228_v22 = vrot.slane %v1196_v14, 4 }
 0x4e6   :  { %v1199_v8 = vpop.f32.mrf.mxu3 }
 0x4e7   :  { %v1284_v32 = vrot.slane %v1199_v8, 4 }
 0x4ee   :  { %v1202_v16 = vpop.f32.mrf.mxu3 }
 0x4ef   :  { %v1214_v44 = vrot.slane %v1202_v16, 4 }
 0x4f6   :  { %v1205_v17 = vpop.f32.mrf.mxu3 }
 0x4f7   :  { %v1270_v61 = vrot.slane %v1205_v17, 4 }
 0x527   :  { %v1208_v19 = vpop.f32.mrf.mxu3 }
 0x528   :  { %v1226_v62 = vrot.slane %v1208_v19, 4  ;;  %v1229_v30 = vsel %vm262_vm3, %v1208_v19, %v1228_v22 }
 0x529   :  { %v1237_v15 = vperm.slane %v1229_v30, %v3862_v37 }
 0x52a   :  { %v1227_v27 = vsel %vm262_vm3, %v1226_v62, %v1196_v14 }
 0x52b   :  { %v1233_v29 = vperm.slane %v1227_v27, %v3862_v37  ;;  %v1250_v31 = vrot.slane %v1237_v15, 4 }
 0x52c   :  { %v1190_v33 = vpop.f32.mrf.mxu2 }
 0x52d   :  { %v1238_v18 = vrot.slane %v1233_v29, 4  ;;  %v1215_v21 = vsel %vm262_vm3, %v1214_v44, %v1190_v33  ;;  %v1216_v34 = vrot.slane %v1190_v33, 4 }
 0x52e   :  { %v1221_v36 = vperm.slane %v1215_v21, %v3862_v37 }
 0x52f   :  { %v1217_v24 = vsel %vm262_vm3, %v1202_v16, %v1216_v34 }
 0x530   :  { %v1225_v0 = vperm.slane %v1217_v24, %v3862_v37  ;;  %v1239_v42 = vsel %vm262_vm3, %v1238_v18, %v1221_v36  ;;  %v1240_v47 = vrot.slane %v1221_v36, 4 }
 0x531   :  { %v1245_v50 = vperm.slane %v1239_v42, %v3871_v45 }
 0x532   :  { %v1241_v51 = vsel %vm262_vm3, %v1233_v29, %v1240_v47  ;;  %v1251_v53 = vsel %vm262_vm3, %v1250_v31, %v1225_v0  ;;  %v1252_v54 = vrot.slane %v1225_v0, 4 }
 0x533   :  { %v1249_v55 = vperm.slane %v1241_v51, %v3871_v45  ;;  %v1257_v56 = vperm.slane %v1251_v53, %v3871_v45  ;;  %v1262_v39 = vrot.slane %v1245_v50, 4 }
 0x534   :  { %v1253_v57 = vsel %vm262_vm3, %v1237_v15, %v1252_v54  ;;  %v1211_v58 = vpop.f32.mrf.mxu3 }
 0x535   :  { %v1261_v26 = vperm.slane %v1253_v57, %v3871_v45  ;;  %v1264_v59 = vrot.slane %v1249_v55, 4  ;;  %v1266_v43 = vrot.slane %v1257_v56, 4  ;;  %v1282_v63 = vrot.slane %v1211_v58, 4 }
 0x536   :  { %v1285_v1 = vsel %vm262_vm3, %v1211_v58, %v1284_v32  ;;  %v1263_v28 = vsel %vm262_vm3, 0.0, %v1262_v39 }
 0x537   :  { %v1265_v35 = vsel %vm262_vm3, 0.0, %v1264_v59  ;;  %v1268_v40 = vrot.slane %v1261_v26, 4  ;;  %v1326_v25 = vsel %vm262_vm3, %v1264_v59, %v1245_v50  ;;  %v1283_v4 = vsel %vm262_vm3, %v1282_v63, %v1199_v8 }
 0x538   :  { %v1330_v3 = vperm.slane %v1326_v25, %v3862_v37  ;;  %v1331_v49 = vrot.slane %v1265_v35, 4  ;;  %v1293_v38 = vperm.slane %v1285_v1, %v3862_v37  ;;  %v1289_v5 = vperm.slane %v1283_v4, %v3862_v37 }
 0x539   :  { %v1269_v46 = vsel %vm262_vm3, 0.0, %v1268_v40  ;;  %v1193_v52 = vpop.f32.mrf.mxu2  ;;  %v1267_v7 = vsel %vm262_vm3, 0.0, %v1266_v43  ;;  %v1337_v48 = vsel %vm262_vm3, %v1268_v40, %v1257_v56 }
 0x53a   :  { %v1332_v60 = vsel %vm262_vm3, %v1331_v49, %v1263_v28  ;;  %v1271_v9 = vsel %vm262_vm3, %v1270_v61, %v1193_v52  ;;  %v1272_v6 = vrot.slane %v1193_v52, 4  ;;  %v1341_v2 = vperm.slane %v1337_v48, %v3862_v37 }
 0x53b   :  { %v1294_v41 = vrot.slane %v1289_v5, 4  ;;  %v1277_v11 = vperm.slane %v1271_v9, %v3862_v37  ;;  %v1336_v13 = vperm.slane %v1332_v60, %v3862_v37  ;;  %v1342_v14 = vrot.slane %v1269_v46, 4 }
 0x53c   :  { %v1306_v8 = vrot.slane %v1293_v38, 4  ;;  %v1273_v16 = vsel %vm262_vm3, %v1205_v17, %v1272_v6  ;;  %v1350_v22 = vrot.slane %v1330_v3, 4  ;;  %v1362_v19 = vrot.slane %v1341_v2, 4 }
 0x53d   :  { %v1281_v62 = vperm.slane %v1273_v16, %v3862_v37  ;;  %v1295_v30 = vsel %vm262_vm3, %v1294_v41, %v1277_v11  ;;  %v1296_v27 = vrot.slane %v1277_v11, 4  ;;  %v1343_v44 = vsel %vm262_vm3, %v1342_v14, %v1267_v7 }
 0x53e   :  { %v1301_v29 = vperm.slane %v1295_v30, %v3871_v45  ;;  %v1347_v15 = vperm.slane %v1343_v44, %v3862_v37  ;;  %v1351_v33 = vsel %vm262_vm3, %v1336_v13, %v1350_v22  ;;  %v1348_v18 = vrot.slane %v1336_v13, 4 }
 0x53f   :  { %v1297_v21 = vsel %vm262_vm3, %v1289_v5, %v1296_v27  ;;  %v1307_v17 = vsel %vm262_vm3, %v1306_v8, %v1281_v62  ;;  %v1308_v34 = vrot.slane %v1281_v62, 4  ;;  %v1359_v36 = vperm.slane %v1351_v33, %v3871_v45 }
 0x540   :  { %v1305_v24 = vperm.slane %v1297_v21, %v3871_v45  ;;  %v1313_v31 = vperm.slane %v1307_v17, %v3871_v45  ;;  %v1318_v0 = vrot.slane %v1301_v29, 4  ;;  %v1363_v42 = vsel %vm262_vm3, %v1347_v15, %v1362_v19 }
 0x541   :  { %v1309_v47 = vsel %vm262_vm3, %v1293_v38, %v1308_v34  ;;  %v1371_v50 = vperm.slane %v1363_v42, %v3871_v45  ;;  %v1378_v51 = vrot.slane %v1359_v36, 4  ;;  %v1349_v53 = vsel %vm262_vm3, %v1348_v18, %v1330_v3 }
 0x542   :  { %v1317_v54 = vperm.slane %v1309_v47, %v3871_v45  ;;  %v1320_v55 = vrot.slane %v1305_v24, 4  ;;  %v1322_v56 = vrot.slane %v1313_v31, 4  ;;  %v1355_v57 = vperm.slane %v1349_v53, %v3871_v45  ;;  %v189_v24 = vld [vmem:[#allocation7 + $0x88] sm:$0xff] }
 0x543   :  { %v1379_v39 = vsel %vm262_vm3, %v1371_v50, %v1378_v51  ;;  %v1376_v32 = vrot.slane %v1371_v50, 4  ;;  %v1360_v58 = vrot.slane %v1347_v15, 4  ;;  %v1319_v26 = vsel %vm262_vm3, 0.0, %v1318_v0  ;;  %v187_v0 = vld [vmem:[#allocation7 + $0x8] sm:$0xff] }
 0x544   :  { %v1321_v59 = vsel %vm262_vm3, 0.0, %v1320_v55  ;;  %v1324_v43 = vrot.slane %v1317_v54, 4  ;;  %v1380_v61 = vsel %vm262_vm3, %v1320_v55, %v1301_v29  ;;  %1452 = vrot.lane.b32.xlu1 %v1379_v39, %s3731_s22  ;;  %v1374_v35 = vrot.slane %v1355_v57, 4 }
 0x545   :  { %v1385_v63 = vrot.slane %v1321_v59, 4  ;;  %v1377_v1 = vsel %vm262_vm3, %v1376_v32, %v1359_v36  ;;  %v1361_v28 = vsel %vm262_vm3, %v1360_v58, %v1341_v2  ;;  %v1384_v3 = vperm.slane %v1380_v61, %v3862_v37  ;;  %v190_v36 = vld [vmem:[#allocation7 + $0xc8] sm:$0xff] }
 0x546   :  { %v1325_v40 = vsel %vm262_vm3, 0.0, %v1324_v43  ;;  %1444 = vrot.lane.b32.xlu2 %v1377_v1, %s3721_s12  ;;  %v1367_v25 = vperm.slane %v1361_v28, %v3871_v45  ;;  %v1391_v49 = vsel %vm262_vm3, %v1324_v43, %v1313_v31  ;;  %v1323_v38 = vsel %vm262_vm3, 0.0, %v1322_v56  ;;  %1485 = vmatpush.msrb.mxu0 %v190_v36  ;;  %v188_v31 = vld [vmem:[#allocation7 + $0x48] sm:$0xff] }
 0x547   :  { %v1396_v4 = vrot.slane %v1325_v40, 4  ;;  %v1386_v46 = vsel %vm262_vm3, %v1385_v63, %v1319_v26  ;;  %v1395_v5 = vperm.slane %v1391_v49, %v3862_v37  ;;  %v1404_v60 = vrot.slane %v1384_v3, 4  ;;  %v3452_v26 = vld [vmem:[%s5005_s7 + $0x1] ss:$0 sm:$0xff] }
 0x548   :  { %v1372_v52 = vrot.slane %v1367_v25, 4  ;;  %v1375_v7 = vsel %vm262_vm3, %v1367_v25, %v1374_v35  ;;  %v1390_v48 = vperm.slane %v1386_v46, %v3862_v37  ;;  %1486 = vmatpush.msrb.mxu0 %v189_v24  ;;  %v3732_v25 = vmov 32.0   ;;  %v198_v24 = vld [vmem:[#allocation9 + $0x30] sm:$0xff] }
 0x549   :  { %1436 = vrot.lane.b32.xlu0 %v1375_v7, %s3713_s14  ;;  %v1397_v9 = vsel %vm262_vm3, %v1396_v4, %v1323_v38  ;;  %v1416_v6 = vrot.slane %v1395_v5, 4  ;;  %3501 = vrcp.f32 %v3732_v25 }
 0x54a   :  { %v1401_v2 = vperm.slane %v1397_v9, %v3862_v37  ;;  %v1402_v41 = vrot.slane %v1390_v48, 4  ;;  %v1373_v11 = vsel %vm262_vm3, %v1372_v52, %v1355_v57  ;;  %v1405_v13 = vsel %vm262_vm3, %v1390_v48, %v1404_v60  ;;  %1487 = vmatpush.msrb.mxu0 %v188_v31 }
 0x54b   :  { %v1413_v30 = vperm.slane %v1405_v13, %v3871_v45  ;;  %v193_v13 = vld [vmem:[#allocation7 + $0x90] sm:$0xff] }
 0x54c   :  { %v1417_v14 = vsel %vm262_vm3, %v1401_v2, %v1416_v6  ;;  %v1403_v8 = vsel %vm262_vm3, %v1402_v41, %v1384_v3  ;;  %v1414_v16 = vrot.slane %v1401_v2, 4  ;;  %1488 = vmatpush.msrb.mxu0 %v187_v0  ;;  %v3453_v0 = vld [vmem:[%s5005_s7 + $0x2] ss:$0 sm:$0xff] }
 0x54d   :  { %v1425_v22 = vperm.slane %v1417_v14, %v3871_v45  ;;  %v1409_v19 = vperm.slane %v1403_v8, %v3871_v45  ;;  %v1432_v17 = vrot.slane %v1413_v30, 4  ;;  %v192_v14 = vld [vmem:[#allocation7 + $0x50] sm:$0xff] }
 0x54e   :  { %v1415_v62 = vsel %vm262_vm3, %v1414_v16, %v1395_v5  ;;  %v191_v16 = vld [vmem:[#allocation7 + $0x10] sm:$0xff] }
 0x54f   :  { %v1430_v27 = vrot.slane %v1425_v22, 4  ;;  %v1421_v44 = vperm.slane %v1415_v62, %v3871_v45  ;;  %v1428_v29 = vrot.slane %v1409_v19, 4  ;;  %v1433_v34 = vsel %vm262_vm3, %v1425_v22, %v1432_v17  ;;  %v3502_v3 = vpop.eup %3501  ;;  %v199_v17 = vld [vmem:[#allocation9 + $0x40] sm:$0xff] }
 0x550   :  { %v1505_v49 = vmul.f32 32.0, %v3502_v3  ;;  %vm1509_vm8 = vweird.f32 %v3502_v3 }
 0x551   :  { %v1431_v15 = vsel %vm262_vm3, %v1430_v27, %v1413_v30  ;;  %v1426_v33 = vrot.slane %v1421_v44, 4  ;;  %v1429_v18 = vsel %vm262_vm3, %v1421_v44, %v1428_v29  ;;  %v202_v27 = vld [vmem:[#allocation9 + $0x70] sm:$0xff]  ;;  %v201_v44 = vld [vmem:[#allocation9 + $0x60] sm:$0xff] }
 0x552   :  { %1446 = vrot.lane.b32.xlu2 %v1431_v15, %s3721_s12  ;;  %1438 = vrot.lane.b32.xlu0 %v1429_v18, %s3713_s14  ;;  %v1506_v4 = vsub.f32 1.0, %v1505_v49  ;;  %v200_v15 = vld [vmem:[#allocation9 + $0x50] sm:$0xff] }
 0x553   :  { %v1427_v21 = vsel %vm262_vm3, %v1426_v33, %v1409_v19  ;;  %1602 = vmatpush.msra.mxu0 %v202_v27  ;;  %v1670_v27 = vld [vmem:[#allocation7 + $0x58] sm:$0xff] }
 0x554   :  { %v1507_v38 = vmul.f32 %v3502_v3, %v1506_v4 }
 0x555   :  { %1603 = vmatpush.msra.mxu0 %v201_v44 }
 0x556   :  { %v1508_v46 = vadd.f32 %v3502_v3, %v1507_v38  ;;  %v3456_v38 = vld [vmem:[%s5005_s7 + $0x5] ss:$0 sm:$0xff] }
 0x557   :  { %1604 = vmatpush.msra.mxu0 %v200_v15 }
 0x558   :  { %v4367_v5 = vsel %vm1509_vm8, %v3502_v3, %v1508_v46 }
 0x559   :  { %1605 = vmatpush.msra.mxu0 %v199_v17 }
 0x55a   :  { %1454 = vrot.lane.b32.xlu0 %v1433_v34, %s3731_s22 }
 0x55b   :  { %1606 = vmatpush.msra.mxu0 %v198_v24 }
 0x5a0   :  { %v1445_v47 = vpop.permute.xlu2 %1444 }
 0x5ac   :  { %v1447_v39 = vpop.permute.xlu2 %1446 }
 0x5b6   :  { %v1453_v51 = vpop.permute.xlu1 %1452 }
 0x5bb   :  { %v1437_v42 = vpop.permute.xlu0 %1436 }
 0x5bc   :  { %v1458_v50 = vsel %vm970_vm4, %v1373_v11, %v1437_v42  ;;  %v194_v11 = vld [vmem:[#allocation7 + $0xd0] sm:$0xff] }
 0x5bd   :  { %v1461_v53 = vsel %vm1460_vm6, %v1458_v50, %v1445_v47  ;;  %1574 = vmatpush.msra.mxu1 %v194_v11  ;;  %v3454_v50 = vld [vmem:[%s5005_s7 + $0x3] ss:$0 sm:$0xff] }
 0x5be   :  { %v1464_v54 = vsel %vm1463_vm7, %v1461_v53, %v1453_v51 }
 0x5bf   :  { %3330 = vmatmul.msk.f32.vlgmr.msrb.gmra.mxu0 %vm145_vm0, %v1464_v54  ;;  %1575 = vmatpush.msra.mxu1 %v193_v13 }
 0x5c1   :  { %1576 = vmatpush.msra.mxu1 %v192_v14 }
 0x5c3   :  { %1577 = vmatpush.msra.mxu1 %v191_v16 }
 0x5c4   :  { %v1439_v55 = vpop.permute.xlu0 %1438 }
 0x5c5   :  { %v1459_v56 = vsel %vm970_vm4, %v1427_v21, %v1439_v55 }
 0x5c6   :  { %v1462_v57 = vsel %vm1460_vm6, %v1459_v56, %v1447_v39 }
 0x5cc   :  { %v1455_v32 = vpop.permute.xlu0 %1454 }
 0x5cd   :  { %v1465_v58 = vsel %vm1463_vm7, %v1462_v57, %v1455_v32 }
 0x5ce   :  { %3331 = vmatmul.msk.f32.gmra.mxu0 %vm145_vm0, %v1465_v58 }
 0x63c   :  { %v1490_v59 = vpop.f32.mrf.mxu0 }
 0x63d   :  { %v1491_v43 = vadd.f32 %v3452_v26, %v1490_v59 }
 0x63f   :  { %v1496_v61 = vadd.f32 %v1491_v43, %v3824_v20 }
 0x641   :  { %v1498_v63 = vsel %vm145_vm0, %v1496_v61, 0.0 }
 0x642   :  { %1499 = vadd.xlane.f32.xlu1 %v1498_v63  ;;  %v196_v63 = vld [vmem:[#allocation9 + $0x10] sm:$0xff] }
 0x64b   :  { %v1493_v1 = vpop.f32.mrf.mxu0 }
 0x64c   :  { %v1494_v28 = vadd.f32 %v3452_v26, %v1493_v1  ;;  %v195_v1 = vld [vmem:[#allocation9] sm:$0xff] }
 0x64e   :  { %v1497_v35 = vadd.f32 %v1494_v28, %v3828_v23  ;;  %v3455_v28 = vld [vmem:[%s5005_s7 + $0x4] ss:$0 sm:$0xff] }
 0x650   :  { %v1501_v40 = vsel %vm145_vm0, %v1497_v35, 0.0 }
 0x651   :  { %1502 = vadd.xlane.f32.xlu2 %v1501_v40 }
 0x6b5   :  { %v1500_v20 = vpop.xlane.xlu1 %1499 }
 0x6b6   :  { %v1511_v52 = vmul.f32 %v4367_v5, %v1500_v20 }
 0x6b8   :  { %v1513_v7 = vsub.f32 %v1496_v61, %v1511_v52  ;;  %v197_v61 = vld [vmem:[#allocation9 + $0x20] sm:$0xff] }
 0x6b9   :  { %1607 = vmatpush.msra.mxu0 %v197_v61 }
 0x6ba   :  { %v1515_v48 = vmul.f32 %v1513_v7, %v1513_v7 }
 0x6bb   :  { %1608 = vmatpush.msra.mxu0 %v196_v63 }
 0x6bc   :  { %v1517_v23 = vsel %vm145_vm0, %v1515_v48, 0.0 }
 0x6bd   :  { %1518 = vadd.xlane.f32.xlu0 %v1517_v23  ;;  %1609 = vmatpush.msra.mxu0 %v195_v1  ;;  %v3459_v1 = vld [vmem:[%s5005_s7 + $0x8] ss:$0 sm:$0xff] }
 0x6c4   :  { %v1503_v60 = vpop.xlane.xlu2 %1502 }
 0x6c5   :  { %v1512_v9 = vmul.f32 %v4367_v5, %v1503_v60 }
 0x6c7   :  { %v1514_v6 = vsub.f32 %v1497_v35, %v1512_v9 }
 0x6c9   :  { %v1516_v2 = vmul.f32 %v1514_v6, %v1514_v6 }
 0x6cb   :  { %v1520_v41 = vsel %vm145_vm0, %v1516_v2, 0.0 }
 0x6cc   :  { %1521 = vadd.xlane.f32.xlu1 %v1520_v41 }
 0x730   :  { %v1519_v8 = vpop.xlane.xlu0 %1518 }
 0x731   :  { %v1523_v22 = vmul.f32 %v1519_v8, %v4367_v5 }
 0x733   :  { %v1525_v19 = vadd.f32 1e-05, %v1523_v22 }
 0x735   :  { %3503 = vrsqrt.f32 %v1525_v19  ;;  %vm1533_vm10 = vweird.f32 %v1525_v19 }
 0x73b   :  { %v3504_v62 = vpop.eup %3503 }
 0x73c   :  { %v1528_v30 = vmul.f32 %v3504_v62, %v1525_v19  ;;  %vm1534_vm9 = vweird.f32 %v3504_v62 }
 0x73d   :  { %vm1535_vm11 = vmor %vm1533_vm10, %vm1534_vm9 }
 0x73e   :  { %v1529_v29 = vmul.f32 %v3504_v62, %v1528_v30  ;;  %v1671_v30 = vld [vmem:[#allocation7 + $0x98] sm:$0xff] }
 0x73f   :  { %v1522_v33 = vpop.xlane.xlu1 %1521 }
 0x740   :  { %v1530_v18 = vmul.f32 0.5, %v1529_v29  ;;  %v1524_v21 = vmul.f32 %v1522_v33, %v4367_v5  ;;  %v1669_v29 = vld [vmem:[#allocation7 + $0x18] sm:$0xff] }
 0x742   :  { %v1531_v34 = vsub.f32 1.5, %v1530_v18  ;;  %v1526_v36 = vadd.f32 1e-05, %v1524_v21 }
 0x744   :  { %v1532_v31 = vmul.f32 %v3504_v62, %v1531_v34  ;;  %3505 = vrsqrt.f32 %v1526_v36  ;;  %vm1543_vm13 = vweird.f32 %v1526_v36 }
 0x746   :  { %v1536_v42 = vsel %vm1535_vm11, %v3504_v62, %v1532_v31  ;;  %v1672_v62 = vld [vmem:[#allocation7 + $0xd8] sm:$0xff] }
 0x747   :  { %v1547_v47 = vmul.f32 %v1536_v42, %v1513_v7  ;;  %1693 = vmatpush.msrb.mxu1 %v1672_v62  ;;  %v1784_v62 = vld [vmem:[#allocation7 + $0xe0] sm:$0xff] }
 0x749   :  { %v1550_v51 = vmul.f32 %v3453_v0, %v1547_v47  ;;  %1694 = vmatpush.msrb.mxu1 %v1671_v30  ;;  %v3457_v47 = vld [vmem:[%s5005_s7 + $0x6] ss:$0 sm:$0xff]  ;;  %v1783_v30 = vld [vmem:[#allocation7 + $0xa0] sm:$0xff] }
 0x74a   :  { %v3506_v53 = vpop.eup %3505 }
 0x74b   :  { %v1538_v54 = vmul.f32 %v3506_v53, %v1526_v36  ;;  %v1553_v55 = vadd.f32 %v3454_v50, %v1550_v51  ;;  %vm1544_vm12 = vweird.f32 %v3506_v53  ;;  %1695 = vmatpush.msrb.mxu1 %v1670_v27  ;;  %v1782_v27 = vld [vmem:[#allocation7 + $0x60] sm:$0xff] }
 0x74c   :  { %vm1545_vm14 = vmor %vm1543_vm13, %vm1544_vm12 }
 0x74d   :  { %v1539_v56 = vmul.f32 %v3506_v53, %v1538_v54  ;;  %3332 = vmatmul.msk.f32.vlgmr.msra.gmra.mxu1 %vm145_vm0, %v1553_v55 }
 0x74e   :  { %1696 = vmatpush.msrb.mxu1 %v1669_v29 }
 0x74f   :  { %v1540_v39 = vmul.f32 0.5, %v1539_v56 }
 0x750   :  { %1828 = vmatpush.msra.mxu1 %v1784_v62 }
 0x751   :  { %v1541_v32 = vsub.f32 1.5, %v1540_v39 }
 0x752   :  { %1829 = vmatpush.msra.mxu1 %v1783_v30 }
 0x753   :  { %v1542_v57 = vmul.f32 %v3506_v53, %v1541_v32 }
 0x754   :  { %1830 = vmatpush.msra.mxu1 %v1782_v27 }
 0x755   :  { %v1546_v58 = vsel %vm1545_vm14, %v3506_v53, %v1542_v57  ;;  %v3458_v53 = vld [vmem:[%s5005_s7 + $0x7] ss:$0 sm:$0xff] }
 0x756   :  { %v1548_v26 = vmul.f32 %v1546_v58, %v1514_v6 }
 0x758   :  { %v1551_v59 = vmul.f32 %v3453_v0, %v1548_v26 }
 0x75a   :  { %v1554_v43 = vadd.f32 %v3454_v50, %v1551_v59 }
 0x75c   :  { %3333 = vmatmul.msk.f32.gmra.mxu1 %vm145_vm0, %v1554_v43 }
 0x7ca   :  { %v1579_v35 = vpop.f32.mrf.mxu1 }
 0x7cb   :  { %v1580_v40 = vadd.f32 %v3455_v28, %v1579_v35 }
 0x7cd   :  { %v1585_v25 = vmax.f32 %v1580_v40, 0.0 }
 0x7cf   :  { %3334 = vmatmul.msk.f32.vlgmr.msra.gmra.mxu0 %vm1060_vm5, %v1585_v25 }
 0x7d9   :  { %v1582_v3 = vpop.f32.mrf.mxu1 }
 0x7da   :  { %v1583_v49 = vadd.f32 %v3455_v28, %v1582_v3 }
 0x7dc   :  { %v1586_v4 = vmax.f32 %v1583_v49, 0.0 }
 0x7de   :  { %3335 = vmatmul.msk.f32.gmra.mxu0 %vm1060_vm5, %v1586_v4 }
 0x84c   :  { %v1611_v46 = vpop.f32.mrf.mxu0 }
 0x84d   :  { %v1612_v20 = vadd.f32 %v3456_v38, %v1611_v46 }
 0x84f   :  { %v1617_v52 = vadd.f32 %v1612_v20, %v1553_v55 }
 0x851   :  { %v1619_v7 = vsel %vm145_vm0, %v1617_v52, 0.0 }
 0x852   :  { %1620 = vadd.xlane.f32.xlu2 %v1619_v7 }
 0x85b   :  { %v1614_v48 = vpop.f32.mrf.mxu0 }
 0x85c   :  { %v1615_v23 = vadd.f32 %v3456_v38, %v1614_v48 }
 0x85e   :  { %v1618_v60 = vadd.f32 %v1615_v23, %v1554_v43 }
 0x860   :  { %v1622_v9 = vsel %vm145_vm0, %v1618_v60, 0.0 }
 0x861   :  { %1623 = vadd.xlane.f32.xlu0 %v1622_v9 }
 0x8c5   :  { %v1621_v6 = vpop.xlane.xlu2 %1620 }
 0x8c6   :  { %v1625_v2 = vmul.f32 %v1621_v6, %v4367_v5 }
 0x8c8   :  { %v1627_v41 = vsub.f32 %v1617_v52, %v1625_v2 }
 0x8ca   :  { %v1629_v11 = vmul.f32 %v1627_v41, %v1627_v41 }
 0x8cc   :  { %v1631_v13 = vsel %vm145_vm0, %v1629_v11, 0.0 }
 0x8cd   :  { %1632 = vadd.xlane.f32.xlu1 %v1631_v13 }
 0x8d4   :  { %v1624_v14 = vpop.xlane.xlu0 %1623 }
 0x8d5   :  { %v1626_v8 = vmul.f32 %v1624_v14, %v4367_v5 }
 0x8d7   :  { %v1628_v16 = vsub.f32 %v1618_v60, %v1626_v8 }
 0x8d9   :  { %v1630_v22 = vmul.f32 %v1628_v16, %v1628_v16 }
 0x8db   :  { %v1634_v19 = vsel %vm145_vm0, %v1630_v22, 0.0  ;;  %v1751_v22 = vld [vmem:[#allocation10 + $0x8] sm:$0xff] }
 0x8dc   :  { %1635 = vadd.xlane.f32.xlu2 %v1634_v19  ;;  %v1750_v19 = vld [vmem:[#allocation10] sm:$0xff]  ;;  %1772 = vmatpush.msrb.mxu0 %v1751_v22 }
 0x8de   :  { %1773 = vmatpush.msrb.mxu0 %v1750_v19 }
 0x940   :  { %v1633_v44 = vpop.xlane.xlu1 %1632 }
 0x941   :  { %v1637_v15 = vmul.f32 %v1633_v44, %v4367_v5 }
 0x943   :  { %v1639_v33 = vadd.f32 1e-05, %v1637_v15 }
 0x945   :  { %3507 = vrsqrt.f32 %v1639_v33  ;;  %vm1647_vm1 = vweird.f32 %v1639_v33 }
 0x94b   :  { %v3508_v18 = vpop.eup %3507 }
 0x94c   :  { %v1642_v21 = vmul.f32 %v3508_v18, %v1639_v33  ;;  %vm1648_vm15 = vweird.f32 %v3508_v18 }
 0x94d   :  { %vm1649_vm2 = vmor %vm1647_vm1, %vm1648_vm15 }
 0x94e   :  { %v1643_v17 = vmul.f32 %v3508_v18, %v1642_v21 }
 0x94f   :  { %v1636_v34 = vpop.xlane.xlu2 %1635 }
 0x950   :  { %v1644_v36 = vmul.f32 0.5, %v1643_v17  ;;  %v1638_v24 = vmul.f32 %v1636_v34, %v4367_v5 }
 0x952   :  { %v1645_v31 = vsub.f32 1.5, %v1644_v36  ;;  %v1640_v0 = vadd.f32 1e-05, %v1638_v24 }
 0x954   :  { %v1646_v42 = vmul.f32 %v3508_v18, %v1645_v31  ;;  %3509 = vrsqrt.f32 %v1640_v0  ;;  %vm1657_vm9 = vweird.f32 %v1640_v0 }
 0x956   :  { %v1650_v50 = vsel %vm1649_vm2, %v3508_v18, %v1646_v42  ;;  %v1781_v42 = vld [vmem:[#allocation7 + $0x20] sm:$0xff] }
 0x957   :  { %v1661_v51 = vmul.f32 %v1650_v50, %v1627_v41  ;;  %1831 = vmatpush.msra.mxu1 %v1781_v42 }
 0x959   :  { %v1664_v54 = vmul.f32 %v3457_v47, %v1661_v51 }
 0x95a   :  { %v3510_v55 = vpop.eup %3509 }
 0x95b   :  { %v1652_v56 = vmul.f32 %v3510_v55, %v1640_v0  ;;  %v1667_v39 = vadd.f32 %v3458_v53, %v1664_v54  ;;  %vm1658_vm8 = vweird.f32 %v3510_v55 }
 0x95c   :  { %vm1659_vm10 = vmor %vm1657_vm9, %vm1658_vm8 }
 0x95d   :  { %v1653_v32 = vmul.f32 %v3510_v55, %v1652_v56  ;;  %3336 = vmatmul.msk.f32.vlgmr.msrb.gmra.mxu1 %vm145_vm0, %v1667_v39 }
 0x95f   :  { %v1654_v57 = vmul.f32 0.5, %v1653_v32 }
 0x961   :  { %v1655_v58 = vsub.f32 1.5, %v1654_v57 }
 0x963   :  { %v1656_v26 = vmul.f32 %v3510_v55, %v1655_v58 }
 0x965   :  { %v1660_v59 = vsel %vm1659_vm10, %v3510_v55, %v1656_v26 }
 0x966   :  { %v1662_v43 = vmul.f32 %v1660_v59, %v1628_v16 }
 0x968   :  { %v1665_v61 = vmul.f32 %v3457_v47, %v1662_v43 }
 0x96a   :  { %v1668_v63 = vadd.f32 %v3458_v53, %v1665_v61 }
 0x96c   :  { %3337 = vmatmul.msk.f32.gmra.mxu1 %vm145_vm0, %v1668_v63 }
 0x9da   :  { %v1698_v28 = vpop.f32.mrf.mxu1 }
 0x9db   :  { %v1699_v35 = vadd.f32 %v3459_v1, %v1698_v28 }
 0x9dd   :  { %v1704_v40 = vsel %vm1460_vm6, %v1699_v35, -inf }
 0x9de   :  { %1705 = vmax.xlane.f32.xlu0 %v1704_v40 }
 0x9e9   :  { %v1701_v25 = vpop.f32.mrf.mxu1 }
 0x9ea   :  { %v1702_v3 = vadd.f32 %v3459_v1, %v1701_v25 }
 0x9ec   :  { %v1707_v49 = vsel %vm1460_vm6, %v1702_v3, -inf }
 0x9ed   :  { %1708 = vmax.xlane.f32.xlu1 %v1707_v49 }
 0xa51   :  { %v1706_v4 = vpop.xlane.xlu0 %1705 }
 0xa52   :  { %vm1710_vm11 = vcmp.eq.f32.partialorder %v1699_v35, %v1706_v4 }
 0xa53   :  { %v1712_v38 = vsel %vm1710_vm11, %v3816_v10, 16 }
 0xa54   :  { %v1714_v46 = vsel %vm1460_vm6, %v1712_v38, 2147483647 }
 0xa55   :  { %v1716_v20 = vshra.s32 %v1714_v46, 16  ;;  %v1715_v6 = vand.u32 65535, %v1714_v46 }
 0xa57   :  { %v1718_v52 = vcvt.s32.f32 %v1716_v20  ;;  %v1717_v41 = vcvt.s32.f32 %v1715_v6 }
 0xa59   :  { %1719 = vmin.xlane.f32.xlu2 %v1718_v52 }
 0xa60   :  { %v1709_v7 = vpop.xlane.xlu1 %1708 }
 0xa61   :  { %vm1711_vm12 = vcmp.eq.f32.partialorder %v1702_v3, %v1709_v7 }
 0xa62   :  { %v1713_v48 = vsel %vm1711_vm12, %v3816_v10, 16 }
 0xa63   :  { %v1729_v23 = vsel %vm1460_vm6, %v1713_v48, 2147483647 }
 0xa64   :  { %v1731_v60 = vshra.s32 %v1729_v23, 16  ;;  %v1730_v13 = vand.u32 65535, %v1729_v23 }
 0xa66   :  { %v1733_v9 = vcvt.s32.f32 %v1731_v60  ;;  %v1732_v8 = vcvt.s32.f32 %v1730_v13 }
 0xa68   :  { %1734 = vmin.xlane.f32.xlu0 %v1733_v9 }
 0xacc   :  { %v1720_v2 = vpop.xlane.xlu2 %1719 }
 0xacd   :  { %vm1721_vm13 = vcmp.eq.f32.partialorder %v1718_v52, %v1720_v2  ;;  %v1726_v44 = vcvt.f32.s32 %v1720_v2 }
 0xace   :  { %v1722_v11 = vsel %vm1721_vm13, %v1717_v41, inf }
 0xacf   :  { %1723 = vmin.xlane.f32.xlu1 %v1722_v11  ;;  %v1727_v15 = vshll.u32 %v1726_v44, 16 }
 0xadb   :  { %v1735_v14 = vpop.xlane.xlu0 %1734 }
 0xadc   :  { %vm1736_vm14 = vcmp.eq.f32.partialorder %v1733_v9, %v1735_v14  ;;  %v1741_v17 = vcvt.f32.s32 %v1735_v14 }
 0xadd   :  { %v1737_v16 = vsel %vm1736_vm14, %v1732_v8, inf }
 0xade   :  { %1738 = vmin.xlane.f32.xlu2 %v1737_v16  ;;  %v1742_v36 = vshll.u32 %v1741_v17, 16 }
 0xb42   :  { %v1724_v29 = vpop.xlane.xlu1 %1723 }
 0xb43   :  { %v1725_v33 = vcvt.f32.s32 %v1724_v29 }
 0xb45   :  { %v1728_v18 = vadd.s32 %v1727_v15, %v1725_v33 }
 0xb47   :  { %vm1744_vm15 = vcmp.eq.s32.totalorder %v3816_v10, %v1728_v18 }
 0xb48   :  { %v3338_v21 = vsel %vm1744_vm15, 1.0, %v3724_v12 }
 0xb49   :  { %3340 = vmatmul.msk.f32.vlgmr.msrb.gmra.mxu0 %vm1460_vm6, %v3338_v21 }
 0xb51   :  { %v1739_v34 = vpop.xlane.xlu2 %1738 }
 0xb52   :  { %v1740_v24 = vcvt.f32.s32 %v1739_v34 }
 0xb54   :  { %v1743_v31 = vadd.s32 %v1742_v36, %v1740_v24 }
 0xb56   :  { %vm1745_vm1 = vcmp.eq.s32.totalorder %v3816_v10, %v1743_v31  ;;  %v3460_v10 = vld [vmem:[%s5005_s7 + $0x9] ss:$0 sm:$0xff] }
 0xb57   :  { %v3339_v0 = vsel %vm1745_vm1, 1.0, %v3724_v12 }
 0xb58   :  { %3341 = vmatmul.msk.f32.gmra.mxu0 %vm1460_vm6, %v3339_v0 }
 0xbc6   :  { %v4422_v47 = vpop.f32.mrf.mxu0 }
 0xbc7   :  { %3342 = vmatmul.msk.f32.vlgmr.msra.gmra.mxu1 %vm145_vm0, %v4422_v47 }
 0xbd5   :  { %v4426_v50 = vpop.f32.mrf.mxu0 }
 0xbd6   :  { %3343 = vmatmul.msk.f32.gmra.mxu1 %vm145_vm0, %v4426_v50 }
 0xc44   :  { %v1833_v51 = vpop.f32.mrf.mxu1 }
 0xc45   :  { %v4441_v54 = vadd.f32 %v3460_v10, %v1833_v51 }
 0xc47   :  { %v1861_v9 = vrot.slane %v4441_v54, 4 }
 0xc53   :  { %v1836_v12 = vpop.f32.mrf.mxu1 }
 0xc54   :  { %v4433_v53 = vadd.f32 %v3460_v10, %v1836_v12 }
 0xc56   :  { %1843 = vrot.lane.b32.xlu2 %v4433_v53, %s3727_s4  ;;  %1855 = vrot.lane.b32.xlu1 %v4433_v53, %s3725_s19  ;;  %v1917_v32 = vrot.slane %v4433_v53, 4 }
 0xc57   :  { %1849 = vrot.lane.b32.xlu0 %v4433_v53, %s3728_s21 }
 0xc5e   :  { %1853 = vrot.lane.b32.xlu1 %v4441_v54, %s3725_s19 }
 0xc5f   :  { %1847 = vrot.lane.b32.xlu0 %v4441_v54, %s3728_s21 }
 0xc66   :  { %2081 = vrot.lane.b32.xlu1 %v4433_v53, %s3726_s20 }
 0xc67   :  { %1841 = vrot.lane.b32.xlu0 %v4441_v54, %s3727_s4 }
 0xcb0   :  { %v4451_v55 = vpop.permute.xlu2 %1843 }
 0xcb1   :  { %v1929_v56 = vrot.slane %v4451_v55, 4 }
 0xcc8   :  { %v4454_v39 = vpop.permute.xlu1 %1855 }
 0xcc9   :  { %v1927_v57 = vrot.slane %v4454_v39, 4  ;;  %v1930_v58 = vsel %vm262_vm3, %v4454_v39, %v1929_v56  ;;  %v1850_v26 = vpop.permute.xlu0 %1849  ;;  %2093 = vrot.lane.b32.xlu0 %v4454_v39, %s3726_s20 }
 0xcca   :  { %v1938_v59 = vperm.slane %v1930_v58, %v3862_v37  ;;  %v1915_v43 = vrot.slane %v1850_v26, 4  ;;  %v1918_v61 = vsel %vm262_vm3, %v1850_v26, %v1917_v32  ;;  %2089 = vrot.lane.b32.xlu2 %v1850_v26, %s3726_s20  ;;  %v3431_v29 = vpack.i.bf16 %v4433_v53, %v1850_v26 }
 0xccb   :  { %v1928_v63 = vsel %vm262_vm3, %v1927_v57, %v4451_v55  ;;  %v1926_v1 = vperm.slane %v1918_v61, %v3862_v37 }
 0xccc   :  { %v1934_v28 = vperm.slane %v1928_v63, %v3862_v37  ;;  %v1951_v35 = vrot.slane %v1938_v59, 4  ;;  %v1916_v40 = vsel %vm262_vm3, %v1915_v43, %v4433_v53 }
 0xccd   :  { %v1922_v25 = vperm.slane %v1916_v40, %v3862_v37  ;;  %v1953_v3 = vrot.slane %v1926_v1, 4 }
 0xcce   :  { %v1939_v49 = vrot.slane %v1934_v28, 4  ;;  %v1952_v4 = vsel %vm262_vm3, %v1951_v35, %v1926_v1 }
 0xccf   :  { %v1941_v38 = vrot.slane %v1922_v25, 4  ;;  %v1954_v46 = vsel %vm262_vm3, %v1938_v59, %v1953_v3  ;;  %v1958_v20 = vperm.slane %v1952_v4, %v3871_v45 }
 0xcd0   :  { %v1940_v52 = vsel %vm262_vm3, %v1939_v49, %v1922_v25  ;;  %v1962_v7 = vperm.slane %v1954_v46, %v3871_v45  ;;  %v4499_v44 = vpop.permute.xlu1 %1853 }
 0xcd1   :  { %v1942_v48 = vsel %vm262_vm3, %v1934_v28, %v1941_v38  ;;  %v1946_v23 = vperm.slane %v1940_v52, %v3871_v45  ;;  %v1967_v60 = vrot.slane %v1958_v20, 4  ;;  %v4480_v6 = vpop.permute.xlu0 %1847  ;;  %2079 = vrot.lane.b32.xlu0 %v4441_v54, %s3726_s20  ;;  %v1871_v31 = vrot.slane %v4499_v44, 4 }
 0xcd2   :  { %v1969_v2 = vrot.slane %v1962_v7, 4  ;;  %v1859_v41 = vrot.slane %v4480_v6, 4  ;;  %2085 = vrot.lane.b32.xlu2 %v4451_v55, %s3726_s20  ;;  %2087 = vrot.lane.b32.xlu1 %v4480_v6, %s3726_s20  ;;  %v1950_v11 = vperm.slane %v1942_v48, %v3871_v45  ;;  %v1862_v14 = vsel %vm262_vm3, %v4480_v6, %v1861_v9 }
 0xcd3   :  { %v1963_v13 = vrot.slane %v1946_v23, 4  ;;  %v3436_v8 = vpack.i.bf16 %v4454_v39, %v4480_v6  ;;  %v1968_v30 = vsel %vm262_vm3, 0.0, %v1967_v60  ;;  %v1870_v15 = vperm.slane %v1862_v14, %v3862_v37 }
 0xcd4   :  { %v1970_v16 = vsel %vm262_vm3, 0.0, %v1969_v2  ;;  %v1860_v22 = vsel %vm262_vm3, %v1859_v41, %v4441_v54  ;;  %v1965_v19 = vrot.slane %v1950_v11, 4  ;;  %v2036_v62 = vsel %vm262_vm3, %v1969_v2, %v1958_v20 }
 0xcd5   :  { %v2041_v27 = vrot.slane %v1970_v16, 4  ;;  %v2040_v21 = vperm.slane %v2036_v62, %v3862_v37  ;;  %v1866_v17 = vperm.slane %v1860_v22, %v3862_v37  ;;  %v1964_v0 = vsel %vm262_vm3, 0.0, %v1963_v13 }
 0xcd6   :  { %v1966_v33 = vsel %vm262_vm3, 0.0, %v1965_v19  ;;  %v2025_v18 = vsel %vm262_vm3, %v1965_v19, %v1946_v23  ;;  %v1897_v59 = vrot.slane %v1870_v15, 4 }
 0xcd7   :  { %v2029_v34 = vperm.slane %v2025_v18, %v3862_v37  ;;  %v2030_v36 = vrot.slane %v1966_v33, 4  ;;  %v2042_v24 = vsel %vm262_vm3, %v2041_v27, %v1968_v30  ;;  %v2061_v51 = vrot.slane %v2040_v21, 4 }
 0xcd8   :  { %v2046_v42 = vperm.slane %v2042_v24, %v3862_v37  ;;  %v1885_v26 = vrot.slane %v1866_v17, 4 }
 0xcd9   :  { %v4512_v10 = vpop.permute.xlu0 %1841  ;;  %3432 = vrot.lane.b32.xlu0 %v3431_v29, %s3716_s2  ;;  %v2031_v12 = vsel %vm262_vm3, %v2030_v36, %v1964_v0  ;;  %v2049_v53 = vrot.slane %v2029_v34, 4 }
 0xcda   :  { %v1872_v56 = vsel %vm262_vm3, %v1871_v31, %v4512_v10  ;;  %v1873_v32 = vrot.slane %v4512_v10, 4  ;;  %2091 = vrot.lane.b32.xlu2 %v4499_v44, %s3726_s20  ;;  %2083 = vrot.lane.b32.xlu1 %v4512_v10, %s3726_s20  ;;  %v2035_v57 = vperm.slane %v2031_v12, %v3862_v37  ;;  %v2059_v58 = vrot.slane %v2046_v42, 4 }
 0xcdb   :  { %v1878_v43 = vperm.slane %v1872_v56, %v3862_v37  ;;  %v2062_v61 = vsel %vm262_vm3, %v2046_v42, %v2061_v51 }
 0xcdc   :  { %v1874_v63 = vsel %vm262_vm3, %v4499_v44, %v1873_v32  ;;  %v2047_v1 = vrot.slane %v2035_v57, 4  ;;  %v2060_v28 = vsel %vm262_vm3, %v2059_v58, %v2040_v21  ;;  %v2050_v35 = vsel %vm262_vm3, %v2035_v57, %v2049_v53 }
 0xcdd   :  { %v1882_v40 = vperm.slane %v1874_v63, %v3862_v37  ;;  %v1883_v25 = vrot.slane %v1878_v43, 4  ;;  %v1886_v3 = vsel %vm262_vm3, %v1878_v43, %v1885_v26  ;;  %v2066_v49 = vperm.slane %v2060_v28, %v3871_v45 }
 0xcde   :  { %v1894_v4 = vperm.slane %v1886_v3, %v3871_v45  ;;  %v2048_v38 = vsel %vm262_vm3, %v2047_v1, %v2029_v34  ;;  %v2058_v46 = vperm.slane %v2050_v35, %v3871_v45  ;;  %v2070_v20 = vperm.slane %v2062_v61, %v3871_v45 }
 0xcdf   :  { %v1884_v52 = vsel %vm262_vm3, %v1883_v25, %v1866_v17  ;;  %v1895_v7 = vrot.slane %v1882_v40, 4  ;;  %v1898_v48 = vsel %vm262_vm3, %v1882_v40, %v1897_v59  ;;  %v2054_v23 = vperm.slane %v2048_v38, %v3871_v45 }
 0xce0   :  { %v1890_v60 = vperm.slane %v1884_v52, %v3871_v45  ;;  %v1906_v9 = vperm.slane %v1898_v48, %v3871_v45  ;;  %v1909_v2 = vrot.slane %v1894_v4, 4  ;;  %v2071_v41 = vrot.slane %v2066_v49, 4 }
 0xce1   :  { %v1896_v11 = vsel %vm262_vm3, %v1895_v7, %v1870_v15  ;;  %v2073_v13 = vrot.slane %v2054_v23, 4  ;;  %v2075_v14 = vrot.slane %v2070_v20, 4  ;;  %v2077_v16 = vrot.slane %v2058_v46, 4 }
 0xce2   :  { %v1902_v22 = vperm.slane %v1896_v11, %v3871_v45  ;;  %v1907_v19 = vrot.slane %v1890_v60, 4  ;;  %v1910_v62 = vsel %vm262_vm3, 0.0, %v1909_v2  ;;  %v1913_v30 = vrot.slane %v1906_v9, 4 }
 0xce3   :  { %v1976_v27 = vrot.slane %v1910_v62, 4  ;;  %v1971_v29 = vsel %vm262_vm3, %v1909_v2, %v1890_v60  ;;  %v4547_v33 = vsel %vm262_vm3, %v2071_v41, %v2054_v23  ;;  %v4550_v18 = vsel %vm262_vm3, %v2066_v49, %v2073_v13  ;;  %v2082_v23 = vpop.permute.xlu1 %2081 }
 0xce4   :  { %v1908_v15 = vsel %vm262_vm3, 0.0, %v1907_v19  ;;  %v1911_v21 = vrot.slane %v1902_v22, 4  ;;  %v1914_v17 = vsel %vm262_vm3, 0.0, %v1913_v30  ;;  %v1975_v34 = vperm.slane %v1971_v29, %v3862_v37 }
 0xce5   :  { %v1987_v36 = vrot.slane %v1914_v17, 4  ;;  %v1977_v24 = vsel %vm262_vm3, %v1976_v27, %v1908_v15  ;;  %v1982_v31 = vsel %vm262_vm3, %v1913_v30, %v1902_v22  ;;  %v4558_v0 = vsel %vm262_vm3, %v2075_v14, %v2058_v46 }
 0xce6   :  { %v1912_v42 = vsel %vm262_vm3, 0.0, %v1911_v21  ;;  %v1981_v51 = vperm.slane %v1977_v24, %v3862_v37  ;;  %v1986_v12 = vperm.slane %v1982_v31, %v3862_v37  ;;  %v1995_v53 = vrot.slane %v1975_v34, 4 }
 0xce7   :  { %v1988_v56 = vsel %vm262_vm3, %v1987_v36, %v1912_v42  ;;  %v4565_v32 = vsel %vm262_vm3, %v2070_v20, %v2077_v16  ;;  %v2161_v60 = vrot.slane %v2082_v23, 4 }
 0xce8   :  { %v1992_v57 = vperm.slane %v1988_v56, %v3862_v37  ;;  %v1993_v58 = vrot.slane %v1981_v51, 4  ;;  %v1996_v26 = vsel %vm262_vm3, %v1981_v51, %v1995_v53  ;;  %v2007_v59 = vrot.slane %v1986_v12, 4 }
 0xce9   :  { %v2004_v43 = vperm.slane %v1996_v26, %v3871_v45 }
 0xcea   :  { %v1994_v61 = vsel %vm262_vm3, %v1993_v58, %v1975_v34  ;;  %v2005_v63 = vrot.slane %v1992_v57, 4  ;;  %v2008_v1 = vsel %vm262_vm3, %v1992_v57, %v2007_v59 }
 0xceb   :  { %v2000_v28 = vperm.slane %v1994_v61, %v3871_v45  ;;  %v2016_v35 = vperm.slane %v2008_v1, %v3871_v45  ;;  %v2023_v40 = vrot.slane %v2004_v43, 4 }
 0xcec   :  { %v2006_v25 = vsel %vm262_vm3, %v2005_v63, %v1986_v12 }
 0xced   :  { %v2012_v3 = vperm.slane %v2006_v25, %v3871_v45  ;;  %v2019_v49 = vrot.slane %v2000_v28, 4  ;;  %v2021_v4 = vrot.slane %v2016_v35, 4  ;;  %v4577_v38 = vsel %vm262_vm3, %v2016_v35, %v2023_v40 }
 0xcef   :  { %v2017_v46 = vrot.slane %v2012_v3, 4  ;;  %v4580_v20 = vsel %vm262_vm3, %v2012_v3, %v2019_v49  ;;  %v4583_v52 = vsel %vm262_vm3, %v2021_v4, %v2004_v43 }
 0xcf1   :  { %v4586_v7 = vsel %vm262_vm3, %v2017_v46, %v2000_v28 }
 0xd24   :  { %v2090_v48 = vpop.permute.xlu2 %2089 }
 0xd25   :  { %v2159_v9 = vrot.slane %v2090_v48, 4  ;;  %v2162_v2 = vsel %vm262_vm3, %v2090_v48, %v2161_v60 }
 0xd26   :  { %v2170_v13 = vperm.slane %v2162_v2, %v3862_v37 }
 0xd27   :  { %v2160_v11 = vsel %vm262_vm3, %v2159_v9, %v2082_v23 }
 0xd28   :  { %v2166_v16 = vperm.slane %v2160_v11, %v3862_v37  ;;  %v2197_v30 = vrot.slane %v2170_v13, 4 }
 0xd2a   :  { %v2185_v15 = vrot.slane %v2166_v16, 4 }
 0xd2c   :  { %v2086_v41 = vpop.permute.xlu2 %2085 }
 0xd2d   :  { %v2173_v14 = vrot.slane %v2086_v41, 4 }
 0xd34   :  { %v2092_v23 = vpop.permute.xlu2 %2091 }
 0xd3b   :  { %v2094_v22 = vpop.permute.xlu0 %2093 }
 0xd3c   :  { %v2171_v19 = vrot.slane %v2094_v22, 4  ;;  %v2174_v62 = vsel %vm262_vm3, %v2094_v22, %v2173_v14 }
 0xd3d   :  { %v2182_v27 = vperm.slane %v2174_v62, %v3862_v37 }
 0xd3e   :  { %v2172_v29 = vsel %vm262_vm3, %v2171_v19, %v2086_v41  ;;  %v2115_v19 = vrot.slane %v2092_v23, 4 }
 0xd3f   :  { %v2178_v21 = vperm.slane %v2172_v29, %v3862_v37  ;;  %v2195_v17 = vrot.slane %v2182_v27, 4  ;;  %v2198_v34 = vsel %vm262_vm3, %v2182_v27, %v2197_v30 }
 0xd40   :  { %v2206_v36 = vperm.slane %v2198_v34, %v3871_v45 }
 0xd41   :  { %v2183_v24 = vrot.slane %v2178_v21, 4  ;;  %v2186_v31 = vsel %vm262_vm3, %v2178_v21, %v2185_v15  ;;  %v2196_v42 = vsel %vm262_vm3, %v2195_v17, %v2170_v13 }
 0xd42   :  { %v2194_v51 = vperm.slane %v2186_v31, %v3871_v45  ;;  %v2202_v12 = vperm.slane %v2196_v42, %v3871_v45  ;;  %v2213_v53 = vrot.slane %v2206_v36, 4 }
 0xd43   :  { %v2184_v56 = vsel %vm262_vm3, %v2183_v24, %v2166_v16  ;;  %v2080_v57 = vpop.permute.xlu0 %2079 }
 0xd44   :  { %v2190_v58 = vperm.slane %v2184_v56, %v3871_v45  ;;  %v2209_v26 = vrot.slane %v2194_v51, 4  ;;  %v2211_v59 = vrot.slane %v2202_v12, 4  ;;  %v2214_v43 = vsel %vm262_vm3, 0.0, %v2213_v53  ;;  %v2088_v61 = vpop.permute.xlu1 %2087 }
 0xd45   :  { %v2280_v63 = vsel %vm262_vm3, %v2213_v53, %v2202_v12  ;;  %v2285_v1 = vrot.slane %v2214_v43, 4  ;;  %v2103_v28 = vrot.slane %v2088_v61, 4  ;;  %v2105_v35 = vrot.slane %v2080_v57, 4 }
 0xd46   :  { %v2207_v40 = vrot.slane %v2190_v58, 4  ;;  %v2210_v25 = vsel %vm262_vm3, 0.0, %v2209_v26  ;;  %v2212_v3 = vsel %vm262_vm3, 0.0, %v2211_v59  ;;  %v2269_v49 = vsel %vm262_vm3, %v2209_v26, %v2190_v58 }
 0xd47   :  { %v2274_v4 = vrot.slane %v2210_v25, 4  ;;  %v2104_v46 = vsel %vm262_vm3, %v2103_v28, %v2080_v57  ;;  %v4611_v48 = vperm.slane %v2269_v49, %v3862_v37  ;;  %v4615_v9 = vperm.slane %v2280_v63, %v3862_v37 }
 0xd48   :  { %v2208_v60 = vsel %vm262_vm3, 0.0, %v2207_v40  ;;  %v2106_v2 = vsel %vm262_vm3, %v2088_v61, %v2105_v35  ;;  %v2286_v11 = vsel %vm262_vm3, %v2285_v1, %v2212_v3  ;;  %v2110_v14 = vperm.slane %v2104_v46, %v3862_v37 }
 0xd49   :  { %v2275_v41 = vsel %vm262_vm3, %v2274_v4, %v2208_v60  ;;  %v2293_v13 = vrot.slane %v4611_v48, 4  ;;  %v4624_v22 = vperm.slane %v2286_v11, %v3862_v37  ;;  %v2305_v62 = vrot.slane %v4615_v9, 4 }
 0xd4a   :  { %v2279_v16 = vperm.slane %v2275_v41, %v3862_v37  ;;  %v2114_v30 = vperm.slane %v2106_v2, %v3862_v37  ;;  %v2129_v36 = vrot.slane %v2110_v14, 4 }
 0xd4b   :  { %v2306_v34 = vsel %vm262_vm3, %v4624_v22, %v2305_v62 }
 0xd4c   :  { %v2084_v27 = vpop.permute.xlu1 %2083  ;;  %v2294_v29 = vsel %vm262_vm3, %v2279_v16, %v2293_v13  ;;  %v2314_v42 = vperm.slane %v2306_v34, %v3871_v45  ;;  %v2141_v12 = vrot.slane %v2114_v30, 4 }
 0xd4d   :  { %v2116_v15 = vsel %vm262_vm3, %v2115_v19, %v2084_v27  ;;  %v2117_v21 = vrot.slane %v2084_v27, 4  ;;  %v2302_v17 = vperm.slane %v2294_v29, %v3871_v45 }
 0xd4e   :  { %v2122_v24 = vperm.slane %v2116_v15, %v3862_v37 }
 0xd4f   :  { %v2118_v31 = vsel %vm262_vm3, %v2092_v23, %v2117_v21  ;;  %v2321_v51 = vrot.slane %v2302_v17, 4 }
 0xd50   :  { %v2126_v53 = vperm.slane %v2118_v31, %v3862_v37  ;;  %v2127_v56 = vrot.slane %v2122_v24, 4  ;;  %v2130_v57 = vsel %vm262_vm3, %v2122_v24, %v2129_v36  ;;  %v2291_v31 = vrot.slane %v2279_v16, 4 }
 0xd51   :  { %v2138_v58 = vperm.slane %v2130_v57, %v3871_v45  ;;  %v2322_v26 = vsel %vm262_vm3, %v2314_v42, %v2321_v51 }
 0xd52   :  { %v2128_v59 = vsel %vm262_vm3, %v2127_v56, %v2110_v14  ;;  %v2139_v43 = vrot.slane %v2126_v53, 4  ;;  %v2142_v61 = vsel %vm262_vm3, %v2126_v53, %v2141_v12  ;;  %3344 = vmatpush.xpose.msk.msrb.mxu3 %vm970_vm4, %v2322_v26  ;;  %v2319_v56 = vrot.slane %v2314_v42, 4 }
 0xd53   :  { %v2134_v63 = vperm.slane %v2128_v59, %v3871_v45  ;;  %v2150_v1 = vperm.slane %v2142_v61, %v3871_v45  ;;  %v2153_v28 = vrot.slane %v2138_v58, 4  ;;  %v2292_v57 = vsel %vm262_vm3, %v2291_v31, %v4611_v48 }
 0xd54   :  { %v2140_v35 = vsel %vm262_vm3, %v2139_v43, %v2114_v30  ;;  %v2303_v26 = vrot.slane %v4624_v22, 4  ;;  %v2320_v59 = vsel %vm262_vm3, %v2319_v56, %v2302_v17  ;;  %v2298_v61 = vperm.slane %v2292_v57, %v3871_v45 }
 0xd55   :  { %v2146_v40 = vperm.slane %v2140_v35, %v3871_v45  ;;  %v2151_v25 = vrot.slane %v2134_v63, 4  ;;  %v2154_v3 = vsel %vm262_vm3, 0.0, %v2153_v28  ;;  %v2157_v49 = vrot.slane %v2150_v1, 4 }
 0xd56   :  { %v2215_v4 = vsel %vm262_vm3, %v2153_v28, %v2134_v63  ;;  %v2220_v46 = vrot.slane %v2154_v3, 4  ;;  %v2304_v42 = vsel %vm262_vm3, %v2303_v26, %v4615_v9  ;;  %v2317_v28 = vrot.slane %v2298_v61, 4 }
 0xd57   :  { %v2152_v23 = vsel %vm262_vm3, 0.0, %v2151_v25  ;;  %v2155_v60 = vrot.slane %v2146_v40, 4  ;;  %v2158_v2 = vsel %vm262_vm3, 0.0, %v2157_v49  ;;  %v2219_v41 = vperm.slane %v2215_v4, %v3862_v37 }
 0xd58   :  { %v2231_v11 = vrot.slane %v2158_v2, 4  ;;  %v2221_v13 = vsel %vm262_vm3, %v2220_v46, %v2152_v23  ;;  %v2226_v14 = vsel %vm262_vm3, %v2157_v49, %v2146_v40  ;;  %v2310_v17 = vperm.slane %v2304_v42, %v3871_v45 }
 0xd59   :  { %v2156_v19 = vsel %vm262_vm3, 0.0, %v2155_v60  ;;  %v2225_v62 = vperm.slane %v2221_v13, %v3862_v37  ;;  %v2230_v30 = vperm.slane %v2226_v14, %v3862_v37  ;;  %v2239_v27 = vrot.slane %v2219_v41, 4  ;;  %v3554_v14 = vld [vmem:[#allocation6 + $0x18] sm:$0xff] }
 0xd5a   :  { %v2232_v29 = vsel %vm262_vm3, %v2231_v11, %v2156_v19  ;;  %v2318_v35 = vsel %vm262_vm3, %v2310_v17, %v2317_v28  ;;  %v2315_v3 = vrot.slane %v2310_v17, 4 }
 0xd5b   :  { %v2236_v15 = vperm.slane %v2232_v29, %v3862_v37  ;;  %v2240_v21 = vsel %vm262_vm3, %v2225_v62, %v2239_v27  ;;  %v2251_v34 = vrot.slane %v2230_v30, 4  ;;  %v2237_v58 = vrot.slane %v2225_v62, 4 }
 0xd5c   :  { %v2248_v36 = vperm.slane %v2240_v21, %v3871_v45  ;;  %v2316_v49 = vsel %vm262_vm3, %v2315_v3, %v2298_v61  ;;  %v3556_v21 = vld [vmem:[#allocation6 + $0x28] sm:$0xff] }
 0xd5d   :  { %v2252_v24 = vsel %vm262_vm3, %v2236_v15, %v2251_v34  ;;  %v2238_v16 = vsel %vm262_vm3, %v2237_v58, %v2219_v41  ;;  %v2249_v63 = vrot.slane %v2236_v15, 4 }
 0xd5e   :  { %v2260_v51 = vperm.slane %v2252_v24, %v3871_v45  ;;  %v2267_v12 = vrot.slane %v2248_v36, 4  ;;  %v2244_v48 = vperm.slane %v2238_v16, %v3871_v45  ;;  %v3558_v24 = vld [vmem:[#allocation6 + $0x38] sm:$0xff] }
 0xd5f   :  { %v2250_v22 = vsel %vm262_vm3, %v2249_v63, %v2230_v30  ;;  %v3441_v30 = vpack.i.bf16 %v4451_v55, %v4441_v54  ;;  %v3557_v54 = vld [vmem:[#allocation6 + $0x30] sm:$0xff] }
 0xd60   :  { %v2268_v53 = vsel %vm262_vm3, %v2260_v51, %v2267_v12  ;;  %v2265_v43 = vrot.slane %v2260_v51, 4  ;;  %v2256_v40 = vperm.slane %v2250_v22, %v3871_v45  ;;  %v2263_v25 = vrot.slane %v2244_v48, 4  ;;  %v3433_v12 = vpop.permute.xlu0 %3432 }
 0xd61   :  { %3345 = vmatpush.xpose.msk.msrb.mxu3 %vm970_vm4, %v2268_v53 }
 0xd62   :  { %v2266_v1 = vsel %vm262_vm3, %v2265_v43, %v2248_v36  ;;  %v2264_v9 = vsel %vm262_vm3, %v2256_v40, %v2263_v25  ;;  %v2261_v4 = vrot.slane %v2256_v40, 4  ;;  %v3435_v25 = vunpack.i.h.bf16 %v3433_v12 }
 0xd64   :  { %v2262_v46 = vsel %vm262_vm3, %v2261_v4, %v2244_v48  ;;  %v3434_v4 = vunpack.i.l.bf16 %v3433_v12 }
 0xd65   :  { %3346 = vmatpush.xpose.msk.msrb.mxu3 %vm970_vm4, %v2320_v59 }
 0xd69   :  { %3347 = vmatpush.xpose.msk.msrb.mxu3 %vm970_vm4, %v2266_v1 }
 0xd6d   :  { %3348 = vmatpush.xpose.msk.msrb.mxu3 %vm970_vm4, %v2318_v35 }
 0xd71   :  { %3349 = vmatpush.xpose.msk.msrb.mxu3 %vm970_vm4, %v2264_v9 }
 0xd75   :  { %3350 = vmatpush.xpose.msk.msrb.mxu3 %vm970_vm4, %v2316_v49 }
 0xd79   :  { %3351 = vmatpush.xpose.msk.msrb.mxu3 %vm970_vm4, %v2262_v46  ;;  %v2405_v46 = vrot.slane %v3435_v25, 4 }
 0xd7c   :  { %3352 = vmatmul.msk.f32.vlgmr.msrb.gmra.mxu3 %vm970_vm4, %v4586_v7 }
 0xd84   :  { %3353 = vmatmul.msk.f32.gmra.mxu3 %vm970_vm4, %v4547_v33  ;;  %v3551_v33 = vld [vmem:[#allocation6] sm:$0xff] }
 0xd8c   :  { %3354 = vmatmul.msk.f32.gmra.mxu3 %vm970_vm4, %v4580_v20 }
 0xd94   :  { %3355 = vmatmul.msk.f32.gmra.mxu3 %vm970_vm4, %v4550_v18  ;;  %v3552_v18 = vld [vmem:[#allocation6 + $0x8] sm:$0xff] }
 0xd9c   :  { %3356 = vmatmul.msk.f32.gmra.mxu3 %vm970_vm4, %v4583_v52 }
 0xda4   :  { %3357 = vmatmul.msk.f32.gmra.mxu3 %vm970_vm4, %v4558_v0  ;;  %v3553_v0 = vld [vmem:[#allocation6 + $0x10] sm:$0xff] }
 0xdac   :  { %3358 = vmatmul.msk.f32.gmra.mxu3 %vm970_vm4, %v4577_v38 }
 0xdb4   :  { %3359 = vmatmul.msk.f32.gmra.mxu3 %vm970_vm4, %v4565_v32  ;;  %v3446_v32 = vpack.i.bf16 %v4512_v10, %v4499_v44  ;;  %v3555_v44 = vld [vmem:[#allocation6 + $0x20] sm:$0xff] }
 0xdff   :  { %v2632_v7 = vpop.f32.mrf.mxu3 }
 0xe00   :  { %v2633_v23 = vadd.f32 %v3551_v33, %v2632_v7 }
 0xe02   :  { %v2656_v20 = vsel %vm1060_vm5, %v2633_v23, -inf }
 0xe03   :  { %2657 = vmax.xlane.f32.xlu0 %v2656_v20 }
 0xe07   :  { %v2635_v60 = vpop.f32.mrf.mxu3 }
 0xe08   :  { %v2636_v2 = vadd.f32 %v3552_v18, %v2635_v60  ;;  %v2403_v60 = vrot.slane %v3434_v4, 4  ;;  %v2406_v18 = vsel %vm262_vm3, %v3434_v4, %v2405_v46 }
 0xe0a   :  { %v2659_v52 = vsel %vm1060_vm5, %v2636_v2, -inf }
 0xe0b   :  { %2660 = vmax.xlane.f32.xlu2 %v2659_v52 }
 0xe0f   :  { %v2638_v41 = vpop.f32.mrf.mxu3 }
 0xe10   :  { %v2639_v11 = vadd.f32 %v3553_v0, %v2638_v41 }
 0xe12   :  { %v2662_v38 = vsel %vm1060_vm5, %v2639_v11, -inf }
 0xe13   :  { %2663 = vmax.xlane.f32.xlu1 %v2662_v38  ;;  %v2404_v38 = vsel %vm262_vm3, %v2403_v60, %v3435_v25 }
 0xe17   :  { %3447 = vrot.lane.b32.xlu0 %v3446_v32, %s3716_s2  ;;  %v2641_v13 = vpop.f32.mrf.mxu3  ;;  %v2414_v32 = vperm.slane %v2406_v18, %v3862_v37 }
 0xe18   :  { %v2642_v19 = vadd.f32 %v3554_v14, %v2641_v13 }
 0xe1a   :  { %v2665_v62 = vsel %vm1060_vm5, %v2642_v19, -inf }
 0xe1b   :  { %2666 = vmax.xlane.f32.xlu2 %v2665_v62 }
 0xe1f   :  { %v2644_v27 = vpop.f32.mrf.mxu3 }
 0xe20   :  { %v4718_v10 = vadd.f32 %v3555_v44, %v2644_v27 }
 0xe22   :  { %v2668_v29 = vsel %vm1060_vm5, %v4718_v10, -inf }
 0xe27   :  { %v2647_v15 = vpop.f32.mrf.mxu3 }
 0xe28   :  { %v4722_v34 = vadd.f32 %v3556_v21, %v2647_v15 }
 0xe2a   :  { %v2671_v39 = vsel %vm1060_vm5, %v4722_v34, -inf }
 0xe2c   :  { %3437 = vrot.lane.b32.xlu1 %v3436_v8, %s3716_s2 }
 0xe2f   :  { %v2650_v36 = vpop.f32.mrf.mxu3 }
 0xe30   :  { %v4726_v55 = vadd.f32 %v3557_v54, %v2650_v36 }
 0xe32   :  { %v2674_v6 = vsel %vm1060_vm5, %v4726_v55, -inf }
 0xe33   :  { %3442 = vrot.lane.b32.xlu2 %v3441_v30, %s3716_s2 }
 0xe37   :  { %v2653_v8 = vpop.f32.mrf.mxu3 }
 0xe38   :  { %v4730_v31 = vadd.f32 %v3558_v24, %v2653_v8  ;;  %v2441_v24 = vrot.slane %v2414_v32, 4 }
 0xe3a   :  { %v2677_v51 = vsel %vm1060_vm5, %v4730_v31, -inf }
 0xe41   :  { %2669 = vmax.xlane.f32.xlu0 %v2668_v29  ;;  %v2410_v29 = vperm.slane %v2404_v38, %v3862_v37 }
 0xe56   :  { %2672 = vmax.xlane.f32.xlu1 %v2671_v39 }
 0xe5c   :  { %2675 = vmax.xlane.f32.xlu2 %v2674_v6 }
 0xe64   :  { %2678 = vmax.xlane.f32.xlu2 %v2677_v51 }
 0xe76   :  { %v2658_v53 = vpop.xlane.xlu0 %2657 }
 0xe77   :  { %v2680_v56 = vsub.f32 %v2633_v23, %v2658_v53 }
 0xe79   :  { %v2688_v57 = vmul.f32 1.442695, %v2680_v56 }
 0xe7b   :  { %3511 = vpow2.f32 %v2688_v57 }
 0xe7e   :  { %v2661_v58 = vpop.xlane.xlu2 %2660 }
 0xe7f   :  { %v2681_v26 = vsub.f32 %v2636_v2, %v2661_v58 }
 0xe81   :  { %v4734_v59 = vpop.eup %3511  ;;  %v2690_v43 = vmul.f32 1.442695, %v2681_v26 }
 0xe82   :  { %v2704_v61 = vsel %vm1060_vm5, %v4734_v59, 0.0 }
 0xe83   :  { %3513 = vpow2.f32 %v2690_v43  ;;  %2705 = vadd.xlane.f32.xlu0 %v2704_v61  ;;  %v2429_v43 = vrot.slane %v2410_v29, 4 }
 0xe86   :  { %v2664_v16 = vpop.xlane.xlu1 %2663 }
 0xe87   :  { %v2682_v63 = vsub.f32 %v2639_v11, %v2664_v16 }
 0xe89   :  { %v4738_v42 = vpop.eup %3513  ;;  %v2692_v1 = vmul.f32 1.442695, %v2682_v63  ;;  %v3448_v17 = vpop.permute.xlu0 %3447 }
 0xe8a   :  { %v2707_v28 = vsel %vm1060_vm5, %v4738_v42, 0.0  ;;  %v3450_v3 = vunpack.i.h.bf16 %v3448_v17  ;;  %v3449_v49 = vunpack.i.l.bf16 %v3448_v17 }
 0xe8b   :  { %3515 = vpow2.f32 %v2692_v1  ;;  %2708 = vadd.xlane.f32.xlu1 %v2707_v28 }
 0xe8c   :  { %v2361_v7 = vrot.slane %v3450_v3, 4  ;;  %v2359_v33 = vrot.slane %v3449_v49, 4 }
 0xe8e   :  { %v2667_v48 = vpop.xlane.xlu2 %2666  ;;  %v2360_v52 = vsel %vm262_vm3, %v2359_v33, %v3450_v3  ;;  %v2362_v41 = vsel %vm262_vm3, %v3449_v49, %v2361_v7 }
 0xe8f   :  { %v2683_v22 = vsub.f32 %v2642_v19, %v2667_v48  ;;  %v2366_v13 = vperm.slane %v2360_v52, %v3862_v37  ;;  %v2370_v14 = vperm.slane %v2362_v41, %v3862_v37 }
 0xe91   :  { %v4742_v35 = vpop.eup %3515  ;;  %v2694_v40 = vmul.f32 1.442695, %v2683_v22  ;;  %v2383_v54 = vrot.slane %v2370_v14, 4  ;;  %v2371_v51 = vrot.slane %v2366_v13, 4 }
 0xe92   :  { %v2710_v9 = vsel %vm1060_vm5, %v4742_v35, 0.0 }
 0xe93   :  { %3517 = vpow2.f32 %v2694_v40  ;;  %2711 = vadd.xlane.f32.xlu0 %v2710_v9 }
 0xe96   :  { %v3443_v23 = vpop.permute.xlu2 %3442 }
 0xe97   :  { %v3445_v0 = vunpack.i.h.bf16 %v3443_v23  ;;  %v3444_v11 = vunpack.i.l.bf16 %v3443_v23 }
 0xe99   :  { %v4746_v20 = vpop.eup %3517  ;;  %v2417_v62 = vrot.slane %v3445_v0, 4  ;;  %v2349_v30 = vrot.slane %v3444_v11, 4 }
 0xe9a   :  { %v2713_v2 = vsel %vm1060_vm5, %v4746_v20, 0.0 }
 0xe9b   :  { %2714 = vadd.xlane.f32.xlu2 %v2713_v2 }
 0xe9e   :  { %v3438_v19 = vpop.permute.xlu1 %3437 }
 0xe9f   :  { %v3440_v27 = vunpack.i.h.bf16 %v3438_v19  ;;  %v3439_v44 = vunpack.i.l.bf16 %v3438_v19 }
 0xea1   :  { %v2415_v15 = vrot.slane %v3440_v27, 4  ;;  %v2347_v21 = vrot.slane %v3439_v44, 4  ;;  %v2350_v36 = vsel %vm262_vm3, %v3439_v44, %v2349_v30  ;;  %v2418_v39 = vsel %vm262_vm3, %v3440_v27, %v2417_v62 }
 0xea2   :  { %v2358_v6 = vperm.slane %v2350_v36, %v3862_v37  ;;  %v2426_v8 = vperm.slane %v2418_v39, %v3862_v37 }
 0xea3   :  { %v2348_v12 = vsel %vm262_vm3, %v2347_v21, %v3444_v11  ;;  %v2416_v53 = vsel %vm262_vm3, %v2415_v15, %v3445_v0 }
 0xea4   :  { %v2354_v56 = vperm.slane %v2348_v12, %v3862_v37  ;;  %v2384_v57 = vsel %vm262_vm3, %v2383_v54, %v2358_v6  ;;  %v2385_v58 = vrot.slane %v2358_v6, 4  ;;  %v2422_v26 = vperm.slane %v2416_v53, %v3862_v37 }
 0xea5   :  { %v2390_v61 = vperm.slane %v2384_v57, %v3871_v45  ;;  %v2439_v16 = vrot.slane %v2426_v8, 4  ;;  %v2442_v63 = vsel %vm262_vm3, %v2426_v8, %v2441_v24 }
 0xea6   :  { %v2372_v1 = vsel %vm262_vm3, %v2371_v51, %v2354_v56  ;;  %v2373_v28 = vrot.slane %v2354_v56, 4  ;;  %v2386_v48 = vsel %vm262_vm3, %v2370_v14, %v2385_v58  ;;  %v2427_v22 = vrot.slane %v2422_v26, 4 }
 0xea7   :  { %v2378_v17 = vperm.slane %v2372_v1, %v3871_v45  ;;  %v2394_v40 = vperm.slane %v2386_v48, %v3871_v45  ;;  %v2399_v25 = vrot.slane %v2390_v61, 4  ;;  %v2430_v9 = vsel %vm262_vm3, %v2422_v26, %v2429_v43 }
 0xea8   :  { %v2374_v3 = vsel %vm262_vm3, %v2366_v13, %v2373_v28  ;;  %v2428_v49 = vsel %vm262_vm3, %v2427_v22, %v2410_v29  ;;  %v2438_v4 = vperm.slane %v2430_v9, %v3871_v45  ;;  %v2440_v46 = vsel %vm262_vm3, %v2439_v16, %v2414_v32 }
 0xea9   :  { %v2382_v7 = vperm.slane %v2374_v3, %v3871_v45  ;;  %v2395_v33 = vrot.slane %v2378_v17, 4  ;;  %v2401_v23 = vrot.slane %v2394_v40, 4  ;;  %v2434_v60 = vperm.slane %v2428_v49, %v3871_v45 }
 0xeaa   :  { %v2446_v18 = vperm.slane %v2440_v46, %v3871_v45  ;;  %v2450_v2 = vperm.slane %v2442_v63, %v3871_v45  ;;  %v2453_v52 = vrot.slane %v2438_v4, 4  ;;  %v2400_v41 = vsel %vm262_vm3, 0.0, %v2399_v25 }
 0xeab   :  { %v2397_v0 = vrot.slane %v2382_v7, 4  ;;  %v2402_v11 = vsel %vm262_vm3, 0.0, %v2401_v23  ;;  %v2451_v38 = vrot.slane %v2434_v60, 4  ;;  %v2396_v13 = vsel %vm262_vm3, 0.0, %v2395_v33 }
 0xeac   :  { %v2454_v32 = vsel %vm262_vm3, 0.0, %v2453_v52  ;;  %v2455_v14 = vrot.slane %v2446_v18, 4  ;;  %v2457_v19 = vrot.slane %v2450_v2, 4  ;;  %v2513_v62 = vsel %vm262_vm3, %v2453_v52, %v2434_v60 }
 0xead   :  { %v2398_v30 = vsel %vm262_vm3, 0.0, %v2397_v0  ;;  %v2518_v27 = vrot.slane %v2454_v32, 4  ;;  %v2452_v44 = vsel %vm262_vm3, 0.0, %v2451_v38  ;;  %v2517_v29 = vperm.slane %v2513_v62, %v3862_v37 }
 0xeae   :  { %v2458_v15 = vsel %vm262_vm3, 0.0, %v2457_v19  ;;  %v2456_v21 = vsel %vm262_vm3, 0.0, %v2455_v14  ;;  %v2524_v36 = vsel %vm262_vm3, %v2457_v19, %v2446_v18  ;;  %v2459_v39 = vsel %vm262_vm3, %v2397_v0, %v2378_v17 }
 0xeaf   :  { %v2529_v54 = vrot.slane %v2458_v15, 4  ;;  %v2519_v6 = vsel %vm262_vm3, %v2518_v27, %v2452_v44  ;;  %v2528_v8 = vperm.slane %v2524_v36, %v3862_v37  ;;  %v2537_v24 = vrot.slane %v2517_v29, 4 }
 0xeb0   :  { %v2523_v51 = vperm.slane %v2519_v6, %v3862_v37  ;;  %v2463_v12 = vperm.slane %v2459_v39, %v3862_v37  ;;  %v2464_v53 = vrot.slane %v2398_v30, 4  ;;  %v2470_v56 = vsel %vm262_vm3, %v2401_v23, %v2390_v61 }
 0xeb1   :  { %v2530_v57 = vsel %vm262_vm3, %v2529_v54, %v2456_v21  ;;  %v2549_v58 = vrot.slane %v2528_v8, 4  ;;  %v2474_v26 = vperm.slane %v2470_v56, %v3862_v37  ;;  %v2475_v43 = vrot.slane %v2402_v11, 4 }
 0xeb2   :  { %v2534_v16 = vperm.slane %v2530_v57, %v3862_v37  ;;  %v2538_v63 = vsel %vm262_vm3, %v2523_v51, %v2537_v24  ;;  %v2465_v1 = vsel %vm262_vm3, %v2464_v53, %v2396_v13  ;;  %v2483_v28 = vrot.slane %v2463_v12, 4 }
 0xeb3   :  { %v2546_v48 = vperm.slane %v2538_v63, %v3871_v45  ;;  %v2469_v22 = vperm.slane %v2465_v1, %v3862_v37  ;;  %v2476_v17 = vsel %vm262_vm3, %v2475_v43, %v2400_v41  ;;  %v2495_v61 = vrot.slane %v2474_v26, 4 }
 0xeb4   :  { %v2670_v40 = vpop.xlane.xlu0 %2669  ;;  %v2550_v25 = vsel %vm262_vm3, %v2534_v16, %v2549_v58  ;;  %v2480_v9 = vperm.slane %v2476_v17, %v3862_v37  ;;  %v2535_v3 = vrot.slane %v2523_v51, 4  ;;  %v2547_v49 = vrot.slane %v2534_v16, 4 }
 0xeb5   :  { %v2684_v4 = vsub.f32 %v4718_v10, %v2670_v40  ;;  %v2558_v46 = vperm.slane %v2550_v25, %v3871_v45  ;;  %v2565_v7 = vrot.slane %v2546_v48, 4  ;;  %v2484_v33 = vsel %vm262_vm3, %v2469_v22, %v2483_v28 }
 0xeb6   :  { %v2492_v23 = vperm.slane %v2484_v33, %v3871_v45  ;;  %v2496_v60 = vsel %vm262_vm3, %v2480_v9, %v2495_v61  ;;  %v2536_v18 = vsel %vm262_vm3, %v2535_v3, %v2517_v29  ;;  %v2481_v38 = vrot.slane %v2469_v22, 4 }
 0xeb7   :  { %v2696_v2 = vmul.f32 1.442695, %v2684_v4  ;;  %v2566_v52 = vsel %vm262_vm3, %v2558_v46, %v2565_v7  ;;  %v2504_v41 = vperm.slane %v2496_v60, %v3871_v45  ;;  %v2563_v11 = vrot.slane %v2558_v46, 4 }
 0xeb8   :  { %2776 = vmatpush.msra.mxu0 %v2566_v52  ;;  %v2511_v0 = vrot.slane %v2492_v23, 4  ;;  %v2542_v10 = vperm.slane %v2536_v18, %v3871_v45  ;;  %v2548_v13 = vsel %vm262_vm3, %v2547_v49, %v2528_v8  ;;  %v2493_v32 = vrot.slane %v2480_v9, 4 }
 0xeb9   :  { %3519 = vpow2.f32 %v2696_v2  ;;  %v2509_v19 = vrot.slane %v2504_v41, 4  ;;  %v2482_v62 = vsel %vm262_vm3, %v2481_v38, %v2463_v12  ;;  %v2564_v44 = vsel %vm262_vm3, %v2563_v11, %v2546_v48 }
 0xeba   :  { %v2512_v14 = vsel %vm262_vm3, %v2504_v41, %v2511_v0  ;;  %v2488_v30 = vperm.slane %v2482_v62, %v3871_v45  ;;  %v2494_v27 = vsel %vm262_vm3, %v2493_v32, %v2474_v26  ;;  %v2554_v29 = vperm.slane %v2548_v13, %v3871_v45 }
 0xebb   :  { %2777 = vmatpush.msra.mxu0 %v2512_v14  ;;  %v2561_v15 = vrot.slane %v2542_v10, 4  ;;  %v2510_v21 = vsel %vm262_vm3, %v2509_v19, %v2492_v23  ;;  %v2500_v36 = vperm.slane %v2494_v27, %v3871_v45 }
 0xebc   :  { %v2507_v39 = vrot.slane %v2488_v30, 4  ;;  %v2559_v24 = vrot.slane %v2554_v29, 4 }
 0xebd   :  { %2778 = vmatpush.msra.mxu0 %v2564_v44  ;;  %v2562_v6 = vsel %vm262_vm3, %v2554_v29, %v2561_v15  ;;  %v2505_v12 = vrot.slane %v2500_v36, 4 }
 0xebe   :  { %v2508_v51 = vsel %vm262_vm3, %v2500_v36, %v2507_v39  ;;  %v2560_v53 = vsel %vm262_vm3, %v2559_v24, %v2542_v10 }
 0xebf   :  { %v3520_v54 = vpop.eup %3519  ;;  %2779 = vmatpush.msra.mxu0 %v2510_v21  ;;  %v2506_v56 = vsel %vm262_vm3, %v2505_v12, %v2488_v30 }
 0xec0   :  { %v2716_v8 = vsel %vm1060_vm5, %v3520_v54, 0.0 }
 0xec1   :  { %2780 = vmatpush.msra.mxu0 %v2562_v6  ;;  %2717 = vadd.xlane.f32.xlu1 %v2716_v8 }
 0xec3   :  { %2781 = vmatpush.msra.mxu0 %v2508_v51 }
 0xec5   :  { %2782 = vmatpush.msra.mxu0 %v2560_v53 }
 0xec7   :  { %2783 = vmatpush.msra.mxu0 %v2506_v56 }
 0xec9   :  { %v2673_v57 = vpop.xlane.xlu1 %2672 }
 0xeca   :  { %v2685_v58 = vsub.f32 %v4722_v34, %v2673_v57 }
 0xecc   :  { %v2698_v26 = vmul.f32 1.442695, %v2685_v58 }
 0xece   :  { %3521 = vpow2.f32 %v2698_v26 }
 0xecf   :  { %v2676_v43 = vpop.xlane.xlu2 %2675 }
 0xed0   :  { %v2686_v16 = vsub.f32 %v4726_v55, %v2676_v43 }
 0xed2   :  { %v2700_v63 = vmul.f32 1.442695, %v2686_v16 }
 0xed4   :  { %v3522_v1 = vpop.eup %3521  ;;  %3523 = vpow2.f32 %v2700_v63 }
 0xed5   :  { %v2719_v28 = vsel %vm1060_vm5, %v3522_v1, 0.0 }
 0xed6   :  { %2720 = vadd.xlane.f32.xlu0 %v2719_v28 }
 0xed7   :  { %v2679_v48 = vpop.xlane.xlu2 %2678 }
 0xed8   :  { %v2687_v22 = vsub.f32 %v4730_v31, %v2679_v48 }
 0xeda   :  { %v3524_v17 = vpop.eup %3523  ;;  %v2702_v61 = vmul.f32 1.442695, %v2687_v22 }
 0xedb   :  { %v2722_v40 = vsel %vm1060_vm5, %v3524_v17, 0.0 }
 0xedc   :  { %3525 = vpow2.f32 %v2702_v61  ;;  %2723 = vadd.xlane.f32.xlu2 %v2722_v40 }
 0xee2   :  { %v3526_v34 = vpop.eup %3525 }
 0xee3   :  { %v2725_v25 = vsel %vm1060_vm5, %v3526_v34, 0.0 }
 0xee4   :  { %2726 = vadd.xlane.f32.xlu1 %v2725_v25 }
 0xef6   :  { %v2706_v55 = vpop.xlane.xlu0 %2705 }
 0xef7   :  { %3527 = vrcp.f32 %v2706_v55 }
 0xefd   :  { %v3528_v9 = vpop.eup %3527 }
 0xefe   :  { %v2736_v3 = vmul.f32 %v3528_v9, %v4734_v59  ;;  %v2709_v49 = vpop.xlane.xlu1 %2708 }
 0xeff   :  { %3529 = vrcp.f32 %v2709_v49 }
 0xf00   :  { %3360 = vmatmul.msk.f32.vlgmr.msra.gmra.mxu0 %vm1060_vm5, %v2736_v3 }
 0xf05   :  { %v3530_v31 = vpop.eup %3529 }
 0xf06   :  { %v2712_v4 = vpop.xlane.xlu0 %2711  ;;  %v2737_v46 = vmul.f32 %v3530_v31, %v4738_v42 }
 0xf07   :  { %3531 = vrcp.f32 %v2712_v4 }
 0xf08   :  { %3361 = vmatmul.msk.f32.gmra.mxu0 %vm1060_vm5, %v2737_v46 }
 0xf0d   :  { %v3532_v7 = vpop.eup %3531 }
 0xf0e   :  { %v2715_v33 = vpop.xlane.xlu2 %2714  ;;  %v2738_v23 = vmul.f32 %v3532_v7, %v4742_v35 }
 0xf0f   :  { %3533 = vrcp.f32 %v2715_v33 }
 0xf10   :  { %3362 = vmatmul.msk.f32.gmra.mxu0 %vm1060_vm5, %v2738_v23 }
 0xf15   :  { %v3534_v60 = vpop.eup %3533 }
 0xf16   :  { %v2739_v59 = vmul.f32 %v3534_v60, %v4746_v20 }
 0xf18   :  { %3363 = vmatmul.msk.f32.gmra.mxu0 %vm1060_vm5, %v2739_v59 }
 0xf34   :  { %v2718_v18 = vpop.xlane.xlu1 %2717 }
 0xf35   :  { %3535 = vrcp.f32 %v2718_v18 }
 0xf3b   :  { %v3536_v2 = vpop.eup %3535 }
 0xf3c   :  { %v2740_v52 = vmul.f32 %v3536_v2, %v3520_v54 }
 0xf3e   :  { %3364 = vmatmul.msk.f32.gmra.mxu0 %vm1060_vm5, %v2740_v52 }
 0xf49   :  { %v2721_v42 = vpop.xlane.xlu0 %2720 }
 0xf4a   :  { %3537 = vrcp.f32 %v2721_v42 }
 0xf4f   :  { %v2724_v41 = vpop.xlane.xlu2 %2723 }
 0xf50   :  { %v3538_v0 = vpop.eup %3537  ;;  %3539 = vrcp.f32 %v2724_v41 }
 0xf51   :  { %v2741_v35 = vmul.f32 %v3538_v0, %v3522_v1 }
 0xf53   :  { %3365 = vmatmul.msk.f32.gmra.mxu0 %vm1060_vm5, %v2741_v35 }
 0xf56   :  { %v3540_v11 = vpop.eup %3539 }
 0xf57   :  { %v2727_v10 = vpop.xlane.xlu1 %2726  ;;  %v2742_v20 = vmul.f32 %v3540_v11, %v3524_v17 }
 0xf58   :  { %3541 = vrcp.f32 %v2727_v10 }
 0xf5b   :  { %3366 = vmatmul.msk.f32.gmra.mxu0 %vm1060_vm5, %v2742_v20 }
 0xf5e   :  { %v3542_v38 = vpop.eup %3541 }
 0xf5f   :  { %v2743_v13 = vmul.f32 %v3542_v38, %v3526_v34 }
 0xf63   :  { %3367 = vmatmul.msk.f32.gmra.mxu0 %vm1060_vm5, %v2743_v13 }
 0xf7d   :  { %v2785_v32 = vpop.f32.mrf.mxu0 }
 0xf7e   :  { %v2811_v29 = vrot.slane %v2785_v32, 4 }
 0xf85   :  { %v2788_v14 = vpop.f32.mrf.mxu0 }
 0xf86   :  { %v2867_v39 = vrot.slane %v2788_v14, 4 }
 0xf8d   :  { %v2791_v19 = vpop.f32.mrf.mxu0 }
 0xf8e   :  { %v2823_v6 = vrot.slane %v2791_v19, 4 }
 0xf95   :  { %v2794_v62 = vpop.f32.mrf.mxu0 }
 0xf96   :  { %v2879_v9 = vrot.slane %v2794_v62, 4 }
 0xfbb   :  { %v2797_v30 = vpop.f32.mrf.mxu0 }
 0xfbc   :  { %v2809_v27 = vrot.slane %v2797_v30, 4  ;;  %v2812_v15 = vsel %vm262_vm3, %v2797_v30, %v2811_v29 }
 0xfbd   :  { %v2820_v54 = vperm.slane %v2812_v15, %v3862_v37 }
 0xfbe   :  { %v2810_v21 = vsel %vm262_vm3, %v2809_v27, %v2785_v32 }
 0xfbf   :  { %v2816_v8 = vperm.slane %v2810_v21, %v3862_v37  ;;  %v2847_v57 = vrot.slane %v2820_v54, 4 }
 0xfc1   :  { %v2835_v26 = vrot.slane %v2816_v8, 4 }
 0xfd0   :  { %v2800_v44 = vpop.f32.mrf.mxu0 }
 0xfd1   :  { %v2865_v36 = vrot.slane %v2800_v44, 4  ;;  %v2868_v24 = vsel %vm262_vm3, %v2800_v44, %v2867_v39 }
 0xfd2   :  { %v2876_v43 = vperm.slane %v2868_v24, %v3862_v37 }
 0xfd3   :  { %v2866_v12 = vsel %vm262_vm3, %v2865_v36, %v2788_v14 }
 0xfd4   :  { %v2872_v63 = vperm.slane %v2866_v12, %v3862_v37  ;;  %v2903_v49 = vrot.slane %v2876_v43, 4 }
 0xfd6   :  { %v2891_v3 = vrot.slane %v2872_v63, 4 }
 0xfd8   :  { %v2803_v51 = vpop.f32.mrf.mxu0 }
 0xfd9   :  { %v2821_v53 = vrot.slane %v2803_v51, 4  ;;  %v2824_v56 = vsel %vm262_vm3, %v2803_v51, %v2823_v6 }
 0xfda   :  { %v2832_v58 = vperm.slane %v2824_v56, %v3862_v37 }
 0xfdb   :  { %v2822_v16 = vsel %vm262_vm3, %v2821_v53, %v2791_v19 }
 0xfdc   :  { %v2828_v1 = vperm.slane %v2822_v16, %v3862_v37  ;;  %v2845_v28 = vrot.slane %v2832_v58, 4  ;;  %v2848_v48 = vsel %vm262_vm3, %v2832_v58, %v2847_v57 }
 0xfdd   :  { %v2856_v22 = vperm.slane %v2848_v48, %v3871_v45 }
 0xfde   :  { %v2833_v17 = vrot.slane %v2828_v1, 4  ;;  %v2836_v61 = vsel %vm262_vm3, %v2828_v1, %v2835_v26  ;;  %v2846_v40 = vsel %vm262_vm3, %v2845_v28, %v2820_v54 }
 0xfdf   :  { %v2844_v34 = vperm.slane %v2836_v61, %v3871_v45  ;;  %v2852_v25 = vperm.slane %v2846_v40, %v3871_v45  ;;  %v2863_v55 = vrot.slane %v2856_v22, 4 }
 0xfe0   :  { %v2834_v31 = vsel %vm262_vm3, %v2833_v17, %v2816_v8  ;;  %v2806_v4 = vpop.f32.mrf.mxu0 }
 0xfe1   :  { %v2840_v46 = vperm.slane %v2834_v31, %v3871_v45  ;;  %v2859_v7 = vrot.slane %v2844_v34, 4  ;;  %v2861_v33 = vrot.slane %v2852_v25, 4  ;;  %v2864_v23 = vsel %vm262_vm3, 0.0, %v2863_v55 }
 0xfe2   :  { %v2932_v60 = vsel %vm262_vm3, %v2863_v55, %v2852_v25  ;;  %v2937_v59 = vrot.slane %v2864_v23, 4  ;;  %v2877_v18 = vrot.slane %v2806_v4, 4  ;;  %v2880_v2 = vsel %vm262_vm3, %v2806_v4, %v2879_v9 }
 0xfe3   :  { %v2860_v52 = vsel %vm262_vm3, 0.0, %v2859_v7  ;;  %v2862_v42 = vsel %vm262_vm3, 0.0, %v2861_v33  ;;  %v2936_v41 = vperm.slane %v2932_v60, %v3862_v37  ;;  %v2888_v0 = vperm.slane %v2880_v2, %v3862_v37 }
 0xfe4   :  { %v2926_v35 = vrot.slane %v2860_v52, 4  ;;  %v2878_v11 = vsel %vm262_vm3, %v2877_v18, %v2794_v62  ;;  %v2857_v10 = vrot.slane %v2840_v46, 4  ;;  %v2921_v20 = vsel %vm262_vm3, %v2859_v7, %v2840_v46 }
 0xfe5   :  { %v2884_v38 = vperm.slane %v2878_v11, %v3862_v37  ;;  %v2901_v13 = vrot.slane %v2888_v0, 4  ;;  %v2904_v32 = vsel %vm262_vm3, %v2888_v0, %v2903_v49  ;;  %v2925_v14 = vperm.slane %v2921_v20, %v3862_v37 }
 0xfe6   :  { %v2912_v19 = vperm.slane %v2904_v32, %v3871_v45  ;;  %v2858_v30 = vsel %vm262_vm3, 0.0, %v2857_v10  ;;  %v2938_v27 = vsel %vm262_vm3, %v2937_v59, %v2862_v42  ;;  %v2957_v44 = vrot.slane %v2936_v41, 4 }
 0xfe7   :  { %v2889_v29 = vrot.slane %v2884_v38, 4  ;;  %v2892_v62 = vsel %vm262_vm3, %v2884_v38, %v2891_v3  ;;  %v2902_v15 = vsel %vm262_vm3, %v2901_v13, %v2876_v43  ;;  %v2927_v21 = vsel %vm262_vm3, %v2926_v35, %v2858_v30 }
 0xfe8   :  { %v2900_v36 = vperm.slane %v2892_v62, %v3871_v45  ;;  %v2908_v39 = vperm.slane %v2902_v15, %v3871_v45  ;;  %v2919_v54 = vrot.slane %v2912_v19, 4  ;;  %v2931_v6 = vperm.slane %v2927_v21, %v3862_v37 }
 0xfe9   :  { %v2890_v8 = vsel %vm262_vm3, %v2889_v29, %v2872_v63  ;;  %v2942_v24 = vperm.slane %v2938_v27, %v3862_v37  ;;  %v2945_v51 = vrot.slane %v2925_v14, 4 }
 0xfea   :  { %v2896_v12 = vperm.slane %v2890_v8, %v3871_v45  ;;  %v2915_v53 = vrot.slane %v2900_v36, 4  ;;  %v2917_v56 = vrot.slane %v2908_v39, 4  ;;  %v2920_v57 = vsel %vm262_vm3, 0.0, %v2919_v54  ;;  %v1786_v8 = vld [vmem:[#allocation7 + $0x68] sm:$0xff] }
 0xfeb   :  { %v2986_v58 = vsel %vm262_vm3, %v2919_v54, %v2908_v39  ;;  %v2991_v26 = vrot.slane %v2920_v57, 4  ;;  %v2946_v43 = vsel %vm262_vm3, %v2931_v6, %v2945_v51  ;;  %v2958_v16 = vsel %vm262_vm3, %v2942_v24, %v2957_v44 }
 0xfec   :  { %v2913_v1 = vrot.slane %v2896_v12, 4  ;;  %v2916_v28 = vsel %vm262_vm3, 0.0, %v2915_v53  ;;  %v2918_v63 = vsel %vm262_vm3, 0.0, %v2917_v56  ;;  %v2990_v48 = vperm.slane %v2986_v58, %v3862_v37 }
 0xfed   :  { %v2980_v22 = vrot.slane %v2916_v28, 4  ;;  %v2954_v17 = vperm.slane %v2946_v43, %v3871_v45  ;;  %v2966_v61 = vperm.slane %v2958_v16, %v3871_v45  ;;  %v2943_v40 = vrot.slane %v2931_v6, 4  ;;  %v1787_v6 = vld [vmem:[#allocation7 + $0xa8] sm:$0xff] }
 0xfee   :  { %v2955_v34 = vrot.slane %v2942_v24, 4  ;;  %v2914_v25 = vsel %vm262_vm3, 0.0, %v2913_v1  ;;  %v2975_v55 = vsel %vm262_vm3, %v2915_v53, %v2896_v12  ;;  %v2992_v9 = vsel %vm262_vm3, %v2991_v26, %v2918_v63  ;;  %v1785_v24 = vld [vmem:[#allocation7 + $0x28] sm:$0xff] }
 0xfef   :  { %v2971_v3 = vrot.slane %v2966_v61, 4  ;;  %v2973_v49 = vrot.slane %v2954_v17, 4  ;;  %v2944_v31 = vsel %vm262_vm3, %v2943_v40, %v2925_v14  ;;  %v2979_v4 = vperm.slane %v2975_v55, %v3862_v37 }
 0xff0   :  { %v2950_v46 = vperm.slane %v2944_v31, %v3871_v45  ;;  %v2956_v7 = vsel %vm262_vm3, %v2955_v34, %v2936_v41  ;;  %v2981_v33 = vsel %vm262_vm3, %v2980_v22, %v2914_v25  ;;  %v2996_v23 = vperm.slane %v2992_v9, %v3862_v37 }
 0xff1   :  { %v2972_v60 = vsel %vm262_vm3, %v2971_v3, %v2954_v17  ;;  %v2974_v59 = vsel %vm262_vm3, %v2966_v61, %v2973_v49  ;;  %v2962_v18 = vperm.slane %v2956_v7, %v3871_v45  ;;  %v2985_v2 = vperm.slane %v2981_v33, %v3862_v37 }
 0xff2   :  { %3039 = vrot.lane.b32.xlu2 %v2972_v60, %s3721_s12  ;;  %3047 = vrot.lane.b32.xlu1 %v2974_v59, %s3731_s22  ;;  %v2969_v52 = vrot.slane %v2950_v46, 4  ;;  %v2999_v42 = vrot.slane %v2979_v4, 4  ;;  %v3011_v0 = vrot.slane %v2990_v48, 4  ;;  %v3009_v41 = vrot.slane %v2996_v23, 4  ;;  %v1791_v59 = vld [vmem:[#allocation7 + $0xb0] sm:$0xff] }
 0xff3   :  { %v2967_v35 = vrot.slane %v2962_v18, 4  ;;  %v2997_v11 = vrot.slane %v2985_v2, 4 }
 0xff4   :  { %v2970_v10 = vsel %vm262_vm3, %v2962_v18, %v2969_v52  ;;  %v3000_v20 = vsel %vm262_vm3, %v2985_v2, %v2999_v42  ;;  %v3012_v38 = vsel %vm262_vm3, %v2996_v23, %v3011_v0  ;;  %v3010_v13 = vsel %vm262_vm3, %v3009_v41, %v2990_v48  ;;  %v3461_v48 = vld [vmem:[%s5005_s7 + $0xa] ss:$0 sm:$0xff]  ;;  %v1790_v18 = vld [vmem:[#allocation7 + $0x70] sm:$0xff] }
 0xff5   :  { %3031 = vrot.lane.b32.xlu0 %v2970_v10, %s3713_s14  ;;  %v3008_v37 = vperm.slane %v3000_v20, %v3871_v45  ;;  %v3020_v32 = vperm.slane %v3012_v38, %v3871_v45  ;;  %v2998_v14 = vsel %vm262_vm3, %v2997_v11, %v2979_v4  ;;  %v3016_v19 = vperm.slane %v3010_v13, %v3871_v45  ;;  %v1789_v42 = vld [vmem:[#allocation7 + $0x30] sm:$0xff]  ;;  %v1799_v11 = vld [vmem:[#allocation9 + $0x68] sm:$0xff]  ;;  %v1798_v20 = vld [vmem:[#allocation9 + $0x58] sm:$0xff] }
 0xff6   :  { %v3004_v30 = vperm.slane %v2998_v14, %v3871_v45  ;;  %v2968_v27 = vsel %vm262_vm3, %v2967_v35, %v2950_v46  ;;  %v1788_v45 = vld [vmem:[#allocation7 + $0xe8] sm:$0xff]  ;;  %v1800_v35 = vld [vmem:[#allocation9 + $0x78] sm:$0xff] }
 0xff7   :  { %v3025_v44 = vrot.slane %v3020_v32, 4  ;;  %v3021_v29 = vrot.slane %v3016_v19, 4  ;;  %v3027_v39 = vrot.slane %v3008_v37, 4  ;;  %3078 = vmatpush.msrb.mxu1 %v1788_v45  ;;  %3188 = vmatpush.msra.mxu2 %v1800_v35  ;;  %v3255_v35 = vld [vmem:[#allocation7 + $0x38] sm:$0xff] }
 0xff8   :  { %v3023_v62 = vrot.slane %v3004_v30, 4 }
 0xff9   :  { %v3026_v15 = vsel %vm262_vm3, %v3025_v44, %v3008_v37  ;;  %v3022_v21 = vsel %vm262_vm3, %v3021_v29, %v3004_v30  ;;  %v3028_v54 = vsel %vm262_vm3, %v3020_v32, %v3027_v39  ;;  %3079 = vmatpush.msrb.mxu1 %v1787_v6  ;;  %3189 = vmatpush.msra.mxu2 %v1799_v11  ;;  %v1797_v32 = vld [vmem:[#allocation9 + $0x48] sm:$0xff]  ;;  %v1796_v30 = vld [vmem:[#allocation9 + $0x38] sm:$0xff] }
 0xffa   :  { %3041 = vrot.lane.b32.xlu2 %v3026_v15, %s3721_s12  ;;  %v3024_v36 = vsel %vm262_vm3, %v3016_v19, %v3023_v62  ;;  %v3462_v29 = vld [vmem:[%s5005_s7 + $0xb] ss:$0 sm:$0xff] }
 0xffb   :  { %3080 = vmatpush.msrb.mxu1 %v1786_v8  ;;  %3190 = vmatpush.msra.mxu2 %v1798_v20 }
 0xffd   :  { %3033 = vrot.lane.b32.xlu0 %v3024_v36, %s3713_s14  ;;  %3081 = vmatpush.msrb.mxu1 %v1785_v24 }
 0xffe   :  { %3191 = vmatpush.msra.mxu2 %v1797_v32 }
0x1000   :  { %3192 = vmatpush.msra.mxu2 %v1796_v30 }
0x1005   :  { %3049 = vrot.lane.b32.xlu0 %v3028_v54, %s3731_s22 }
0x104c   :  { %v3040_v12 = vpop.permute.xlu2 %3039 }
0x1054   :  { %v3042_v16 = vpop.permute.xlu2 %3041 }
0x1064   :  { %v3048_v56 = vpop.permute.xlu1 %3047 }
0x1067   :  { %v3032_v51 = vpop.permute.xlu0 %3031 }
0x1068   :  { %v3053_v53 = vsel %vm970_vm4, %v2968_v27, %v3032_v51 }
0x1069   :  { %v3055_v57 = vsel %vm1460_vm6, %v3053_v53, %v3040_v12 }
0x106a   :  { %v3057_v58 = vsel %vm1463_vm7, %v3055_v57, %v3048_v56 }
0x106b   :  { %3368 = vmatmul.msk.f32.vlgmr.msrb.gmra.mxu1 %vm145_vm0, %v3057_v58  ;;  %v1795_v58 = vld [vmem:[#allocation9 + $0x28] sm:$0xff] }
0x106c   :  { %3193 = vmatpush.msra.mxu2 %v1795_v58 }
0x106f   :  { %v3034_v26 = vpop.permute.xlu0 %3033 }
0x1070   :  { %v3054_v43 = vsel %vm970_vm4, %v3022_v21, %v3034_v26  ;;  %v3463_v21 = vld [vmem:[%s5005_s7 + $0xc] ss:$0 sm:$0xff] }
0x1071   :  { %v3056_v28 = vsel %vm1460_vm6, %v3054_v43, %v3042_v16  ;;  %v1794_v26 = vld [vmem:[#allocation9 + $0x18] sm:$0xff]  ;;  %v1793_v43 = vld [vmem:[#allocation9 + $0x8] sm:$0xff] }
0x1072   :  { %3194 = vmatpush.msra.mxu2 %v1794_v26  ;;  %v3464_v16 = vld [vmem:[%s5005_s7 + $0xd] ss:$0 sm:$0xff] }
0x1074   :  { %3195 = vmatpush.msra.mxu2 %v1793_v43 }
0x1077   :  { %v3050_v1 = vpop.permute.xlu0 %3049 }
0x1078   :  { %v3058_v63 = vsel %vm1463_vm7, %v3056_v28, %v3050_v1 }
0x1079   :  { %3369 = vmatmul.msk.f32.gmra.mxu1 %vm145_vm0, %v3058_v63 }
0x10e8   :  { %v3083_v22 = vpop.f32.mrf.mxu1 }
0x10e9   :  { %v3084_v17 = vadd.f32 %v3461_v48, %v3083_v22 }
0x10eb   :  { %v3089_v61 = vadd.f32 %v3084_v17, %v4422_v47 }
0x10ed   :  { %v3091_v40 = vsel %vm145_vm0, %v3089_v61, 0.0 }
0x10ee   :  { %3092 = vadd.xlane.f32.xlu1 %v3091_v40 }
0x10f6   :  { %v3086_v34 = vpop.f32.mrf.mxu1 }
0x10f7   :  { %v3087_v25 = vadd.f32 %v3461_v48, %v3086_v34 }
0x10f9   :  { %v3090_v55 = vadd.f32 %v3087_v25, %v4426_v50  ;;  %v1792_v50 = vld [vmem:[#allocation7 + $0xf0] sm:$0xff] }
0x10fa   :  { %3160 = vmatpush.msra.mxu1 %v1792_v50 }
0x10fb   :  { %v3094_v9 = vsel %vm145_vm0, %v3090_v55, 0.0 }
0x10fc   :  { %3095 = vadd.xlane.f32.xlu2 %v3094_v9  ;;  %3161 = vmatpush.msra.mxu1 %v1791_v59 }
0x10fe   :  { %3162 = vmatpush.msra.mxu1 %v1790_v18 }
0x1100   :  { %3163 = vmatpush.msra.mxu1 %v1789_v42  ;;  %v3256_v42 = vld [vmem:[#allocation7 + $0x78] sm:$0xff] }
0x1161   :  { %v3093_v3 = vpop.xlane.xlu1 %3092 }
0x1162   :  { %v3097_v49 = vmul.f32 %v3093_v3, %v4367_v5 }
0x1164   :  { %v3099_v31 = vsub.f32 %v3089_v61, %v3097_v49  ;;  %v3465_v61 = vld [vmem:[%s5005_s7 + $0xe] ss:$0 sm:$0xff] }
0x1166   :  { %v3101_v4 = vmul.f32 %v3099_v31, %v3099_v31 }
0x1168   :  { %v3103_v46 = vsel %vm145_vm0, %v3101_v4, 0.0 }
0x1169   :  { %3104 = vadd.xlane.f32.xlu0 %v3103_v46 }
0x116f   :  { %v3096_v7 = vpop.xlane.xlu2 %3095 }
0x1170   :  { %v3098_v47 = vmul.f32 %v3096_v7, %v4367_v5 }
0x1172   :  { %v3100_v33 = vsub.f32 %v3090_v55, %v3098_v47 }
0x1174   :  { %v3102_v23 = vmul.f32 %v3100_v33, %v3100_v33 }
0x1176   :  { %v3106_v60 = vsel %vm145_vm0, %v3102_v23, 0.0 }
0x1177   :  { %3107 = vadd.xlane.f32.xlu1 %v3106_v60 }
0x11dc   :  { %v3105_v2 = vpop.xlane.xlu0 %3104 }
0x11dd   :  { %v3109_v52 = vmul.f32 %v3105_v2, %v4367_v5  ;;  %v3258_v2 = vld [vmem:[#allocation7 + $0xf8] sm:$0xff] }
0x11de   :  { %3279 = vmatpush.msrb.mxu1 %v3258_v2 }
0x11df   :  { %v3111_v0 = vadd.f32 1e-05, %v3109_v52  ;;  %v3257_v52 = vld [vmem:[#allocation7 + $0xb8] sm:$0xff] }
0x11e0   :  { %3280 = vmatpush.msrb.mxu1 %v3257_v52 }
0x11e1   :  { %3543 = vrsqrt.f32 %v3111_v0  ;;  %vm3119_vm4 = vweird.f32 %v3111_v0 }
0x11e2   :  { %3281 = vmatpush.msrb.mxu1 %v3256_v42 }
0x11e4   :  { %3282 = vmatpush.msrb.mxu1 %v3255_v35 }
0x11e7   :  { %v3544_v41 = vpop.eup %3543 }
0x11e8   :  { %v3114_v10 = vmul.f32 %v3544_v41, %v3111_v0  ;;  %vm3120_vm3 = vweird.f32 %v3544_v41 }
0x11e9   :  { %vm3121_vm6 = vmor %vm3119_vm4, %vm3120_vm3 }
0x11ea   :  { %v3115_v38 = vmul.f32 %v3544_v41, %v3114_v10  ;;  %v3108_v13 = vpop.xlane.xlu1 %3107 }
0x11eb   :  { %v3110_v37 = vmul.f32 %v3108_v13, %v4367_v5 }
0x11ec   :  { %v3116_v14 = vmul.f32 0.5, %v3115_v38 }
0x11ed   :  { %v3112_v19 = vadd.f32 1e-05, %v3110_v37 }
0x11ee   :  { %v3117_v27 = vsub.f32 1.5, %v3116_v14 }
0x11ef   :  { %3545 = vrsqrt.f32 %v3112_v19  ;;  %vm3129_vm2 = vweird.f32 %v3112_v19 }
0x11f0   :  { %v3118_v44 = vmul.f32 %v3544_v41, %v3117_v27  ;;  %v3466_v27 = vld [vmem:[%s5005_s7 + $0xf] ss:$0 sm:$0xff] }
0x11f2   :  { %v3122_v62 = vsel %vm3121_vm6, %v3544_v41, %v3118_v44 }
0x11f3   :  { %v3133_v15 = vmul.f32 %v3122_v62, %v3099_v31  ;;  %v3467_v62 = vld [vmem:[%s5005_s7 + $0x10] ss:$0 sm:$0xff] }
0x11f5   :  { %v3546_v36 = vpop.eup %3545  ;;  %v3136_v39 = vmul.f32 %v3462_v29, %v3133_v15 }
0x11f6   :  { %v3124_v54 = vmul.f32 %v3546_v36, %v3112_v19  ;;  %vm3130_vm7 = vweird.f32 %v3546_v36 }
0x11f7   :  { %v3139_v45 = vadd.f32 %v3463_v21, %v3136_v39  ;;  %vm3131_vm8 = vmor %vm3129_vm2, %vm3130_vm7 }
0x11f8   :  { %v3125_v6 = vmul.f32 %v3546_v36, %v3124_v54 }
0x11f9   :  { %3370 = vmatmul.msk.f32.vlgmr.msra.gmra.mxu1 %vm145_vm0, %v3139_v45 }
0x11fa   :  { %v3126_v8 = vmul.f32 0.5, %v3125_v6 }
0x11fc   :  { %v3127_v24 = vsub.f32 1.5, %v3126_v8 }
0x11fe   :  { %v3128_v51 = vmul.f32 %v3546_v36, %v3127_v24 }
0x1200   :  { %v3132_v12 = vsel %vm3131_vm8, %v3546_v36, %v3128_v51 }
0x1201   :  { %v3134_v53 = vmul.f32 %v3132_v12, %v3100_v33 }
0x1203   :  { %v3137_v56 = vmul.f32 %v3462_v29, %v3134_v53  ;;  %v3468_v53 = vld [vmem:[%s5005_s7 + $0x11] ss:$0 sm:$0xff] }
0x1205   :  { %v3140_v57 = vadd.f32 %v3463_v21, %v3137_v56 }
0x1207   :  { %3371 = vmatmul.msk.f32.gmra.mxu1 %vm145_vm0, %v3140_v57 }
0x1276   :  { %v3165_v1 = vpop.f32.mrf.mxu1 }
0x1277   :  { %v3166_v28 = vadd.f32 %v3464_v16, %v3165_v1 }
0x1279   :  { %v3171_v63 = vmax.f32 %v3166_v28, 0.0 }
0x127b   :  { %3372 = vmatmul.msk.f32.vlgmr.msra.gmra.mxu2 %vm1060_vm5, %v3171_v63 }
0x1284   :  { %v3168_v48 = vpop.f32.mrf.mxu1 }
0x1285   :  { %v3169_v22 = vadd.f32 %v3464_v16, %v3168_v48 }
0x1287   :  { %v3172_v17 = vmax.f32 %v3169_v22, 0.0 }
0x1289   :  { %3373 = vmatmul.msk.f32.gmra.mxu2 %vm1060_vm5, %v3172_v17 }
0x12fe   :  { %v3197_v40 = vpop.f32.mrf.mxu2 }
0x12ff   :  { %v3198_v34 = vadd.f32 %v3465_v61, %v3197_v40 }
0x1301   :  { %v3203_v25 = vadd.f32 %v3198_v34, %v3139_v45 }
0x1303   :  { %v3205_v55 = vsel %vm145_vm0, %v3203_v25, 0.0 }
0x1304   :  { %3206 = vadd.xlane.f32.xlu2 %v3205_v55 }
0x130c   :  { %v3200_v9 = vpop.f32.mrf.mxu2 }
0x130d   :  { %v3201_v3 = vadd.f32 %v3465_v61, %v3200_v9 }
0x130f   :  { %v3204_v49 = vadd.f32 %v3201_v3, %v3140_v57 }
0x1311   :  { %v3208_v31 = vsel %vm145_vm0, %v3204_v49, 0.0 }
0x1312   :  { %3209 = vadd.xlane.f32.xlu0 %v3208_v31 }
0x1377   :  { %v3207_v4 = vpop.xlane.xlu2 %3206 }
0x1378   :  { %v3211_v46 = vmul.f32 %v3207_v4, %v4367_v5 }
0x137a   :  { %v3213_v7 = vsub.f32 %v3203_v25, %v3211_v46 }
0x137c   :  { %v3215_v47 = vmul.f32 %v3213_v7, %v3213_v7 }
0x137e   :  { %v3217_v33 = vsel %vm145_vm0, %v3215_v47, 0.0 }
0x137f   :  { %3218 = vadd.xlane.f32.xlu1 %v3217_v33 }
0x1385   :  { %v3210_v23 = vpop.xlane.xlu0 %3209 }
0x1386   :  { %v3212_v60 = vmul.f32 %v3210_v23, %v4367_v5 }
0x1388   :  { %v3214_v50 = vsub.f32 %v3204_v49, %v3212_v60 }
0x138a   :  { %v3216_v59 = vmul.f32 %v3214_v50, %v3214_v50 }
0x138c   :  { %v3220_v18 = vsel %vm145_vm0, %v3216_v59, 0.0 }
0x138d   :  { %3221 = vadd.xlane.f32.xlu2 %v3220_v18 }
0x13f2   :  { %v3219_v0 = vpop.xlane.xlu1 %3218 }
0x13f3   :  { %v3223_v41 = vmul.f32 %v3219_v0, %v4367_v5 }
0x13f5   :  { %v3225_v11 = vadd.f32 1e-05, %v3223_v41 }
0x13f7   :  { %3547 = vrsqrt.f32 %v3225_v11  ;;  %vm3233_vm9 = vweird.f32 %v3225_v11 }
0x13fd   :  { %v3548_v10 = vpop.eup %3547 }
0x13fe   :  { %v3228_v20 = vmul.f32 %v3548_v10, %v3225_v11  ;;  %vm3234_vm5 = vweird.f32 %v3548_v10 }
0x13ff   :  { %vm3235_vm10 = vmor %vm3233_vm9, %vm3234_vm5 }
0x1400   :  { %v3229_v38 = vmul.f32 %v3548_v10, %v3228_v20  ;;  %v3222_v13 = vpop.xlane.xlu2 %3221 }
0x1401   :  { %v3224_v37 = vmul.f32 %v3222_v13, %v4367_v5 }
0x1402   :  { %v3230_v32 = vmul.f32 0.5, %v3229_v38 }
0x1403   :  { %v3226_v14 = vadd.f32 1e-05, %v3224_v37 }
0x1404   :  { %v3231_v19 = vsub.f32 1.5, %v3230_v32 }
0x1405   :  { %3549 = vrsqrt.f32 %v3226_v14  ;;  %vm3243_vm12 = vweird.f32 %v3226_v14 }
0x1406   :  { %v3232_v30 = vmul.f32 %v3548_v10, %v3231_v19 }
0x1408   :  { %v3236_v44 = vsel %vm3235_vm10, %v3548_v10, %v3232_v30 }
0x1409   :  { %v3247_v29 = vmul.f32 %v3236_v44, %v3213_v7 }
0x140b   :  { %v3550_v15 = vpop.eup %3549  ;;  %v3250_v5 = vmul.f32 %v3466_v27, %v3247_v29 }
0x140c   :  { %v3238_v21 = vmul.f32 %v3550_v15, %v3226_v14  ;;  %vm3244_vm11 = vweird.f32 %v3550_v15 }
0x140d   :  { %v3253_v36 = vadd.f32 %v3467_v62, %v3250_v5  ;;  %vm3245_vm13 = vmor %vm3243_vm12, %vm3244_vm11 }
0x140e   :  { %v3239_v39 = vmul.f32 %v3550_v15, %v3238_v21 }
0x140f   :  { %3374 = vmatmul.msk.f32.vlgmr.msrb.gmra.mxu1 %vm145_vm0, %v3253_v36 }
0x1410   :  { %v3240_v54 = vmul.f32 0.5, %v3239_v39 }
0x1412   :  { %v3241_v45 = vsub.f32 1.5, %v3240_v54 }
0x1414   :  { %v3242_v6 = vmul.f32 %v3550_v15, %v3241_v45 }
0x1416   :  { %v3246_v8 = vsel %vm3245_vm13, %v3550_v15, %v3242_v6 }
0x1417   :  { %v3248_v24 = vmul.f32 %v3246_v8, %v3214_v50 }
0x1419   :  { %v3251_v51 = vmul.f32 %v3466_v27, %v3248_v24 }
0x141b   :  { %v3254_v12 = vadd.f32 %v3467_v62, %v3251_v51 }
0x141d   :  { %3375 = vmatmul.msk.f32.gmra.mxu1 %vm145_vm0, %v3254_v12 }
0x148c   :  { %v3284_v56 = vpop.f32.mrf.mxu1 }
0x148d   :  { %v3285_v57 = vadd.f32 %v3468_v53, %v3284_v56 }
0x148f   :  { %3290 = vst [vmem:[%s5006_s8] sm:$0xff] %v3285_v57 }
0x149a   :  { %v3287_v58 = vpop.f32.mrf.mxu1 }
0x149b   :  { %v3288_v26 = vadd.f32 %v3468_v53, %v3287_v58 }
0x149d   :  { %3291 = vst [vmem:[%s5006_s8 + $0x8] sm:$0xff] %v3288_v26 }
0x149e   :  { %3296 = vsyncpa [#allocation3], 1 }
0x149f   :  { %3297 = vsyncpa [#allocation5], 1 }
0x14a0   :  { %3298 = vsyncpa [#allocation8], 1 }
0x14a1   :  { %3299 = vsyncpa [#allocation11], 1 }

</bundles_post_ra>
